<compile_context>
chip_gen: v7x
topology: tpu7x:2x2x1
jax: 0.10.0
libtpu: 0.0.40
codegen_flags: <defaults>
</compile_context>

<pallas_src>
import functools

import jax
import jax.numpy as jnp
from jax.experimental import pallas as pl
from jax.experimental.pallas import tpu as pltpu


def _linear_kernel(x_ref, w_ref, b_ref, o_ref, *, apply_relu):
    """o[i,j] = relu?(sum_k x[i,k] @ w[k,j] + b[j]).

    o_ref doubles as the f32 accumulator: its block index is constant along
    the k grid axis, so the tile stays resident in VMEM across the reduction.
    """
    k = pl.program_id(2)

    @pl.when(k == 0)
    def _():
        o_ref[...] = jnp.zeros_like(o_ref)

    o_ref[...] += jnp.dot(
        x_ref[...].astype(jnp.bfloat16),   # bf16 x bf16 on the MXU
        w_ref[...],
        preferred_element_type=jnp.float32,
    )

    @pl.when(k == pl.num_programs(2) - 1)
    def _():
        out = o_ref[...] + b_ref[...]
        if apply_relu:
            out = jnp.maximum(out, 0.0)
        o_ref[...] = out


def _largest_aligned_tile(dim, target, align):
    """Largest multiple of `align` that divides `dim` and is <= target.

    Falls back to the full dim (block dim == array dim is always legal), so
    dimensions like N=31 are never padded.
    """
    best = None
    t = align
    limit = min(dim, target)
    while t <= limit:
        if dim % t == 0:
            best = t
        t += align
    return best if best is not None else dim


def pallas_linear(x, w, b, *, apply_relu, tn_target=1024, tk_target=2048):
    """relu?(x @ w + b) as a single Pallas TPU matmul kernel.

    x: (M, K) f32, w: (K, N) bf16, b: (1, N) f32.  Tiles are exact divisors
    of K and N (no padding, no output slicing); the weight double-buffer
    stays within the smallest (v5e) default scoped-VMEM budget.
    """
    M, K = x.shape
    Kw, N = w.shape
    assert K == Kw and b.shape == (1, N)

    # Full-M block for small / unaligned batches (legal when block == dim).
    tm = 8 if (M % 8 == 0) else M
    tk = _largest_aligned_tile(K, tk_target, 128)
    tn = _largest_aligned_tile(N, tn_target, 128)

    grid = (M // tm, N // tn, K // tk)

    kernel = functools.partial(_linear_kernel, apply_relu=apply_relu)

    w_bytes = K * N * jnp.dtype(w.dtype).itemsize
    cost = pl.CostEstimate(
        flops=2 * M * K * N,
        transcendentals=0,
        bytes_accessed=M * K * 4 + w_bytes + N * 4 + M * N * 4,
    )

    return pl.pallas_call(
        kernel,
        out_shape=jax.ShapeDtypeStruct((M, N), jnp.float32),
        grid_spec=pltpu.PrefetchScalarGridSpec(
            num_scalar_prefetch=0,
            grid=grid,
            in_specs=[
                pl.BlockSpec((tm, tk), lambda i, j, k: (i, k)),   # activations
                pl.BlockSpec((tk, tn), lambda i, j, k: (k, j)),   # bf16 weights
                pl.BlockSpec((1, tn), lambda i, j, k: (0, j)),    # bias
            ],
            out_specs=pl.BlockSpec((tm, tn), lambda i, j, k: (i, j)),
        ),
        compiler_params=pltpu.CompilerParams(
            dimension_semantics=("parallel", "parallel", "arbitrary"),
        ),
        cost_estimate=cost,
    )(x, w, b)


def init_classifier_vgg_params(key, num_classes=31):
    """nn.Linear-style init (uniform +/- 1/sqrt(fan_in)).

    Weights are stored as (in_features, out_features) bf16 so the kernel can
    stream them directly at half the HBM bytes; biases stay f32 as (1, out).
    """
    dims = [(512 * 7 * 7, 4096), (4096, 4096), (4096, num_classes)]
    params = []
    for fan_in, fan_out in dims:
        key, kw, kb = jax.random.split(key, 3)
        bound = 1.0 / jnp.sqrt(jnp.float32(fan_in))
        w = jax.random.uniform(
            kw, (fan_in, fan_out), jnp.float32, minval=-bound, maxval=bound
        ).astype(jnp.bfloat16)
        b = jax.random.uniform(
            kb, (1, fan_out), jnp.float32, minval=-bound, maxval=bound
        )
        params.append((w, b))
    return params


def classifier_vgg_forward(x, params):
    """x: (B, 25088) -> (B, num_classes). Dropout = identity (eval mode)."""
    (w1, b1), (w2, b2), (w3, b3) = params
    h = pallas_linear(x, w1, b1, apply_relu=True)      # Linear + ReLU (+Dropout=id)
    h = pallas_linear(h, w2, b2, apply_relu=True)      # Linear + ReLU (+Dropout=id)
    return pallas_linear(h, w3, b3, apply_relu=False)  # final Linear


if __name__ == "__main__":
    key = jax.random.PRNGKey(0)
    k_params, k_x = jax.random.split(key)

    num_classes = 31
    batch = 2
    in_features = 512 * 7 * 7  # 25088, fixed by the module definition

    params = init_classifier_vgg_params(k_params, num_classes=num_classes)
    x = jax.random.normal(k_x, (batch, in_features), jnp.float32)

    out = jax.block_until_ready(classifier_vgg_forward(x, params))
    assert out.shape == (batch, num_classes)

    # Reference mirroring the kernel's dtype strategy: bf16 operands on the
    # MXU, f32 accumulation, f32 bias / ReLU.
    ref = x
    for i, (w, b) in enumerate(params):
        ref = jnp.dot(
            ref.astype(jnp.bfloat16), w, preferred_element_type=jnp.float32
        ) + b
        if i < 2:
            ref = jnp.maximum(ref, 0.0)

    assert jnp.allclose(out, ref, atol=2e-2, rtol=2e-2), float(
        jnp.max(jnp.abs(out - ref))
    )

    print("KERNEL_OK")
</pallas_src>

<mosaic_0001>
module attributes {stable_mosaic.version = 11 : i64} {
  func.func @_linear_kernel(%arg0: i32, %arg1: i32, %arg2: i32, %arg3: memref<2x1792xf32, #tpu.memory_space<vmem>>, %arg4: memref<1792x1024xbf16, #tpu.memory_space<vmem>>, %arg5: memref<1x1024xf32, #tpu.memory_space<vmem>>, %arg6: memref<2x1024xf32, #tpu.memory_space<vmem>>) attributes {dimension_semantics = [#tpu.dimension_semantics<parallel>, #tpu.dimension_semantics<parallel>, #tpu.dimension_semantics<arbitrary>], iteration_bounds = array<i64: 1, 4, 14>, scalar_prefetch = 0 : i64, scratch_operands = 0 : i64, tpu.core_type = #tpu.core_type<tc>, window_params = [{transform_indices = @transform_0, window_bounds = array<i64: 2, 1792>}, {transform_indices = @transform_1, window_bounds = array<i64: 1792, 1024>}, {transform_indices = @transform_2, window_bounds = array<i64: 1, 1024>}, {transform_indices = @transform_3, window_bounds = array<i64: 2, 1024>}]} {
    %c0_i32 = arith.constant 0 : i32
    %0 = arith.cmpi eq, %arg2, %c0_i32 : i32
    %1 = arith.extui %0 : i1 to i32
    %c0_i32_0 = arith.constant 0 : i32
    %2 = arith.cmpi ne, %1, %c0_i32_0 : i32
    scf.if %2 {
      %cst_9 = arith.constant 0.000000e+00 : f32
      %13 = vector.broadcast %cst_9 : f32 to vector<2x1024xf32>
      %c0_10 = arith.constant 0 : index
      %c0_11 = arith.constant 0 : index
      %14 = vector.load %arg6[%c0_10, %c0_11] : memref<2x1024xf32, #tpu.memory_space<vmem>>, vector<2x1024xf32>
      tpu.vector_store %arg6[%c0_10, %c0_11], %13 {strides = array<i32>} : memref<2x1024xf32, #tpu.memory_space<vmem>>, vector<2x1024xf32>,
    } else {
    }
    %c0 = arith.constant 0 : index
    %c0_1 = arith.constant 0 : index
    %3 = vector.load %arg6[%c0, %c0_1] : memref<2x1024xf32, #tpu.memory_space<vmem>>, vector<2x1024xf32>
    %c0_2 = arith.constant 0 : index
    %c0_3 = arith.constant 0 : index
    %4 = vector.load %arg3[%c0_2, %c0_3] : memref<2x1792xf32, #tpu.memory_space<vmem>>, vector<2x1792xf32>
    %5 = arith.truncf %4 : vector<2x1792xf32> to vector<2x1792xbf16>
    %c0_4 = arith.constant 0 : index
    %c0_5 = arith.constant 0 : index
    %6 = vector.load %arg4[%c0_4, %c0_5] : memref<1792x1024xbf16, #tpu.memory_space<vmem>>, vector<1792x1024xbf16>
    %cst = arith.constant dense<0.000000e+00> : vector<2x1024xf32>
    %7 = tpu.matmul %5, %6, %cst {dimension_numbers = #tpu.dot_dimension_numbers<[1], [0], [0], [1], [0, 0, 1, 1], [], []>} : vector<2x1792xbf16>, vector<1792x1024xbf16>, vector<2x1024xf32> -> vector<2x1024xf32>
    %8 = arith.addf %3, %7 : vector<2x1024xf32>
    %c0_6 = arith.constant 0 : index
    %c0_7 = arith.constant 0 : index
    %9 = vector.load %arg6[%c0_6, %c0_7] : memref<2x1024xf32, #tpu.memory_space<vmem>>, vector<2x1024xf32>
    tpu.vector_store %arg6[%c0_6, %c0_7], %8 {strides = array<i32>} : memref<2x1024xf32, #tpu.memory_space<vmem>>, vector<2x1024xf32>,
    %c13_i32 = arith.constant 13 : i32
    %10 = arith.cmpi eq, %arg2, %c13_i32 : i32
    %11 = arith.extui %10 : i1 to i32
    %c0_i32_8 = arith.constant 0 : i32
    %12 = arith.cmpi ne, %11, %c0_i32_8 : i32
    scf.if %12 {
      %c0_9 = arith.constant 0 : index
      %c0_10 = arith.constant 0 : index
      %13 = vector.load %arg6[%c0_9, %c0_10] : memref<2x1024xf32, #tpu.memory_space<vmem>>, vector<2x1024xf32>
      %c0_11 = arith.constant 0 : index
      %c0_12 = arith.constant 0 : index
      %14 = vector.load %arg5[%c0_11, %c0_12] : memref<1x1024xf32, #tpu.memory_space<vmem>>, vector<1x1024xf32>
      %15 = vector.broadcast %14 : vector<1x1024xf32> to vector<2x1024xf32>
      %16 = arith.addf %13, %15 : vector<2x1024xf32>
      %cst_13 = arith.constant 0.000000e+00 : f32
      %17 = vector.broadcast %cst_13 : f32 to vector<2x1024xf32>
      %18 = arith.maximumf %16, %17 : vector<2x1024xf32>
      %c0_14 = arith.constant 0 : index
      %c0_15 = arith.constant 0 : index
      %19 = vector.load %arg6[%c0_14, %c0_15] : memref<2x1024xf32, #tpu.memory_space<vmem>>, vector<2x1024xf32>
      tpu.vector_store %arg6[%c0_14, %c0_15], %18 {strides = array<i32>} : memref<2x1024xf32, #tpu.memory_space<vmem>>, vector<2x1024xf32>,
    } else {
    }
    return
  }
  func.func @transform_0(%arg0: i32, %arg1: i32, %arg2: i32) -> (i32, i32) {
    %c0_i32 = arith.constant 0 : i32
    return %arg0, %arg2 : i32, i32
  }
  func.func @transform_1(%arg0: i32, %arg1: i32, %arg2: i32) -> (i32, i32) {
    %c0_i32 = arith.constant 0 : i32
    return %arg2, %arg1 : i32, i32
  }
  func.func @transform_2(%arg0: i32, %arg1: i32, %arg2: i32) -> (i32, i32) {
    %c0_i32 = arith.constant 0 : i32
    %c0_i32_0 = arith.constant 0 : i32
    return %c0_i32, %arg1 : i32, i32
  }
  func.func @transform_3(%arg0: i32, %arg1: i32, %arg2: i32) -> (i32, i32) {
    %c0_i32 = arith.constant 0 : i32
    return %arg0, %arg1 : i32, i32
  }
}

</mosaic_0001>

<bundles_post_ra>
// kernel: tpu_custom_call.1
= control target key start
LH: loop header
LB: loop body
LE: loop exit
PB: predicated region body
PF: predicated region fallthrough
CT: control target
= control target key end

     0   :  { %s10132_s0 = inlined_call_operand.hbm [shape: f32[2,25088], index: 0, kind: input, shape index: {}]   ;;  %s10133_s1 = inlined_call_operand.hbm [shape: bf16[25088,4096], index: 1, kind: input, shape index: {}]   ;;  %s10134_s2 = inlined_call_operand.hbm [shape: f32[1,4096], index: 2, kind: input, shape index: {}]   ;;  %s10135_s3 = inlined_call_operand.hbm [shape: f32[2,4096], index: 3, kind: output, shape index: {}]  }
   0x1   :  { %10148 = sst [smem:[#allocation19_spill]] %s10132_s0 }
   0x2   :  { %10149 = sst [smem:[#allocation20_spill]] %s10133_s1 }
   0x3   :  { %10150 = sst [smem:[#allocation21_spill]] %s10135_s3 }
   0x4   :  { %8 = vsyncpa [#allocation3], 0 }
   0x5   :  { %10 = vsyncpa [#allocation3 + $0x1], 0 }
   0x6   :  { %11 = vsyncpa [#allocation6], 0 }
   0x7   :  { %13 = vsyncpa [#allocation6 + $0x1], 0 }
   0x8   :  { %14 = vsyncpa [#allocation4], 0 }
   0x9   :  { %16 = vsyncpa [#allocation4 + $0x1], 0  ;;  %s8648_s12 = smov 0   ;;  %s8650_s13 = smov 0  }
   0xa   :  { %s8652_s14 = smov 0   ;;  %s8654_s15 = smov 0  }
   0xb   :  { %s8656_s16 = smov 0   ;;  %s8658_s17 = smov 0  }
   0xc   :  { %s8660_s18 = smov 0   ;;  %s8662_s19 = smov 0  }
   0xd   :  { %s8664_s20 = smov 0   ;;  %s8666_s21 = smov 0  }
   0xe   :  { %s8668_s22 = smov 0   ;;  %s8670_s23 = smov 0  }
   0xf   :  { %s8672_s24 = smov 0   ;;  %s8674_s25 = smov 0  }
  0x10 LB: > { %10151 = sst [smem:[#allocation13_spill]] %s8597_s20  ;;  %p10138_p0 = scmp.eq.s32.totalorder %s8617_s25, 0  ;;  %s8617_s25 = sphi %s8674_s25, %s22_s25   ;;  %s8613_s24 = sphi %s8672_s24, %s10203_s24   ;;  %s8609_s23 = sphi %s8670_s23, %s10202_s23   ;;  %s8605_s22 = sphi %s8668_s22, %s10190_s22   ;;  %s8601_s21 = sphi %s8666_s21, %s10201_s21   ;;  %s8597_s20 = sphi %s8664_s20, %s10189_s20   ;;  %s8593_s19 = sphi %s8662_s19, %s10200_s19   ;;  %s8589_s18 = sphi %s8660_s18, %s10199_s18   ;;  %s8585_s17 = sphi %s8658_s17, %s10198_s17   ;;  %s8581_s16 = sphi %s8656_s16, %s10197_s16   ;;  %s8577_s15 = sphi %s8654_s15, %s10196_s15   ;;  %s8573_s14 = sphi %s8652_s14, %s10195_s14   ;;  %s8569_s13 = sphi %s8650_s13, %s10194_s13   ;;  %s8565_s12 = sphi %s8648_s12, %s10193_s12  }
  0x11   : > { %10152 = sst [smem:[#allocation14_spill]] %s8605_s22  ;;  %p85_p1 = scmp.ne.s32.totalorder %s8585_s17, %s8581_s16 }
  0x12   : > { %10153 = sst [smem:[#allocation15_spill]] %s8613_s24  ;;  %p10137_p4 = scmp.lt.s32.totalorder %s8617_s25, 56 }
  0x13   : > { %p87_p3 = por %p85_p1, %p10138_p0  ;;  %s190_s28 = sand.u32 1, %s8617_s25  }
  0x14   : > { %s192_s29 = sand.u32 1, %s8585_s17   ;;  %s7212_s4 = sshll.u32 %s8613_s24, 3 }
  0x15   : > { %s8226_s30 = smul.u32 7168, %s192_s29  ;;  %p8734_p5 = pnand %p10137_p4, %p87_p3 }
  0x16   : > { %s8126_s5 = smul.u32 7168, %s8609_s23  ;;  %s10155_s1 = sld [smem:[#allocation20_spill]] }
  0x17   : > { %s194_s8 = scalar_lea.vmem [#allocation5], %s8226_s30  ;;  %p7218_p6 = scmp.ge.s32.totalorder %s8617_s25, 1 }
  0x18   : > { %s201_s7 = sadd.s32 %s8126_s5, %s7212_s4  ;;  %s204_s9 = sshll.u32 %s194_s8, 4  ;;  %s8738_s9 = int_to_ptr.vmem [resolvable:$true] %s204_s9 }
  0x19   : > { %s7214_s10 = sshll.u32 %s201_s7, 6  ;;  %s8746_s29 = scalar_lea.sflag [#allocation6], %s190_s28 }
  0x1a   : > { %p8375_p8 = pneg %p8734_p5 }
  0x1c   : > { %s8743_s26 = scalar_lea.hbm %s10155_s1, %s7214_s10  ;;  %s8378_s27 = scalar_lea.hbm %s10155_s1, 6422528 }
  0x1d   : > { %s8373_s3 = scalar_lea.hbm %s8743_s26, 114688  ;;  %p8379_p11 = scmp.lt.u32.totalorder %s8743_s26, %s10155_s1 }
  0x1e   : > { %p8374_p7 = scmp.ne.s32.totalorder %s8743_s26, %s8373_s3  ;;  %p8380_p12 = scmp.lt.u32.totalorder %s8378_s27, %s8373_s3 }
  0x1f   : > { %p8382_p1 = scmp.lt.u32.totalorder %s8373_s3, %s8743_s26 }
  0x20   : > { %p8376_p9 = pnand %p8375_p8, %p8374_p7  ;;  %p8381_p13 = por %p8380_p12, %p8379_p11 }
  0x22   : > { %p8377_p10 = pneg %p8376_p9  ;;  %p8383_p3 = por %p8382_p1, %p8381_p13 }
  0x24   : > { %p8384_p4 = pnand %p8383_p3, %p8377_p10 }
  0x26   : > { %8387 = shalt.err (!%p8384_p4)
}
  0x27   : > { %s8388_s28 = scalar_lea.vmem %s8738_s9, 114688  ;;  %s8619_s8 = smov [#allocation5]  }
  0x28   : > { %p8389_p7 = scmp.ne.s32.totalorder %s8738_s9, %s8388_s28  ;;  %s8393_s10 = sshll.u32 %s8619_s8, 4  ;;  %s8394_s10 = int_to_ptr.vmem [resolvable:$false] %s8393_s10 }
  0x29   : > { %s8395_s11 = scalar_lea.vmem %s8394_s10, 229376  ;;  %p8396_p0 = scmp.lt.s32.totalorder %s8738_s9, %s8394_s10 }
  0x2a   : > { %p8391_p9 = pnand %p8389_p7, %p8375_p8  ;;  %p8397_p11 = scmp.lt.s32.totalorder %s8395_s11, %s8388_s28 }
  0x2c   : > { %p8392_p2 = pneg %p8391_p9  ;;  %p8398_p12 = por %p8397_p11, %p8396_p0 }
  0x2e   : > { %p8399_p13 = pnand %p8398_p12, %p8392_p2 }
  0x30   : > { %8402 = shalt.err (!%p8399_p13)
}
  0x31   : > { %s8620_s3 = smov 2048   ;;  %s8621_s30 = smov 512  }
  0x32   : > { %s8622_s4 = smov 32   ;;  %p231_p0 = scmp.lt.s32.totalorder %s8617_s25, 57 }
  0x33   : > { %8243 = dma.hbm_to_vmem [thread:$0]  (!%p8734_p5), %s8743_s26, 114688, %s8738_s9, %s8746_s29, %s8620_s3, %s8621_s30, %s8622_s4  }
  0x34   : > { %p8777_p2 = pnand %p7218_p6, %p231_p0  ;;  %s8782_s5 = sadd.s32 4294967295, %s8617_s25  }
  0x35   : > { %s34_s7 = sadd.s32 1, %s8609_s23  ;;  %s50_s28 = sadd.s32 1, %s8597_s20 }
  0x36   : > { %s10156_s27 = scalar_select %p8777_p2, 1, 0 }
  0x37   : > { %p35_p4 = scmp.ge.s32.totalorder %s34_s7, 14  ;;  %p57_p5 = scmp.ne.s32.totalorder %s8597_s20, %s8593_s19 }
  0x38   : > { %p63_p8 = scmp.ne.s32.totalorder %s8593_s19, %s8589_s18  ;;  %s10158_s26 = sadd.s32 1, %s8613_s24 }
  0x39   : > { %s10205_s7 = smov (%p35_p4, %s34_s7), 0  ;;  %s10207_s26 = smov (!%p35_p4, %s10158_s26), %s8613_s24 }
  0x3a   : > { %10157 = sst [smem:[#allocation16_spill]] %s10205_s7  ;;  %s46_s6 = ssub.s32 %s8609_s23, %s10205_s7 }
  0x3b   : > { %p10159_p6 = scmp.eq.s32.totalorder %s8617_s25, 0  ;;  %p39_p1 = scmp.ge.s32.totalorder %s10207_s26, 4 }
  0x3c   : > { %p48_p3 = scmp.eq.s32.totalorder %s46_s6, 0  ;;  %p10142_p7 = scmp.eq.s32.totalorder %s8782_s5, 0 }
  0x3d   : > { %p8799_p10 = por %p10159_p6, %p57_p5  ;;  %s169_s18 = sand.u32 1, %s8597_s20  }
  0x3e   : > { %s10209_s26 = smov (%p39_p1, %s10207_s26), 0  ;;  %p8812_p9 = por %p10142_p7, %p63_p8 }
  0x3f   : > { %10161 = sst [smem:[#allocation17_spill]] %s10209_s26  ;;  %s8818_s11 = ssub.s32 %s8613_s24, %s10209_s26 }
  0x40   : > { %s8808_s8 = scalar_select %p48_p3, %s8597_s20, %s50_s28  }
  0x41   : > { %s10163_s10 = scalar_select %p8812_p9, 1, 0 }
  0x42   : > { %10162 = sst [smem:[#allocation18_spill]] %s8808_s8  ;;  %s75_s3 = sor.u32 %s8818_s11, %s46_s6 }
  0x43   : > { %p10164_p11 = scmp.ne.s32.totalorder %s8581_s16, %s8577_s15  ;;  %p76_p13 = scmp.eq.s32.totalorder %s75_s3, 0 }
  0x44   : > { %s8225_s4 = smul.u32 28, %s169_s18  ;;  %p10166_p0 = scmp.lt.s32.totalorder %s8617_s25, 56 }
  0x45   : > { %p8826_p12 = por %p10164_p11, %p10142_p7  ;;  %s10168_s1 = sadd.s32 1, %s8585_s17 }
  0x46   : > { %p8834_p4 = pnand %p10166_p0, %p8799_p10  ;;  %s8125_s6 = smul.u32 448, %s8609_s23 }
  0x47   : > { %s10165_s30 = scalar_select %p8826_p12, 1, 0 }
  0x48   : > { %s8841_s26 = scalar_select %p76_p13, %s8585_s17, %s10168_s1  }
  0x49   : > { %s173_s7 = scalar_lea.vmem [#allocation2], %s8225_s4  ;;  %s10169_s0 = sld [smem:[#allocation19_spill]] }
  0x4a   : > { %s183_s15 = sshll.u32 %s173_s7, 4  ;;  %s170_s9 = scalar_lea.sflag [#allocation3], %s169_s18  ;;  %s8849_s15 = int_to_ptr.vmem [resolvable:$true] %s183_s15 }
  0x4b   : > { %p8405_p8 = pneg %p8834_p4 }
  0x4f   : > { %s8847_s22 = scalar_lea.hbm %s10169_s0, %s8125_s6  ;;  %s8408_s20 = scalar_lea.hbm %s10169_s0, 6272 }
  0x50   : > { %s8403_s3 = scalar_lea.hbm %s8847_s22, 448  ;;  %p8409_p1 = scmp.lt.u32.totalorder %s8847_s22, %s10169_s0 }
  0x51   : > { %p8404_p5 = scmp.ne.s32.totalorder %s8847_s22, %s8403_s3  ;;  %p8410_p3 = scmp.lt.u32.totalorder %s8408_s20, %s8403_s3 }
  0x52   : > { %p8412_p13 = scmp.lt.u32.totalorder %s8403_s3, %s8847_s22 }
  0x53   : > { %p8406_p6 = pnand %p8405_p8, %p8404_p5  ;;  %p8411_p11 = por %p8410_p3, %p8409_p1 }
  0x55   : > { %p8407_p10 = pneg %p8406_p6  ;;  %p8413_p0 = por %p8412_p13, %p8411_p11 }
  0x57   : > { %p8414_p7 = pnand %p8413_p0, %p8407_p10 }
  0x59   : > { %8417 = shalt.err (!%p8414_p7)
}
  0x5a   : > { %s8418_s18 = scalar_lea.vmem %s8849_s15, 448  ;;  %s8623_s6 = smov [#allocation2]  }
  0x5b   : > { %p8419_p5 = scmp.ne.s32.totalorder %s8849_s15, %s8418_s18  ;;  %s8423_s1 = sshll.u32 %s8623_s6, 4  ;;  %s8424_s1 = int_to_ptr.vmem [resolvable:$false] %s8423_s1 }
  0x5c   : > { %s8425_s7 = scalar_lea.vmem %s8424_s1, 896  ;;  %p8426_p9 = scmp.lt.s32.totalorder %s8849_s15, %s8424_s1 }
  0x5d   : > { %p8421_p6 = pnand %p8419_p5, %p8405_p8  ;;  %p8427_p1 = scmp.lt.s32.totalorder %s8425_s7, %s8418_s18 }
  0x5f   : > { %p8422_p12 = pneg %p8421_p6  ;;  %p8428_p3 = por %p8427_p1, %p8426_p9 }
  0x61   : > { %p8429_p11 = pnand %p8428_p3, %p8422_p12 }
  0x63   : > { %8432 = shalt.err (!%p8429_p11)
}
  0x64   : > { %8240 = dma.hbm_to_vmem [thread:$0]  (!%p8834_p4), %s8847_s22, 448, %s8849_s15, %s170_s9  }
  0x65   : > { %s7208_s3 = sadd.s32 4294967294, %s8617_s25   ;;  %p102_p7 = scmp.eq.s32.totalorder %s8818_s11, 0 }
  0x66   : > { %s104_s20 = sadd.s32 1, %s8573_s14  ;;  %p111_p9 = scmp.ne.s32.totalorder %s8573_s14, %s8569_s13 }
  0x67   : > { %s8882_s28 = scalar_select %p102_p7, %s8573_s14, %s104_s20  }
  0x68   : > { %p10170_p12 = scmp.eq.s32.totalorder %s8617_s25, 0  ;;  %p117_p10 = scmp.ne.s32.totalorder %s8569_s13, %s8565_s12 }
  0x69   : > { %p143_p13 = scmp.eq.s32.totalorder %s8782_s5, 55  ;;  %p149_p0 = scmp.eq.s32.totalorder %s7208_s3, 55 }
  0x6a   : > { %p8886_p8 = por %p111_p9, %p10170_p12  ;;  %p10172_p5 = scmp.eq.s32.totalorder %s8782_s5, 0 }
  0x6b   : > { %s216_s22 = sand.u32 1, %s8573_s14   ;;  %p8900_p4 = por %p143_p13, %p111_p9 }
  0x6c   : > { %p8895_p6 = por %p117_p10, %p10172_p5  ;;  %p8904_p1 = por %p149_p0, %p117_p10 }
  0x6d   : > { %s10174_s11 = scalar_select %p8900_p4, 1, 0 }
  0x6e   : > { %s10173_s4 = scalar_select %p8895_p6, 1, 0 }
  0x6f   : > { %s10175_s15 = scalar_select %p8904_p1, 1, 0 }
  0x70   : > { %s7215_s9 = sshll.u32 %s216_s22, 3  ;;  %s8127_s18 = sshll.u32 %s8613_s24, 7 }
  0x71   : > { %s8912_s7 = scalar_lea.hbm %s10134_s2, %s8127_s18  ;;  %s218_s3 = scalar_lea.vmem [#allocation7], %s7215_s9 }
  0x72   : > { %s226_s20 = sshll.u32 %s218_s3, 4  ;;  %p10176_p3 = scmp.lt.s32.totalorder %s8617_s25, 56  ;;  %s227_s20 = int_to_ptr.vmem [resolvable:$true] %s226_s20 }
  0x73   : > { %s8433_s22 = scalar_lea.hbm %s8912_s7, 128  ;;  %s8438_s8 = scalar_lea.hbm %s10134_s2, 512 }
  0x74   : > { %p8918_p11 = pnand %p10176_p3, %p8886_p8  ;;  %p8434_p7 = scmp.ne.s32.totalorder %s8912_s7, %s8433_s22 }
  0x75   : > { %p8439_p8 = scmp.lt.u32.totalorder %s8912_s7, %s10134_s2  ;;  %p8440_p13 = scmp.lt.u32.totalorder %s8438_s8, %s8433_s22 }
  0x76   : > { %p8435_p9 = pneg %p8918_p11  ;;  %p8442_p5 = scmp.lt.u32.totalorder %s8433_s22, %s8912_s7 }
  0x77   : > { %p8441_p0 = por %p8440_p13, %p8439_p8 }
  0x78   : > { %p8436_p12 = pnand %p8435_p9, %p8434_p7 }
  0x79   : > { %p8443_p3 = por %p8442_p5, %p8441_p0 }
  0x7a   : > { %p8437_p10 = pneg %p8436_p12 }
  0x7c   : > { %p8444_p1 = pnand %p8443_p3, %p8437_p10 }
  0x7e   : > { %8447 = shalt.err (!%p8444_p1)
}
  0x7f   : > { %s8448_s3 = scalar_lea.vmem %s227_s20, 128  ;;  %s8624_s24 = smov [#allocation7]  }
  0x80   : > { %p8449_p4 = scmp.ne.s32.totalorder %s227_s20, %s8448_s3  ;;  %s8453_s18 = sshll.u32 %s8624_s24, 4  ;;  %s8454_s18 = int_to_ptr.vmem [resolvable:$false] %s8453_s18 }
  0x81   : > { %s8455_s9 = scalar_lea.vmem %s8454_s18, 256  ;;  %p8456_p6 = scmp.lt.s32.totalorder %s227_s20, %s8454_s18 }
  0x82   : > { %p8451_p7 = pnand %p8449_p4, %p8435_p9  ;;  %p8457_p2 = scmp.lt.s32.totalorder %s8455_s9, %s8448_s3 }
  0x84   : > { %p8452_p12 = pneg %p8451_p7  ;;  %p8458_p8 = por %p8457_p2, %p8456_p6 }
  0x86   : > { %p8459_p13 = pnand %p8458_p8, %p8452_p12 }
  0x88   : > { %8462 = shalt.err (!%p8459_p13)
}
  0x89   : > { %8246 = dma.hbm_to_vmem [thread:$0]  (!%p8918_p11), %s8912_s7, 128, %s227_s20, %s8746_s29  }
  0x8a   : > { %p10178_p1 = scmp.ne.s32.totalorder %s10156_s27, 0 }
  0x8b   : > { %s237_s22 = sand.u32 (!%p10178_p1), 1, %s8593_s19   ;;  %p10179_p4 = scmp.ne.s32.totalorder (!%p10178_p1), %s10163_s10, 0 }
  0x8c   : > { %235 = sbr.rel (%p10178_p1) target bundleno = 1327 (0x52f), region = 32  ;;  %s238_s24 = scalar_lea.sflag (!%p10178_p1), [#allocation3], %s237_s22 }
  0x8d   : > { %s8227_s8 = smul.u32 (!%p10178_p1), 28, %s237_s22 }
  0x8f   : > { %s8947_s6 = scalar_lea.vmem (!%p10178_p1), [#allocation2], %s8227_s8 }
  0x93   : > { %8548 = dma.done.wait (%p10179_p4), %s238_s24, 448  }
  0x94   : > { %8550 = vsyncadd (%p10179_p4), %s238_s24, 4294966848  ;;  %s246_s0 = sand.u32 1, %s8782_s5   ;;  %s248_s29 = sand.u32 1, %s8581_s16  }
  0x95   : > { %s8228_s7 = smul.u32 7168, %s248_s29  ;;  %s247_s27 = scalar_lea.sflag [#allocation6], %s246_s0 }
  0x96   : > { %p10180_p2 = scmp.ne.s32.totalorder %s10165_s30, 0 }
  0x97   : > { %s8955_s20 = scalar_lea.vmem [#allocation5], %s8228_s7 }
  0x98   : > { %8552 = dma.done.wait (%p10180_p2), %s247_s27, 114688  }
  0x99   : > { %8554 = vsyncadd (%p10180_p2), %s247_s27, 4294852608  ;;  %s8962_s1 = sand.u32 1, %s8569_s13   ;;  %p10181_p6 = scmp.ne.s32.totalorder %s10173_s4, 0 }
  0x9a   : > { %s7219_s10 = sshll.u32 %s8962_s1, 3 }
  0x9b   : > { %s8965_s3 = scalar_lea.vmem [#allocation7], %s7219_s10 }
  0x9c   : > { %8556 = dma.done.wait (%p10181_p6), %s247_s27, 128  }
  0x9d   : > { %8558 = vsyncadd (%p10181_p6), %s247_s27, 4294967168  ;;  %s7220_s5 = sshll.u32 %s8962_s1, 4  ;;  %p7221_p11 = scmp.ne.s32.totalorder %s8601_s21, 0 }
  0x9e   : > { %s8972_s18 = scalar_lea.vmem [#allocation8], %s7220_s5  ;;  %v8625_v0 = vmov (!%p7221_p11), 0.0  }
  0x9f   : > { %300 = sbr.rel (%p7221_p11) target bundleno = 166 (0xa6), region = 48  ;;  %301 = vst [vmem:[%s8972_s18] sm:$0xff] (!%p7221_p11), %v8625_v0  ;;  %302 = vst [vmem:[%s8972_s18 + $0x8] sm:$0xff] (!%p7221_p11), %v8625_v0 }
  0xa6 PF: > { %v400_v1 = vld [vmem:[%s8955_s20] sm:$0xff]  ;;  %v401_v3 = vld [vmem:[%s8955_s20 + $0x8] sm:$0xff]  ;;  %v8626_v33 = vmov 1983009808   ;;  %v317_v35 = vlaneseq  ;;  %p8119_p9 = scmp.ne.s32.totalorder %s8601_s21, 13 }
  0xa7   : > { %v404_v2 = vld [vmem:[%s8955_s20 + $0x20] sm:$0xff]  ;;  %v405_v5 = vld [vmem:[%s8955_s20 + $0x28] sm:$0xff]  ;;  %v315_v34 = vunpack.c.l.s4 %v8626_v33 }
  0xa8   : > { %v7224_v4 = vcombine.high %v400_v1, %v404_v2  ;;  %v7223_v6 = vcombine.low %v400_v1, %v404_v2  ;;  %v408_v7 = vld [vmem:[%s8955_s20 + $0x40] sm:$0xff]  ;;  %v7226_v9 = vcombine.high %v401_v3, %v405_v5  ;;  %v7225_v10 = vcombine.low %v401_v3, %v405_v5  ;;  %v409_v12 = vld [vmem:[%s8955_s20 + $0x48] sm:$0xff] }
  0xa9   : > { %v412_v8 = vld [vmem:[%s8955_s20 + $0x60] sm:$0xff]  ;;  %v413_v13 = vld [vmem:[%s8955_s20 + $0x68] sm:$0xff]  ;;  %v316_v44 = vunpack.c.0.s8 %v315_v34  ;;  %v8999_v45 = vshrl.u32 %v317_v35, 7 }
  0xaa   : > { %v7232_v11 = vcombine.high %v408_v7, %v412_v8  ;;  %v416_v14 = vld [vmem:[%s8955_s20 + $0x80] sm:$0xff]  ;;  %5776 = vmatprep.subr.bf16.mxu0 %v7224_v4  ;;  %v7234_v15 = vcombine.high %v409_v12, %v413_v13  ;;  %v417_v17 = vld [vmem:[%s8955_s20 + $0x88] sm:$0xff]  ;;  %6063 = vmatprep.subr.bf16.mxu1 %v7226_v9  ;;  %v7231_v19 = vcombine.low %v408_v7, %v412_v8 }
  0xab   : > { %v420_v16 = vld [vmem:[%s8955_s20 + $0xa0] sm:$0xff]  ;;  %v421_v18 = vld [vmem:[%s8955_s20 + $0xa8] sm:$0xff]  ;;  %5777 = vmatpush1.bf16.msra.mxu0 %v7223_v6  ;;  %6064 = vmatpush1.bf16.msra.mxu1 %v7225_v10  ;;  %v7233_v20 = vcombine.low %v409_v12, %v413_v13  ;;  %v9006_v54 = vsub.s32 %v316_v44, %v8999_v45 }
  0xac   : > { %5778 = vmatprep.subr.bf16.mxu0 %v7232_v11  ;;  %v7240_v21 = vcombine.high %v416_v14, %v420_v16  ;;  %6065 = vmatprep.subr.bf16.mxu1 %v7234_v15  ;;  %v7242_v22 = vcombine.high %v417_v17, %v421_v18  ;;  %v424_v23 = vld [vmem:[%s8955_s20 + $0xc0] sm:$0xff]  ;;  %v425_v25 = vld [vmem:[%s8955_s20 + $0xc8] sm:$0xff]  ;;  %v7239_v27 = vcombine.low %v416_v14, %v420_v16 }
  0xad   : > { %v428_v24 = vld [vmem:[%s8955_s20 + $0xe0] sm:$0xff]  ;;  %v429_v26 = vld [vmem:[%s8955_s20 + $0xe8] sm:$0xff]  ;;  %v7241_v28 = vcombine.low %v417_v17, %v421_v18 }
  0xae   : > { %v7248_v29 = vcombine.high %v424_v23, %v428_v24  ;;  %v7250_v30 = vcombine.high %v425_v25, %v429_v26  ;;  %v432_v31 = vld [vmem:[%s8955_s20 + $0x100] sm:$0xff]  ;;  %v433_v36 = vld [vmem:[%s8955_s20 + $0x108] sm:$0xff]  ;;  %v7247_v38 = vcombine.low %v424_v23, %v428_v24  ;;  %v7249_v39 = vcombine.low %v425_v25, %v429_v26 }
  0xaf   : > { %5779 = vmatpush1.bf16.msra.mxu0 %v7231_v19  ;;  %6066 = vmatpush1.bf16.msra.mxu1 %v7233_v20  ;;  %v436_v32 = vld [vmem:[%s8955_s20 + $0x120] sm:$0xff]  ;;  %v437_v37 = vld [vmem:[%s8955_s20 + $0x128] sm:$0xff] }
  0xb0   : > { %5780 = vmatprep.subr.bf16.mxu0 %v7240_v21  ;;  %6067 = vmatprep.subr.bf16.mxu1 %v7242_v22  ;;  %v7256_v40 = vcombine.high %v432_v31, %v436_v32  ;;  %v7258_v41 = vcombine.high %v433_v36, %v437_v37  ;;  %v440_v42 = vld [vmem:[%s8955_s20 + $0x140] sm:$0xff]  ;;  %v441_v46 = vld [vmem:[%s8955_s20 + $0x148] sm:$0xff]  ;;  %v7255_v48 = vcombine.low %v432_v31, %v436_v32 }
  0xb1   : > { %v444_v43 = vld [vmem:[%s8955_s20 + $0x160] sm:$0xff]  ;;  %v445_v47 = vld [vmem:[%s8955_s20 + $0x168] sm:$0xff]  ;;  %v7257_v49 = vcombine.low %v433_v36, %v437_v37 }
  0xb2   : > { %v7264_v50 = vcombine.high %v440_v42, %v444_v43  ;;  %v7266_v51 = vcombine.high %v441_v46, %v445_v47  ;;  %v448_v52 = vld [vmem:[%s8955_s20 + $0x180] sm:$0xff]  ;;  %v449_v55 = vld [vmem:[%s8955_s20 + $0x188] sm:$0xff]  ;;  %v7263_v57 = vcombine.low %v440_v42, %v444_v43  ;;  %v7265_v58 = vcombine.low %v441_v46, %v445_v47 }
  0xb3   : > { %5781 = vmatpush1.bf16.msra.mxu0 %v7239_v27  ;;  %6068 = vmatpush1.bf16.msra.mxu1 %v7241_v28  ;;  %v452_v53 = vld [vmem:[%s8955_s20 + $0x1a0] sm:$0xff]  ;;  %v453_v56 = vld [vmem:[%s8955_s20 + $0x1a8] sm:$0xff] }
  0xb4   : > { %5782 = vmatprep.subr.bf16.mxu0 %v7248_v29  ;;  %6069 = vmatprep.subr.bf16.mxu1 %v7250_v30  ;;  %v7272_v59 = vcombine.high %v448_v52, %v452_v53  ;;  %v9011_v60 = vld [vmem:[%s8947_s6] sm:$0xff]  ;;  %v7274_v61 = vcombine.high %v449_v55, %v453_v56  ;;  %v7271_v3 = vcombine.low %v448_v52, %v452_v53 }
  0xb5   : > { %v456_v62 = vld [vmem:[%s8955_s20 + $0x1c0] sm:$0xff]  ;;  %v9017_v0 = vrot.slane %v9011_v60, %v9006_v54  ;;  %v457_v1 = vld [vmem:[%s8955_s20 + $0x1c8] sm:$0xff]  ;;  %v7273_v5 = vcombine.low %v449_v55, %v453_v56 }
  0xb6   : > { %v460_v63 = vld [vmem:[%s8955_s20 + $0x1e0] sm:$0xff]  ;;  %v461_v2 = vld [vmem:[%s8955_s20 + $0x1e8] sm:$0xff] }
  0xb7   : > { %5783 = vmatpush1.bf16.msra.mxu0 %v7247_v38  ;;  %6070 = vmatpush1.bf16.msra.mxu1 %v7249_v39  ;;  %v328_v4 = vcombine.high %v9017_v0, %v9017_v0  ;;  %v7280_v6 = vcombine.high %v456_v62, %v460_v63  ;;  %v7282_v7 = vcombine.high %v457_v1, %v461_v2  ;;  %v464_v8 = vld [vmem:[%s8955_s20 + $0x200] sm:$0xff]  ;;  %v465_v11 = vld [vmem:[%s8955_s20 + $0x208] sm:$0xff] }
  0xb8   : > { %5784 = vmatprep.subr.bf16.mxu0 %v7256_v40  ;;  %6071 = vmatprep.subr.bf16.mxu1 %v7258_v41  ;;  %v468_v9 = vld [vmem:[%s8955_s20 + $0x220] sm:$0xff]  ;;  %v469_v12 = vld [vmem:[%s8955_s20 + $0x228] sm:$0xff]  ;;  %v7279_v13 = vcombine.low %v456_v62, %v460_v63  ;;  %v7281_v14 = vcombine.low %v457_v1, %v461_v2 }
  0xb9   : > { %v9025_v10 = vpack.c.bf16 %v328_v4, %v328_v4  ;;  %v7288_v15 = vcombine.high %v464_v8, %v468_v9  ;;  %v7290_v16 = vcombine.high %v465_v11, %v469_v12  ;;  %v472_v17 = vld [vmem:[%s8955_s20 + $0x240] sm:$0xff]  ;;  %v473_v19 = vld [vmem:[%s8955_s20 + $0x248] sm:$0xff]  ;;  %v7287_v21 = vcombine.low %v464_v8, %v468_v9 }
  0xba   : > { %v476_v18 = vld [vmem:[%s8955_s20 + $0x260] sm:$0xff]  ;;  %v477_v20 = vld [vmem:[%s8955_s20 + $0x268] sm:$0xff]  ;;  %v7289_v22 = vcombine.low %v465_v11, %v469_v12 }
  0xbb   : > { %5785 = vmatpush1.bf16.msra.mxu0 %v7255_v48  ;;  %6072 = vmatpush1.bf16.msra.mxu1 %v7257_v49  ;;  %v7296_v23 = vcombine.high %v472_v17, %v476_v18  ;;  %v7298_v24 = vcombine.high %v473_v19, %v477_v20  ;;  %v480_v25 = vld [vmem:[%s8955_s20 + $0x280] sm:$0xff]  ;;  %v481_v27 = vld [vmem:[%s8955_s20 + $0x288] sm:$0xff]  ;;  %v7295_v29 = vcombine.low %v472_v17, %v476_v18 }
  0xbc   : > { %5786 = vmatprep.subr.bf16.mxu0 %v7264_v50  ;;  %6073 = vmatprep.subr.bf16.mxu1 %v7266_v51  ;;  %v484_v26 = vld [vmem:[%s8955_s20 + $0x2a0] sm:$0xff]  ;;  %v485_v28 = vld [vmem:[%s8955_s20 + $0x2a8] sm:$0xff]  ;;  %v7297_v30 = vcombine.low %v473_v19, %v477_v20 }
  0xbd   : > { %5808 = vmatprep.mubr.bf16.mxu0 %v9025_v10  ;;  %6095 = vmatprep.mubr.bf16.mxu1 %v9025_v10  ;;  %v7304_v31 = vcombine.high %v480_v25, %v484_v26  ;;  %v7306_v32 = vcombine.high %v481_v27, %v485_v28  ;;  %v488_v33 = vld [vmem:[%s8955_s20 + $0x2c0] sm:$0xff]  ;;  %v489_v35 = vld [vmem:[%s8955_s20 + $0x2c8] sm:$0xff]  ;;  %v7303_v37 = vcombine.low %v480_v25, %v484_v26 }
  0xbe   : > { %v492_v34 = vld [vmem:[%s8955_s20 + $0x2e0] sm:$0xff]  ;;  %v493_v36 = vld [vmem:[%s8955_s20 + $0x2e8] sm:$0xff]  ;;  %v7305_v38 = vcombine.low %v481_v27, %v485_v28  ;;  %v9074_v26 = vpack.c.bf16 %v9017_v0, %v9017_v0 }
  0xbf   : > { %5787 = vmatpush1.bf16.msra.mxu0 %v7263_v57  ;;  %6074 = vmatpush1.bf16.msra.mxu1 %v7265_v58  ;;  %v7312_v39 = vcombine.high %v488_v33, %v492_v34  ;;  %v7314_v40 = vcombine.high %v489_v35, %v493_v36  ;;  %v496_v41 = vld [vmem:[%s8955_s20 + $0x300] sm:$0xff]  ;;  %v497_v43 = vld [vmem:[%s8955_s20 + $0x308] sm:$0xff]  ;;  %v7311_v46 = vcombine.low %v488_v33, %v492_v34 }
  0xc0   : > { %5788 = vmatprep.subr.bf16.mxu0 %v7272_v59  ;;  %6075 = vmatprep.subr.bf16.mxu1 %v7274_v61  ;;  %v500_v42 = vld [vmem:[%s8955_s20 + $0x320] sm:$0xff]  ;;  %v501_v44 = vld [vmem:[%s8955_s20 + $0x328] sm:$0xff]  ;;  %v7313_v47 = vcombine.low %v489_v35, %v493_v36 }
  0xc1   : > { %v7320_v48 = vcombine.high %v496_v41, %v500_v42  ;;  %v7322_v49 = vcombine.high %v497_v43, %v501_v44  ;;  %v504_v50 = vld [vmem:[%s8955_s20 + $0x340] sm:$0xff]  ;;  %v505_v52 = vld [vmem:[%s8955_s20 + $0x348] sm:$0xff]  ;;  %v7319_v55 = vcombine.low %v496_v41, %v500_v42  ;;  %v7321_v56 = vcombine.low %v497_v43, %v501_v44 }
  0xc2   : > { %v508_v51 = vld [vmem:[%s8955_s20 + $0x360] sm:$0xff]  ;;  %v509_v53 = vld [vmem:[%s8955_s20 + $0x368] sm:$0xff] }
  0xc3   : > { %5789 = vmatpush1.bf16.msra.mxu0 %v7271_v3  ;;  %6076 = vmatpush1.bf16.msra.mxu1 %v7273_v5  ;;  %v7328_v57 = vcombine.high %v504_v50, %v508_v51  ;;  %v7330_v58 = vcombine.high %v505_v52, %v509_v53  ;;  %v512_v59 = vld [vmem:[%s8955_s20 + $0x380] sm:$0xff]  ;;  %v513_v62 = vld [vmem:[%s8955_s20 + $0x388] sm:$0xff]  ;;  %v7327_v1 = vcombine.low %v504_v50, %v508_v51 }
  0xc4   : > { %5790 = vmatprep.subr.bf16.mxu0 %v7280_v6  ;;  %6077 = vmatprep.subr.bf16.mxu1 %v7282_v7  ;;  %v516_v61 = vld [vmem:[%s8955_s20 + $0x3a0] sm:$0xff]  ;;  %v517_v63 = vld [vmem:[%s8955_s20 + $0x3a8] sm:$0xff]  ;;  %v7329_v2 = vcombine.low %v505_v52, %v509_v53  ;;  %v313_v7 = vcombine.high %v9011_v60, %v9011_v60 }
  0xc5   : > { %v7336_v3 = vcombine.high %v512_v59, %v516_v61  ;;  %v7338_v4 = vcombine.high %v513_v62, %v517_v63  ;;  %v520_v5 = vld [vmem:[%s8955_s20 + $0x3c0] sm:$0xff]  ;;  %v521_v8 = vld [vmem:[%s8955_s20 + $0x3c8] sm:$0xff]  ;;  %v7335_v11 = vcombine.low %v512_v59, %v516_v61  ;;  %v7337_v12 = vcombine.low %v513_v62, %v517_v63 }
  0xc6   : > { %v524_v6 = vld [vmem:[%s8955_s20 + $0x3e0] sm:$0xff]  ;;  %v525_v9 = vld [vmem:[%s8955_s20 + $0x3e8] sm:$0xff]  ;;  %v9064_v17 = vrot.slane %v313_v7, %v9006_v54 }
  0xc7   : > { %5791 = vmatpush1.bf16.msra.mxu0 %v7279_v13  ;;  %6078 = vmatpush1.bf16.msra.mxu1 %v7281_v14  ;;  %v7344_v13 = vcombine.high %v520_v5, %v524_v6  ;;  %v7346_v14 = vcombine.high %v521_v8, %v525_v9  ;;  %v529_v60 = vld [vmem:[%s8955_s20 + $0x408] sm:$0xff]  ;;  %v7343_v19 = vcombine.low %v520_v5, %v524_v6  ;;  %v544_v33 = vld [vmem:[%s8955_s20 + $0x480] sm:$0xff] }
  0xc8   : > { %5792 = vmatprep.subr.bf16.mxu0 %v7288_v15  ;;  %6079 = vmatprep.subr.bf16.mxu1 %v7290_v16  ;;  %v528_v15 = vld [vmem:[%s8955_s20 + $0x400] sm:$0xff]  ;;  %v533_v18 = vld [vmem:[%s8955_s20 + $0x428] sm:$0xff]  ;;  %v7345_v20 = vcombine.low %v521_v8, %v525_v9  ;;  %v329_v25 = vcombine.high %v9064_v17, %v9064_v17 }
  0xc9   : > { %v532_v16 = vld [vmem:[%s8955_s20 + $0x420] sm:$0xff]  ;;  %v537_v27 = vld [vmem:[%s8955_s20 + $0x448] sm:$0xff] }
  0xca   : > { %v541_v28 = vld [vmem:[%s8955_s20 + $0x468] sm:$0xff]  ;;  %v548_v34 = vld [vmem:[%s8955_s20 + $0x4a0] sm:$0xff]  ;;  %v9080_v35 = vpack.c.bf16 %v329_v25, %v329_v25 }
  0xcb   : > { %5793 = vmatpush1.bf16.msra.mxu0 %v7287_v21  ;;  %6080 = vmatpush1.bf16.msra.mxu1 %v7289_v22  ;;  %v7352_v21 = vcombine.high %v528_v15, %v532_v16  ;;  %v7354_v22 = vcombine.high %v529_v60, %v533_v18  ;;  %v545_v0 = vld [vmem:[%s8955_s20 + $0x488] sm:$0xff]  ;;  %v552_v41 = vld [vmem:[%s8955_s20 + $0x4c0] sm:$0xff] }
  0xcc   : > { %5794 = vmatprep.subr.bf16.mxu0 %v7296_v23  ;;  %6081 = vmatprep.subr.bf16.mxu1 %v7298_v24  ;;  %v536_v23 = vld [vmem:[%s8955_s20 + $0x440] sm:$0xff]  ;;  %v549_v36 = vld [vmem:[%s8955_s20 + $0x4a8] sm:$0xff] }
  0xcd   : > { %v540_v24 = vld [vmem:[%s8955_s20 + $0x460] sm:$0xff]  ;;  %v553_v43 = vld [vmem:[%s8955_s20 + $0x4c8] sm:$0xff] }
  0xce   : > { %v556_v42 = vld [vmem:[%s8955_s20 + $0x4e0] sm:$0xff]  ;;  %v557_v44 = vld [vmem:[%s8955_s20 + $0x4e8] sm:$0xff] }
  0xcf   : > { %5795 = vmatpush1.bf16.msra.mxu0 %v7295_v29  ;;  %6082 = vmatpush1.bf16.msra.mxu1 %v7297_v30  ;;  %v7351_v29 = vcombine.low %v528_v15, %v532_v16  ;;  %v7353_v30 = vcombine.low %v529_v60, %v533_v18  ;;  %v560_v50 = vld [vmem:[%s8955_s20 + $0x500] sm:$0xff]  ;;  %v561_v52 = vld [vmem:[%s8955_s20 + $0x508] sm:$0xff] }
  0xd0   : > { %5796 = vmatprep.subr.bf16.mxu0 %v7304_v31  ;;  %6083 = vmatprep.subr.bf16.mxu1 %v7306_v32  ;;  %v7360_v31 = vcombine.high %v536_v23, %v540_v24  ;;  %v7362_v32 = vcombine.high %v537_v27, %v541_v28  ;;  %v564_v51 = vld [vmem:[%s8955_s20 + $0x520] sm:$0xff]  ;;  %v565_v53 = vld [vmem:[%s8955_s20 + $0x528] sm:$0xff] }
  0xd1   : > { %v568_v59 = vld [vmem:[%s8955_s20 + $0x540] sm:$0xff]  ;;  %v569_v62 = vld [vmem:[%s8955_s20 + $0x548] sm:$0xff] }
  0xd2   : > { %v572_v61 = vld [vmem:[%s8955_s20 + $0x560] sm:$0xff]  ;;  %v573_v63 = vld [vmem:[%s8955_s20 + $0x568] sm:$0xff] }
  0xd3   : > { %5797 = vmatpush1.bf16.msra.mxu0 %v7303_v37  ;;  %6084 = vmatpush1.bf16.msra.mxu1 %v7305_v38  ;;  %v7359_v37 = vcombine.low %v536_v23, %v540_v24  ;;  %v7361_v38 = vcombine.low %v537_v27, %v541_v28  ;;  %v576_v5 = vld [vmem:[%s8955_s20 + $0x580] sm:$0xff]  ;;  %v577_v7 = vld [vmem:[%s8955_s20 + $0x588] sm:$0xff]  ;;  %v7391_v9 = vcombine.low %v568_v59, %v572_v61 }
  0xd4   : > { %5798 = vmatprep.subr.bf16.mxu0 %v7312_v39  ;;  %6085 = vmatprep.subr.bf16.mxu1 %v7314_v40  ;;  %v7368_v39 = vcombine.high %v544_v33, %v548_v34  ;;  %v7370_v40 = vcombine.high %v545_v0, %v549_v36  ;;  %v580_v6 = vld [vmem:[%s8955_s20 + $0x5a0] sm:$0xff]  ;;  %v581_v8 = vld [vmem:[%s8955_s20 + $0x5a8] sm:$0xff] }
  0xd5   : > { %v588_v15 = vld [vmem:[%s8955_s20 + $0x5e0] sm:$0xff]  ;;  %v585_v16 = vld [vmem:[%s8955_s20 + $0x5c8] sm:$0xff]  ;;  %v7399_v18 = vcombine.low %v576_v5, %v580_v6 }
  0xd6   : > { %v589_v60 = vld [vmem:[%s8955_s20 + $0x5e8] sm:$0xff]  ;;  %v596_v23 = vld [vmem:[%s8955_s20 + $0x620] sm:$0xff] }
  0xd7   : > { %5799 = vmatpush1.bf16.msra.mxu0 %v7311_v46  ;;  %6086 = vmatpush1.bf16.msra.mxu1 %v7313_v47  ;;  %v7367_v46 = vcombine.low %v544_v33, %v548_v34  ;;  %v7369_v47 = vcombine.low %v545_v0, %v549_v36  ;;  %v593_v24 = vld [vmem:[%s8955_s20 + $0x608] sm:$0xff]  ;;  %v7409_v28 = vcombine.low %v585_v16, %v589_v60 }
  0xd8   : > { %5800 = vmatprep.subr.bf16.mxu0 %v7320_v48  ;;  %6087 = vmatprep.subr.bf16.mxu1 %v7322_v49  ;;  %v7376_v48 = vcombine.high %v552_v41, %v556_v42  ;;  %v7378_v49 = vcombine.high %v553_v43, %v557_v44  ;;  %v597_v25 = vld [vmem:[%s8955_s20 + $0x628] sm:$0xff] }
  0xd9   : > { %v601_v33 = vld [vmem:[%s8955_s20 + $0x648] sm:$0xff]  ;;  %v7417_v36 = vcombine.low %v593_v24, %v597_v25 }
  0xda   : > { %v605_v34 = vld [vmem:[%s8955_s20 + $0x668] sm:$0xff] }
  0xdb   : > { %5801 = vmatpush1.bf16.msra.mxu0 %v7319_v55  ;;  %6088 = vmatpush1.bf16.msra.mxu1 %v7321_v56  ;;  %v7375_v55 = vcombine.low %v552_v41, %v556_v42  ;;  %v7377_v56 = vcombine.low %v553_v43, %v557_v44  ;;  %v609_v41 = vld [vmem:[%s8955_s20 + $0x688] sm:$0xff]  ;;  %v7425_v44 = vcombine.low %v601_v33, %v605_v34 }
  0xdc   : > { %5802 = vmatprep.subr.bf16.mxu0 %v7328_v57  ;;  %6089 = vmatprep.subr.bf16.mxu1 %v7330_v58  ;;  %v7384_v57 = vcombine.high %v560_v50, %v564_v51  ;;  %v7386_v58 = vcombine.high %v561_v52, %v565_v53  ;;  %v613_v42 = vld [vmem:[%s8955_s20 + $0x6a8] sm:$0xff] }
  0xdf   : > { %5803 = vmatpush1.bf16.msra.mxu0 %v7327_v1  ;;  %6090 = vmatpush1.bf16.msra.mxu1 %v7329_v2  ;;  %v7383_v1 = vcombine.low %v560_v50, %v564_v51  ;;  %v7385_v2 = vcombine.low %v561_v52, %v565_v53  ;;  %v617_v50 = vld [vmem:[%s8955_s20 + $0x6c8] sm:$0xff]  ;;  %v7433_v53 = vcombine.low %v609_v41, %v613_v42 }
  0xe0   : > { %5804 = vmatprep.subr.bf16.mxu0 %v7336_v3  ;;  %6091 = vmatprep.subr.bf16.mxu1 %v7338_v4  ;;  %v7392_v3 = vcombine.high %v568_v59, %v572_v61  ;;  %v7394_v4 = vcombine.high %v569_v62, %v573_v63  ;;  %v621_v51 = vld [vmem:[%s8955_s20 + $0x6e8] sm:$0xff] }
  0xe1   : > { %v625_v59 = vld [vmem:[%s8955_s20 + $0x708] sm:$0xff] }
  0xe2   : > { %v629_v61 = vld [vmem:[%s8955_s20 + $0x728] sm:$0xff] }
  0xe3   : > { %5805 = vmatpush1.bf16.msra.mxu0 %v7335_v11  ;;  %6092 = vmatpush1.bf16.msra.mxu1 %v7337_v12  ;;  %v7393_v11 = vcombine.low %v569_v62, %v573_v63  ;;  %v7400_v12 = vcombine.high %v576_v5, %v580_v6  ;;  %v7441_v63 = vcombine.low %v617_v50, %v621_v51  ;;  %v633_v5 = vld [vmem:[%s8955_s20 + $0x748] sm:$0xff] }
  0xe4   : > { %5806 = vmatprep.subr.bf16.mxu0 %v7344_v13  ;;  %6093 = vmatprep.subr.bf16.mxu1 %v7346_v14  ;;  %v7402_v13 = vcombine.high %v577_v7, %v581_v8  ;;  %v584_v14 = vld [vmem:[%s8955_s20 + $0x5c0] sm:$0xff]  ;;  %v637_v6 = vld [vmem:[%s8955_s20 + $0x768] sm:$0xff] }
  0xe5   : > { %v7407_v27 = vcombine.low %v584_v14, %v588_v15 }
  0xe7   : > { %5807 = vmatpush1.bf16.msra.mxu0 %v7343_v19  ;;  %6094 = vmatpush1.bf16.msra.mxu1 %v7345_v20  ;;  %v7401_v19 = vcombine.low %v577_v7, %v581_v8  ;;  %v7408_v20 = vcombine.high %v584_v14, %v588_v15  ;;  %v7449_v8 = vcombine.low %v625_v59, %v629_v61  ;;  %v641_v14 = vld [vmem:[%s8955_s20 + $0x788] sm:$0xff] }
  0xe8   : > { %5817 = vmatprep.subr.bf16.mxu0 %v7352_v21  ;;  %6104 = vmatprep.subr.bf16.mxu1 %v7354_v22  ;;  %v7410_v21 = vcombine.high %v585_v16, %v589_v60  ;;  %v592_v22 = vld [vmem:[%s8955_s20 + $0x600] sm:$0xff]  ;;  %v645_v15 = vld [vmem:[%s8955_s20 + $0x7a8] sm:$0xff]  ;;  %v7457_v60 = vcombine.low %v633_v5, %v637_v6 }
  0xe9   : > { %v7415_v0 = vcombine.low %v592_v22, %v596_v23 }
  0xea   : > { %5809 = vmatmul.mubr.bf16.vlgmr.msra.gmra.mrb[0].mxu0 %v9074_v26  ;;  %6096 = vmatmul.mubr.bf16.vlgmr.msra.gmra.mrb[0].mxu1 %v9074_v26 }
  0xeb   : > { %5818 = vmatpush1.bf16.msra.mxu0 %v7351_v29  ;;  %6105 = vmatpush1.bf16.msra.mxu1 %v7353_v30  ;;  %v7416_v29 = vcombine.high %v592_v22, %v596_v23  ;;  %v7418_v30 = vcombine.high %v593_v24, %v597_v25  ;;  %v649_v22 = vld [vmem:[%s8955_s20 + $0x7c8] sm:$0xff] }
  0xec   : > { %5819 = vmatprep.subr.bf16.mxu0 %v7360_v31  ;;  %6106 = vmatprep.subr.bf16.mxu1 %v7362_v32  ;;  %v600_v31 = vld [vmem:[%s8955_s20 + $0x640] sm:$0xff]  ;;  %v653_v23 = vld [vmem:[%s8955_s20 + $0x7e8] sm:$0xff] }
  0xed   : > { %5849 = vmatprep.mubr.bf16.mxu0 %v9080_v35  ;;  %6136 = vmatprep.mubr.bf16.mxu1 %v9080_v35  ;;  %v604_v32 = vld [vmem:[%s8955_s20 + $0x660] sm:$0xff]  ;;  %v9141_v24 = vld [vmem:[%s8947_s6 + $0x8] sm:$0xff] }
  0xee   : > { %v7423_v43 = vcombine.low %v600_v31, %v604_v32 }
  0xef   : > { %5820 = vmatpush1.bf16.msra.mxu0 %v7359_v37  ;;  %6107 = vmatpush1.bf16.msra.mxu1 %v7361_v38  ;;  %v7424_v37 = vcombine.high %v600_v31, %v604_v32  ;;  %v7426_v38 = vcombine.high %v601_v33, %v605_v34  ;;  %v660_v31 = vld [vmem:[%s8955_s20 + $0x820] sm:$0xff]  ;;  %v9147_v32 = vrot.slane %v9141_v24, %v9006_v54  ;;  %v657_v33 = vld [vmem:[%s8955_s20 + $0x808] sm:$0xff] }
  0xf0   : > { %5821 = vmatprep.subr.bf16.mxu0 %v7368_v39  ;;  %6108 = vmatprep.subr.bf16.mxu1 %v7370_v40  ;;  %v608_v39 = vld [vmem:[%s8955_s20 + $0x680] sm:$0xff]  ;;  %v661_v34 = vld [vmem:[%s8955_s20 + $0x828] sm:$0xff] }
  0xf1   : > { %v612_v40 = vld [vmem:[%s8955_s20 + $0x6a0] sm:$0xff] }
  0xf2   : > { %v7431_v52 = vcombine.low %v608_v39, %v612_v40 }
  0xf3   : > { %5822 = vmatpush1.bf16.msra.mxu0 %v7367_v46  ;;  %6109 = vmatpush1.bf16.msra.mxu1 %v7369_v47  ;;  %v7432_v46 = vcombine.high %v608_v39, %v612_v40  ;;  %v7434_v47 = vcombine.high %v609_v41, %v613_v42  ;;  %v664_v39 = vld [vmem:[%s8955_s20 + $0x840] sm:$0xff]  ;;  %v345_v41 = vcombine.high %v9147_v32, %v9147_v32 }
  0xf4   : > { %5823 = vmatprep.subr.bf16.mxu0 %v7376_v48  ;;  %6110 = vmatprep.subr.bf16.mxu1 %v7378_v49  ;;  %v616_v48 = vld [vmem:[%s8955_s20 + $0x6c0] sm:$0xff]  ;;  %v9157_v42 = vpack.c.bf16 %v9064_v17, %v9064_v17  ;;  %v673_v17 = vld [vmem:[%s8955_s20 + $0x888] sm:$0xff] }
  0xf5   : > { %v620_v49 = vld [vmem:[%s8955_s20 + $0x6e0] sm:$0xff] }
  0xf6   : > { %v7439_v62 = vcombine.low %v616_v48, %v620_v49  ;;  %v668_v40 = vld [vmem:[%s8955_s20 + $0x860] sm:$0xff] }
  0xf7   : > { %5824 = vmatpush1.bf16.msra.mxu0 %v7375_v55  ;;  %6111 = vmatpush1.bf16.msra.mxu1 %v7377_v56  ;;  %v7440_v55 = vcombine.high %v616_v48, %v620_v49  ;;  %v7442_v56 = vcombine.high %v617_v50, %v621_v51  ;;  %v7488_v48 = vcombine.high %v664_v39, %v668_v40  ;;  %v672_v50 = vld [vmem:[%s8955_s20 + $0x880] sm:$0xff] }
  0xf8   : > { %5825 = vmatprep.subr.bf16.mxu0 %v7384_v57  ;;  %6112 = vmatprep.subr.bf16.mxu1 %v7386_v58  ;;  %v624_v57 = vld [vmem:[%s8955_s20 + $0x700] sm:$0xff] }
  0xf9   : > { %v628_v58 = vld [vmem:[%s8955_s20 + $0x720] sm:$0xff] }
  0xfa   : > { %v7447_v7 = vcombine.low %v624_v57, %v628_v58  ;;  %v676_v51 = vld [vmem:[%s8955_s20 + $0x8a0] sm:$0xff] }
  0xfb   : > { %5826 = vmatpush1.bf16.msra.mxu0 %v7383_v1  ;;  %6113 = vmatpush1.bf16.msra.mxu1 %v7385_v2  ;;  %v7448_v1 = vcombine.high %v624_v57, %v628_v58  ;;  %v7450_v2 = vcombine.high %v625_v59, %v629_v61  ;;  %v7496_v57 = vcombine.high %v672_v50, %v676_v51  ;;  %v680_v59 = vld [vmem:[%s8955_s20 + $0x8c0] sm:$0xff] }
  0xfc   : > { %5827 = vmatprep.subr.bf16.mxu0 %v7392_v3  ;;  %6114 = vmatprep.subr.bf16.mxu1 %v7394_v4  ;;  %v632_v3 = vld [vmem:[%s8955_s20 + $0x740] sm:$0xff] }
  0xfd   : > { %v636_v4 = vld [vmem:[%s8955_s20 + $0x760] sm:$0xff] }
  0xfe   : > { %v7455_v16 = vcombine.low %v632_v3, %v636_v4  ;;  %v684_v61 = vld [vmem:[%s8955_s20 + $0x8e0] sm:$0xff] }
  0xff   : > { %5828 = vmatpush1.bf16.msra.mxu0 %v7391_v9  ;;  %6115 = vmatpush1.bf16.msra.mxu1 %v7393_v11  ;;  %v7456_v9 = vcombine.high %v632_v3, %v636_v4  ;;  %v7458_v11 = vcombine.high %v633_v5, %v637_v6  ;;  %v7504_v3 = vcombine.high %v680_v59, %v684_v61  ;;  %v688_v5 = vld [vmem:[%s8955_s20 + $0x900] sm:$0xff] }
 0x100   : > { %5829 = vmatprep.subr.bf16.mxu0 %v7400_v12  ;;  %6116 = vmatprep.subr.bf16.mxu1 %v7402_v13  ;;  %v640_v12 = vld [vmem:[%s8955_s20 + $0x780] sm:$0xff] }
 0x101   : > { %v644_v13 = vld [vmem:[%s8955_s20 + $0x7a0] sm:$0xff] }
 0x102   : > { %v7463_v25 = vcombine.low %v640_v12, %v644_v13  ;;  %v692_v6 = vld [vmem:[%s8955_s20 + $0x920] sm:$0xff] }
 0x103   : > { %5830 = vmatpush1.bf16.msra.mxu0 %v7399_v18  ;;  %6117 = vmatpush1.bf16.msra.mxu1 %v7401_v19  ;;  %v7464_v18 = vcombine.high %v640_v12, %v644_v13  ;;  %v7466_v19 = vcombine.high %v641_v14, %v645_v15  ;;  %v7512_v12 = vcombine.high %v688_v5, %v692_v6 }
 0x104   : > { %5831 = vmatprep.subr.bf16.mxu0 %v7408_v20  ;;  %6118 = vmatprep.subr.bf16.mxu1 %v7410_v21  ;;  %v648_v20 = vld [vmem:[%s8955_s20 + $0x7c0] sm:$0xff] }
 0x105   : > { %v652_v21 = vld [vmem:[%s8955_s20 + $0x7e0] sm:$0xff] }
 0x107   : > { %5832 = vmatpush1.bf16.msra.mxu0 %v7407_v27  ;;  %6119 = vmatpush1.bf16.msra.mxu1 %v7409_v28  ;;  %v7465_v27 = vcombine.low %v641_v14, %v645_v15  ;;  %v7472_v28 = vcombine.high %v648_v20, %v652_v21  ;;  %v696_v14 = vld [vmem:[%s8955_s20 + $0x940] sm:$0xff] }
 0x108   : > { %5833 = vmatprep.subr.bf16.mxu0 %v7416_v29  ;;  %6120 = vmatprep.subr.bf16.mxu1 %v7418_v30  ;;  %v7474_v29 = vcombine.high %v649_v22, %v653_v23  ;;  %v656_v30 = vld [vmem:[%s8955_s20 + $0x800] sm:$0xff] }
 0x109   : > { %v700_v15 = vld [vmem:[%s8955_s20 + $0x960] sm:$0xff] }
 0x10b   : > { %5834 = vmatpush1.bf16.msra.mxu0 %v7415_v0  ;;  %6121 = vmatpush1.bf16.msra.mxu1 %v7417_v36  ;;  %v7471_v0 = vcombine.low %v648_v20, %v652_v21  ;;  %v7473_v36 = vcombine.low %v649_v22, %v653_v23  ;;  %v7520_v20 = vcombine.high %v696_v14, %v700_v15  ;;  %v704_v22 = vld [vmem:[%s8955_s20 + $0x980] sm:$0xff] }
 0x10c   : > { %5835 = vmatprep.subr.bf16.mxu0 %v7424_v37  ;;  %6122 = vmatprep.subr.bf16.mxu1 %v7426_v38  ;;  %v7480_v37 = vcombine.high %v656_v30, %v660_v31  ;;  %v7482_v38 = vcombine.high %v657_v33, %v661_v34  ;;  %v708_v23 = vld [vmem:[%s8955_s20 + $0x9a0] sm:$0xff] }
 0x10f   : > { %5836 = vmatpush1.bf16.msra.mxu0 %v7423_v43  ;;  %6123 = vmatpush1.bf16.msra.mxu1 %v7425_v44  ;;  %v665_v43 = vld [vmem:[%s8955_s20 + $0x848] sm:$0xff] }
 0x110   : > { %5837 = vmatprep.subr.bf16.mxu0 %v7432_v46  ;;  %6124 = vmatprep.subr.bf16.mxu1 %v7434_v47  ;;  %v669_v44 = vld [vmem:[%s8955_s20 + $0x868] sm:$0xff]  ;;  %v7479_v46 = vcombine.low %v656_v30, %v660_v31  ;;  %v7481_v47 = vcombine.low %v657_v33, %v661_v34  ;;  %v7528_v30 = vcombine.high %v704_v22, %v708_v23  ;;  %v712_v33 = vld [vmem:[%s8955_s20 + $0x9c0] sm:$0xff] }
 0x111   : > { %v7490_v49 = vcombine.high %v665_v43, %v669_v44  ;;  %v716_v34 = vld [vmem:[%s8955_s20 + $0x9e0] sm:$0xff] }
 0x113   : > { %5838 = vmatpush1.bf16.msra.mxu0 %v7431_v52  ;;  %6125 = vmatpush1.bf16.msra.mxu1 %v7433_v53  ;;  %v9163_v52 = vpack.c.bf16 %v345_v41, %v345_v41  ;;  %v677_v53 = vld [vmem:[%s8955_s20 + $0x8a8] sm:$0xff]  ;;  %v720_v41 = vld [vmem:[%s8955_s20 + $0xa00] sm:$0xff] }
 0x114   : > { %5839 = vmatprep.subr.bf16.mxu0 %v7440_v55  ;;  %6126 = vmatprep.subr.bf16.mxu1 %v7442_v56  ;;  %v7487_v55 = vcombine.low %v664_v39, %v668_v40  ;;  %v7489_v56 = vcombine.low %v665_v43, %v669_v44  ;;  %v7498_v58 = vcombine.high %v673_v17, %v677_v53  ;;  %v724_v43 = vld [vmem:[%s8955_s20 + $0xa20] sm:$0xff]  ;;  %v721_v44 = vld [vmem:[%s8955_s20 + $0xa08] sm:$0xff] }
 0x115   : > { %v7536_v39 = vcombine.high %v712_v33, %v716_v34 }
 0x117   : > { %5840 = vmatpush1.bf16.msra.mxu0 %v7439_v62  ;;  %6127 = vmatpush1.bf16.msra.mxu1 %v7441_v63  ;;  %v681_v62 = vld [vmem:[%s8955_s20 + $0x8c8] sm:$0xff] }
 0x118   : > { %5841 = vmatprep.subr.bf16.mxu0 %v7448_v1  ;;  %6128 = vmatprep.subr.bf16.mxu1 %v7450_v2  ;;  %v685_v63 = vld [vmem:[%s8955_s20 + $0x8e8] sm:$0xff]  ;;  %v7495_v1 = vcombine.low %v672_v50, %v676_v51  ;;  %v7497_v2 = vcombine.low %v673_v17, %v677_v53  ;;  %v728_v51 = vld [vmem:[%s8955_s20 + $0xa40] sm:$0xff] }
 0x119   : > { %v7506_v4 = vcombine.high %v681_v62, %v685_v63  ;;  %v732_v17 = vld [vmem:[%s8955_s20 + $0xa60] sm:$0xff]  ;;  %v729_v53 = vld [vmem:[%s8955_s20 + $0xa48] sm:$0xff] }
 0x11b   : > { %5842 = vmatpush1.bf16.msra.mxu0 %v7447_v7  ;;  %6129 = vmatpush1.bf16.msra.mxu1 %v7449_v8  ;;  %v689_v7 = vld [vmem:[%s8955_s20 + $0x908] sm:$0xff] }
 0x11c   : > { %5843 = vmatprep.subr.bf16.mxu0 %v7456_v9  ;;  %6130 = vmatprep.subr.bf16.mxu1 %v7458_v11  ;;  %v693_v8 = vld [vmem:[%s8955_s20 + $0x928] sm:$0xff]  ;;  %v7503_v9 = vcombine.low %v680_v59, %v684_v61  ;;  %v7505_v11 = vcombine.low %v681_v62, %v685_v63  ;;  %v736_v61 = vld [vmem:[%s8955_s20 + $0xa80] sm:$0xff] }
 0x11d   : > { %v7514_v13 = vcombine.high %v689_v7, %v693_v8  ;;  %v740_v62 = vld [vmem:[%s8955_s20 + $0xaa0] sm:$0xff]  ;;  %v737_v63 = vld [vmem:[%s8955_s20 + $0xa88] sm:$0xff] }
 0x11f   : > { %5844 = vmatpush1.bf16.msra.mxu0 %v7455_v16  ;;  %6131 = vmatpush1.bf16.msra.mxu1 %v7457_v60  ;;  %v697_v16 = vld [vmem:[%s8955_s20 + $0x948] sm:$0xff] }
 0x120   : > { %5845 = vmatprep.subr.bf16.mxu0 %v7464_v18  ;;  %6132 = vmatprep.subr.bf16.mxu1 %v7466_v19  ;;  %v701_v60 = vld [vmem:[%s8955_s20 + $0x968] sm:$0xff]  ;;  %v7511_v18 = vcombine.low %v688_v5, %v692_v6  ;;  %v7513_v19 = vcombine.low %v689_v7, %v693_v8  ;;  %v744_v6 = vld [vmem:[%s8955_s20 + $0xac0] sm:$0xff] }
 0x121   : > { %v7522_v21 = vcombine.high %v697_v16, %v701_v60  ;;  %v748_v7 = vld [vmem:[%s8955_s20 + $0xae0] sm:$0xff]  ;;  %v745_v8 = vld [vmem:[%s8955_s20 + $0xac8] sm:$0xff] }
 0x123   : > { %5846 = vmatpush1.bf16.msra.mxu0 %v7463_v25  ;;  %6133 = vmatpush1.bf16.msra.mxu1 %v7465_v27  ;;  %v705_v25 = vld [vmem:[%s8955_s20 + $0x988] sm:$0xff] }
 0x124   : > { %5847 = vmatprep.subr.bf16.mxu0 %v7472_v28  ;;  %6134 = vmatprep.subr.bf16.mxu1 %v7474_v29  ;;  %v709_v27 = vld [vmem:[%s8955_s20 + $0x9a8] sm:$0xff]  ;;  %v7519_v28 = vcombine.low %v696_v14, %v700_v15  ;;  %v7521_v29 = vcombine.low %v697_v16, %v701_v60  ;;  %v752_v15 = vld [vmem:[%s8955_s20 + $0xb00] sm:$0xff] }
 0x125   : > { %v7530_v31 = vcombine.high %v705_v25, %v709_v27  ;;  %v756_v16 = vld [vmem:[%s8955_s20 + $0xb20] sm:$0xff]  ;;  %v753_v60 = vld [vmem:[%s8955_s20 + $0xb08] sm:$0xff] }
 0x127   : > { %5848 = vmatpush1.bf16.msra.mxu0 %v7471_v0  ;;  %6135 = vmatpush1.bf16.msra.mxu1 %v7473_v36  ;;  %v713_v0 = vld [vmem:[%s8955_s20 + $0x9c8] sm:$0xff] }
 0x128   : > { %5858 = vmatprep.subr.bf16.mxu0 %v7480_v37  ;;  %6145 = vmatprep.subr.bf16.mxu1 %v7482_v38  ;;  %v717_v36 = vld [vmem:[%s8955_s20 + $0x9e8] sm:$0xff]  ;;  %v7527_v37 = vcombine.low %v704_v22, %v708_v23  ;;  %v7529_v38 = vcombine.low %v705_v25, %v709_v27  ;;  %v760_v23 = vld [vmem:[%s8955_s20 + $0xb40] sm:$0xff] }
 0x129   : > { %v7538_v40 = vcombine.high %v713_v0, %v717_v36  ;;  %v764_v25 = vld [vmem:[%s8955_s20 + $0xb60] sm:$0xff]  ;;  %v761_v27 = vld [vmem:[%s8955_s20 + $0xb48] sm:$0xff] }
 0x12a   : > { %5850 = vmatmul.mubr.bf16.vlgmr.msra.gmra.mrb[0].mxu0 %v9157_v42  ;;  %6137 = vmatmul.mubr.bf16.vlgmr.msra.gmra.mrb[0].mxu1 %v9157_v42 }
 0x12b   : > { %5859 = vmatpush1.bf16.msra.mxu0 %v7479_v46  ;;  %6146 = vmatpush1.bf16.msra.mxu1 %v7481_v47  ;;  %v725_v46 = vld [vmem:[%s8955_s20 + $0xa28] sm:$0xff]  ;;  %v7535_v47 = vcombine.low %v712_v33, %v716_v34  ;;  %v768_v34 = vld [vmem:[%s8955_s20 + $0xb80] sm:$0xff] }
 0x12c   : > { %5860 = vmatprep.subr.bf16.mxu0 %v7488_v48  ;;  %6147 = vmatprep.subr.bf16.mxu1 %v7490_v49  ;;  %v7537_v48 = vcombine.low %v713_v0, %v717_v36  ;;  %v7544_v49 = vcombine.high %v720_v41, %v724_v43  ;;  %v7546_v50 = vcombine.high %v721_v44, %v725_v46  ;;  %v772_v0 = vld [vmem:[%s8955_s20 + $0xba0] sm:$0xff]  ;;  %v769_v36 = vld [vmem:[%s8955_s20 + $0xb88] sm:$0xff] }
 0x12d   : > { %5890 = vmatprep.mubr.bf16.mxu0 %v9163_v52  ;;  %6177 = vmatprep.mubr.bf16.mxu1 %v9163_v52 }
 0x12f   : > { %5861 = vmatpush1.bf16.msra.mxu0 %v7487_v55  ;;  %6148 = vmatpush1.bf16.msra.mxu1 %v7489_v56  ;;  %v733_v55 = vld [vmem:[%s8955_s20 + $0xa68] sm:$0xff]  ;;  %v7543_v56 = vcombine.low %v720_v41, %v724_v43  ;;  %v776_v43 = vld [vmem:[%s8955_s20 + $0xbc0] sm:$0xff] }
 0x130   : > { %5862 = vmatprep.subr.bf16.mxu0 %v7496_v57  ;;  %6149 = vmatprep.subr.bf16.mxu1 %v7498_v58  ;;  %v7545_v57 = vcombine.low %v721_v44, %v725_v46  ;;  %v7552_v58 = vcombine.high %v728_v51, %v732_v17  ;;  %v7554_v59 = vcombine.high %v729_v53, %v733_v55  ;;  %v780_v44 = vld [vmem:[%s8955_s20 + $0xbe0] sm:$0xff] }
 0x131   : > { %v330_v46 = vcombine.high %v9141_v24, %v9141_v24  ;;  %v785_v24 = vld [vmem:[%s8955_s20 + $0xc08] sm:$0xff] }
 0x133   : > { %5863 = vmatpush1.bf16.msra.mxu0 %v7495_v1  ;;  %6150 = vmatpush1.bf16.msra.mxu1 %v7497_v2  ;;  %v741_v1 = vld [vmem:[%s8955_s20 + $0xaa8] sm:$0xff]  ;;  %v7551_v2 = vcombine.low %v728_v51, %v732_v17  ;;  %v7600_v51 = vcombine.high %v776_v43, %v780_v44 }
 0x134   : > { %5864 = vmatprep.subr.bf16.mxu0 %v7504_v3  ;;  %6151 = vmatprep.subr.bf16.mxu1 %v7506_v4  ;;  %v7553_v3 = vcombine.low %v729_v53, %v733_v55  ;;  %v7560_v4 = vcombine.high %v736_v61, %v740_v62  ;;  %v7562_v5 = vcombine.high %v737_v63, %v741_v1  ;;  %v784_v53 = vld [vmem:[%s8955_s20 + $0xc00] sm:$0xff] }
 0x135   : > { %v788_v55 = vld [vmem:[%s8955_s20 + $0xc20] sm:$0xff] }
 0x137   : > { %5865 = vmatpush1.bf16.msra.mxu0 %v7503_v9  ;;  %6152 = vmatpush1.bf16.msra.mxu1 %v7505_v11  ;;  %v749_v9 = vld [vmem:[%s8955_s20 + $0xae8] sm:$0xff]  ;;  %v7559_v11 = vcombine.low %v736_v61, %v740_v62  ;;  %v7608_v61 = vcombine.high %v784_v53, %v788_v55 }
 0x138   : > { %5866 = vmatprep.subr.bf16.mxu0 %v7512_v12  ;;  %6153 = vmatprep.subr.bf16.mxu1 %v7514_v13  ;;  %v7561_v12 = vcombine.low %v737_v63, %v741_v1  ;;  %v7568_v13 = vcombine.high %v744_v6, %v748_v7  ;;  %v7570_v14 = vcombine.high %v745_v8, %v749_v9  ;;  %v792_v63 = vld [vmem:[%s8955_s20 + $0xc40] sm:$0xff] }
 0x139   : > { %v796_v1 = vld [vmem:[%s8955_s20 + $0xc60] sm:$0xff] }
 0x13b   : > { %5867 = vmatpush1.bf16.msra.mxu0 %v7511_v18  ;;  %6154 = vmatpush1.bf16.msra.mxu1 %v7513_v19  ;;  %v757_v18 = vld [vmem:[%s8955_s20 + $0xb28] sm:$0xff]  ;;  %v7567_v19 = vcombine.low %v744_v6, %v748_v7  ;;  %v7607_v6 = vcombine.low %v784_v53, %v788_v55 }
 0x13c   : > { %5868 = vmatprep.subr.bf16.mxu0 %v7520_v20  ;;  %6155 = vmatprep.subr.bf16.mxu1 %v7522_v21  ;;  %v7569_v20 = vcombine.low %v745_v8, %v749_v9  ;;  %v7576_v21 = vcombine.high %v752_v15, %v756_v16  ;;  %v7578_v22 = vcombine.high %v753_v60, %v757_v18 }
 0x13d   : > { %v7616_v8 = vcombine.high %v792_v63, %v796_v1 }
 0x13f   : > { %5869 = vmatpush1.bf16.msra.mxu0 %v7519_v28  ;;  %6156 = vmatpush1.bf16.msra.mxu1 %v7521_v29  ;;  %v765_v28 = vld [vmem:[%s8955_s20 + $0xb68] sm:$0xff]  ;;  %v7575_v29 = vcombine.low %v752_v15, %v756_v16  ;;  %v7615_v15 = vcombine.low %v792_v63, %v796_v1 }
 0x140   : > { %5870 = vmatprep.subr.bf16.mxu0 %v7528_v30  ;;  %6157 = vmatprep.subr.bf16.mxu1 %v7530_v31  ;;  %v7577_v30 = vcombine.low %v753_v60, %v757_v18  ;;  %v7584_v31 = vcombine.high %v760_v23, %v764_v25  ;;  %v7586_v33 = vcombine.high %v761_v27, %v765_v28 }
 0x143   : > { %5871 = vmatpush1.bf16.msra.mxu0 %v7527_v37  ;;  %6158 = vmatpush1.bf16.msra.mxu1 %v7529_v38  ;;  %v773_v37 = vld [vmem:[%s8955_s20 + $0xba8] sm:$0xff]  ;;  %v7583_v38 = vcombine.low %v760_v23, %v764_v25 }
 0x144   : > { %5872 = vmatprep.subr.bf16.mxu0 %v7536_v39  ;;  %6159 = vmatprep.subr.bf16.mxu1 %v7538_v40  ;;  %v7585_v39 = vcombine.low %v761_v27, %v765_v28  ;;  %v7592_v40 = vcombine.high %v768_v34, %v772_v0  ;;  %v7594_v41 = vcombine.high %v769_v36, %v773_v37 }
 0x147   : > { %5873 = vmatpush1.bf16.msra.mxu0 %v7535_v47  ;;  %6160 = vmatpush1.bf16.msra.mxu1 %v7537_v48  ;;  %v777_v47 = vld [vmem:[%s8955_s20 + $0xbc8] sm:$0xff] }
 0x148   : > { %5874 = vmatprep.subr.bf16.mxu0 %v7544_v49  ;;  %6161 = vmatprep.subr.bf16.mxu1 %v7546_v50  ;;  %v781_v48 = vld [vmem:[%s8955_s20 + $0xbe8] sm:$0xff]  ;;  %v7591_v49 = vcombine.low %v768_v34, %v772_v0  ;;  %v7593_v50 = vcombine.low %v769_v36, %v773_v37 }
 0x149   : > { %v7602_v17 = vcombine.high %v777_v47, %v781_v48 }
 0x14b   : > { %5875 = vmatpush1.bf16.msra.mxu0 %v7543_v56  ;;  %6162 = vmatpush1.bf16.msra.mxu1 %v7545_v57  ;;  %v9228_v56 = vrot.slane %v330_v46, %v9006_v54  ;;  %v789_v57 = vld [vmem:[%s8955_s20 + $0xc28] sm:$0xff] }
 0x14c   : > { %5876 = vmatprep.subr.bf16.mxu0 %v7552_v58  ;;  %6163 = vmatprep.subr.bf16.mxu1 %v7554_v59  ;;  %v7599_v58 = vcombine.low %v776_v43, %v780_v44  ;;  %v7601_v59 = vcombine.low %v777_v47, %v781_v48  ;;  %v7610_v62 = vcombine.high %v785_v24, %v789_v57  ;;  %v832_v48 = vld [vmem:[%s8955_s20 + $0xd80] sm:$0xff] }
 0x14d   : > { %v7609_v7 = vcombine.low %v785_v24, %v789_v57  ;;  %v840_v57 = vld [vmem:[%s8955_s20 + $0xdc0] sm:$0xff] }
 0x14f   : > { %5877 = vmatpush1.bf16.msra.mxu0 %v7551_v2  ;;  %6164 = vmatpush1.bf16.msra.mxu1 %v7553_v3  ;;  %v346_v2 = vcombine.high %v9228_v56, %v9228_v56  ;;  %v9238_v3 = vpack.c.bf16 %v9147_v32, %v9147_v32  ;;  %v801_v32 = vld [vmem:[%s8955_s20 + $0xc88] sm:$0xff] }
 0x150   : > { %5878 = vmatprep.subr.bf16.mxu0 %v7560_v4  ;;  %6165 = vmatprep.subr.bf16.mxu1 %v7562_v5  ;;  %v793_v4 = vld [vmem:[%s8955_s20 + $0xc48] sm:$0xff] }
 0x151   : > { %v797_v5 = vld [vmem:[%s8955_s20 + $0xc68] sm:$0xff] }
 0x152   : > { %v7618_v9 = vcombine.high %v793_v4, %v797_v5  ;;  %v7617_v16 = vcombine.low %v793_v4, %v797_v5  ;;  %v848_v4 = vld [vmem:[%s8955_s20 + $0xe00] sm:$0xff] }
 0x153   : > { %5879 = vmatpush1.bf16.msra.mxu0 %v7559_v11  ;;  %6166 = vmatpush1.bf16.msra.mxu1 %v7561_v12  ;;  %v800_v11 = vld [vmem:[%s8955_s20 + $0xc80] sm:$0xff] }
 0x154   : > { %5880 = vmatprep.subr.bf16.mxu0 %v7568_v13  ;;  %6167 = vmatprep.subr.bf16.mxu1 %v7570_v14  ;;  %v804_v12 = vld [vmem:[%s8955_s20 + $0xca0] sm:$0xff]  ;;  %v9244_v13 = vpack.c.bf16 %v346_v2, %v346_v2  ;;  %v805_v14 = vld [vmem:[%s8955_s20 + $0xca8] sm:$0xff] }
 0x155   : > { %v7624_v60 = vcombine.high %v800_v11, %v804_v12  ;;  %v7626_v18 = vcombine.high %v801_v32, %v805_v14  ;;  %v7623_v23 = vcombine.low %v800_v11, %v804_v12  ;;  %v7625_v25 = vcombine.low %v801_v32, %v805_v14  ;;  %v852_v5 = vld [vmem:[%s8955_s20 + $0xe20] sm:$0xff] }
 0x156   : > { %v7672_v11 = vcombine.high %v848_v4, %v852_v5  ;;  %v856_v32 = vld [vmem:[%s8955_s20 + $0xe40] sm:$0xff] }
 0x157   : > { %5881 = vmatpush1.bf16.msra.mxu0 %v7567_v19  ;;  %6168 = vmatpush1.bf16.msra.mxu1 %v7569_v20  ;;  %v808_v19 = vld [vmem:[%s8955_s20 + $0xcc0] sm:$0xff] }
 0x158   : > { %5882 = vmatprep.subr.bf16.mxu0 %v7576_v21  ;;  %6169 = vmatprep.subr.bf16.mxu1 %v7578_v22  ;;  %v812_v20 = vld [vmem:[%s8955_s20 + $0xce0] sm:$0xff]  ;;  %v809_v21 = vld [vmem:[%s8955_s20 + $0xcc8] sm:$0xff] }
 0x159   : > { %v813_v22 = vld [vmem:[%s8955_s20 + $0xce8] sm:$0xff]  ;;  %v7632_v27 = vcombine.high %v808_v19, %v812_v20  ;;  %v7631_v34 = vcombine.low %v808_v19, %v812_v20  ;;  %v860_v14 = vld [vmem:[%s8955_s20 + $0xe60] sm:$0xff] }
 0x15a   : > { %v7634_v28 = vcombine.high %v809_v21, %v813_v22  ;;  %v7633_v0 = vcombine.low %v809_v21, %v813_v22  ;;  %v7680_v19 = vcombine.high %v856_v32, %v860_v14  ;;  %v864_v21 = vld [vmem:[%s8955_s20 + $0xe80] sm:$0xff] }
 0x15b   : > { %5883 = vmatpush1.bf16.msra.mxu0 %v7575_v29  ;;  %6170 = vmatpush1.bf16.msra.mxu1 %v7577_v30  ;;  %v816_v29 = vld [vmem:[%s8955_s20 + $0xd00] sm:$0xff] }
 0x15c   : > { %5884 = vmatprep.subr.bf16.mxu0 %v7584_v31  ;;  %6171 = vmatprep.subr.bf16.mxu1 %v7586_v33  ;;  %v820_v30 = vld [vmem:[%s8955_s20 + $0xd20] sm:$0xff]  ;;  %v817_v31 = vld [vmem:[%s8955_s20 + $0xd08] sm:$0xff] }
 0x15d   : > { %v821_v33 = vld [vmem:[%s8955_s20 + $0xd28] sm:$0xff]  ;;  %v7640_v36 = vcombine.high %v816_v29, %v820_v30  ;;  %v7639_v43 = vcombine.low %v816_v29, %v820_v30  ;;  %v868_v22 = vld [vmem:[%s8955_s20 + $0xea0] sm:$0xff] }
 0x15e   : > { %v7642_v37 = vcombine.high %v817_v31, %v821_v33  ;;  %v7641_v44 = vcombine.low %v817_v31, %v821_v33  ;;  %v7688_v29 = vcombine.high %v864_v21, %v868_v22  ;;  %v872_v31 = vld [vmem:[%s8955_s20 + $0xec0] sm:$0xff] }
 0x15f   : > { %5885 = vmatpush1.bf16.msra.mxu0 %v7583_v38  ;;  %6172 = vmatpush1.bf16.msra.mxu1 %v7585_v39  ;;  %v824_v38 = vld [vmem:[%s8955_s20 + $0xd40] sm:$0xff] }
 0x160   : > { %5886 = vmatprep.subr.bf16.mxu0 %v7592_v40  ;;  %6173 = vmatprep.subr.bf16.mxu1 %v7594_v41  ;;  %v828_v39 = vld [vmem:[%s8955_s20 + $0xd60] sm:$0xff]  ;;  %v825_v40 = vld [vmem:[%s8955_s20 + $0xd48] sm:$0xff] }
 0x161   : > { %v829_v41 = vld [vmem:[%s8955_s20 + $0xd68] sm:$0xff]  ;;  %v7648_v46 = vcombine.high %v824_v38, %v828_v39  ;;  %v876_v33 = vld [vmem:[%s8955_s20 + $0xee0] sm:$0xff] }
 0x162   : > { %v7650_v47 = vcombine.high %v825_v40, %v829_v41  ;;  %v7649_v53 = vcombine.low %v825_v40, %v829_v41  ;;  %v880_v40 = vld [vmem:[%s8955_s20 + $0xf00] sm:$0xff] }
 0x163   : > { %5887 = vmatpush1.bf16.msra.mxu0 %v7591_v49  ;;  %6174 = vmatpush1.bf16.msra.mxu1 %v7593_v50  ;;  %v836_v49 = vld [vmem:[%s8955_s20 + $0xda0] sm:$0xff]  ;;  %v833_v50 = vld [vmem:[%s8955_s20 + $0xd88] sm:$0xff] }
 0x164   : > { %5888 = vmatprep.subr.bf16.mxu0 %v7600_v51  ;;  %6175 = vmatprep.subr.bf16.mxu1 %v7602_v17  ;;  %v837_v51 = vld [vmem:[%s8955_s20 + $0xda8] sm:$0xff]  ;;  %v7647_v17 = vcombine.low %v824_v38, %v828_v39  ;;  %v7656_v55 = vcombine.high %v832_v48, %v836_v49  ;;  %v7696_v38 = vcombine.high %v872_v31, %v876_v33  ;;  %v884_v41 = vld [vmem:[%s8955_s20 + $0xf20] sm:$0xff] }
 0x165   : > { %v7658_v24 = vcombine.high %v833_v50, %v837_v51  ;;  %v7657_v63 = vcombine.low %v833_v50, %v837_v51  ;;  %v888_v50 = vld [vmem:[%s8955_s20 + $0xf40] sm:$0xff] }
 0x166   : > { %v892_v51 = vld [vmem:[%s8955_s20 + $0xf60] sm:$0xff] }
 0x167   : > { %5889 = vmatpush1.bf16.msra.mxu0 %v7599_v58  ;;  %6176 = vmatpush1.bf16.msra.mxu1 %v7601_v59  ;;  %v844_v58 = vld [vmem:[%s8955_s20 + $0xde0] sm:$0xff]  ;;  %v841_v59 = vld [vmem:[%s8955_s20 + $0xdc8] sm:$0xff] }
 0x168   : > { %5899 = vmatprep.subr.bf16.mxu0 %v7608_v61  ;;  %6186 = vmatprep.subr.bf16.mxu1 %v7610_v62  ;;  %v845_v61 = vld [vmem:[%s8955_s20 + $0xde8] sm:$0xff]  ;;  %v7655_v62 = vcombine.low %v832_v48, %v836_v49  ;;  %v7664_v1 = vcombine.high %v840_v57, %v844_v58  ;;  %v7704_v48 = vcombine.high %v880_v40, %v884_v41 }
 0x169   : > { %v7666_v2 = vcombine.high %v841_v59, %v845_v61 }
 0x16a   : > { %5891 = vmatmul.mubr.bf16.vlgmr.msra.gmra.mrb[0].mxu0 %v9238_v3  ;;  %6178 = vmatmul.mubr.bf16.vlgmr.msra.gmra.mrb[0].mxu1 %v9238_v3 }
 0x16b   : > { %5900 = vmatpush1.bf16.msra.mxu0 %v7607_v6  ;;  %6187 = vmatpush1.bf16.msra.mxu1 %v7609_v7  ;;  %v849_v6 = vld [vmem:[%s8955_s20 + $0xe08] sm:$0xff] }
 0x16c   : > { %5901 = vmatprep.subr.bf16.mxu0 %v7616_v8  ;;  %6188 = vmatprep.subr.bf16.mxu1 %v7618_v9  ;;  %v853_v7 = vld [vmem:[%s8955_s20 + $0xe28] sm:$0xff]  ;;  %v7663_v8 = vcombine.low %v840_v57, %v844_v58  ;;  %v7665_v9 = vcombine.low %v841_v59, %v845_v61  ;;  %v7712_v57 = vcombine.high %v888_v50, %v892_v51  ;;  %v896_v59 = vld [vmem:[%s8955_s20 + $0xf80] sm:$0xff] }
 0x16d   : > { %5931 = vmatprep.mubr.bf16.mxu0 %v9244_v13  ;;  %6218 = vmatprep.mubr.bf16.mxu1 %v9244_v13  ;;  %v7674_v12 = vcombine.high %v849_v6, %v853_v7  ;;  %v900_v61 = vld [vmem:[%s8955_s20 + $0xfa0] sm:$0xff] }
 0x16f   : > { %5902 = vmatpush1.bf16.msra.mxu0 %v7615_v15  ;;  %6189 = vmatpush1.bf16.msra.mxu1 %v7617_v16  ;;  %v857_v15 = vld [vmem:[%s8955_s20 + $0xe48] sm:$0xff] }
 0x170   : > { %5903 = vmatprep.subr.bf16.mxu0 %v7624_v60  ;;  %6190 = vmatprep.subr.bf16.mxu1 %v7626_v18  ;;  %v861_v16 = vld [vmem:[%s8955_s20 + $0xe68] sm:$0xff]  ;;  %v7671_v60 = vcombine.low %v848_v4, %v852_v5  ;;  %v7673_v18 = vcombine.low %v849_v6, %v853_v7  ;;  %v7720_v4 = vcombine.high %v896_v59, %v900_v61  ;;  %v904_v6 = vld [vmem:[%s8955_s20 + $0xfc0] sm:$0xff] }
 0x171   : > { %v7682_v20 = vcombine.high %v857_v15, %v861_v16  ;;  %v908_v7 = vld [vmem:[%s8955_s20 + $0xfe0] sm:$0xff] }
 0x173   : > { %5904 = vmatpush1.bf16.msra.mxu0 %v7623_v23  ;;  %6191 = vmatpush1.bf16.msra.mxu1 %v7625_v25  ;;  %v865_v23 = vld [vmem:[%s8955_s20 + $0xe88] sm:$0xff] }
 0x174   : > { %5905 = vmatprep.subr.bf16.mxu0 %v7632_v27  ;;  %6192 = vmatprep.subr.bf16.mxu1 %v7634_v28  ;;  %v869_v25 = vld [vmem:[%s8955_s20 + $0xea8] sm:$0xff]  ;;  %v7679_v27 = vcombine.low %v856_v32, %v860_v14  ;;  %v7681_v28 = vcombine.low %v857_v15, %v861_v16  ;;  %v7728_v14 = vcombine.high %v904_v6, %v908_v7  ;;  %v912_v16 = vld [vmem:[%s8955_s20 + $0x1000] sm:$0xff] }
 0x175   : > { %v7690_v30 = vcombine.high %v865_v23, %v869_v25 }
 0x177   : > { %5906 = vmatpush1.bf16.msra.mxu0 %v7631_v34  ;;  %6193 = vmatpush1.bf16.msra.mxu1 %v7633_v0  ;;  %v873_v34 = vld [vmem:[%s8955_s20 + $0xec8] sm:$0xff] }
 0x178   : > { %5907 = vmatprep.subr.bf16.mxu0 %v7640_v36  ;;  %6194 = vmatprep.subr.bf16.mxu1 %v7642_v37  ;;  %v877_v0 = vld [vmem:[%s8955_s20 + $0xee8] sm:$0xff]  ;;  %v7687_v36 = vcombine.low %v864_v21, %v868_v22  ;;  %v7689_v37 = vcombine.low %v865_v23, %v869_v25  ;;  %v7727_v21 = vcombine.low %v904_v6, %v908_v7 }
 0x179   : > { %v7698_v39 = vcombine.high %v873_v34, %v877_v0  ;;  %v953_v6 = vld [vmem:[%s8955_s20 + $0x1148] sm:$0xff] }
 0x17a   : > { %v957_v7 = vld [vmem:[%s8955_s20 + $0x1168] sm:$0xff] }
 0x17b   : > { %5908 = vmatpush1.bf16.msra.mxu0 %v7639_v43  ;;  %6195 = vmatpush1.bf16.msra.mxu1 %v7641_v44  ;;  %v881_v43 = vld [vmem:[%s8955_s20 + $0xf08] sm:$0xff] }
 0x17c   : > { %5909 = vmatprep.subr.bf16.mxu0 %v7648_v46  ;;  %6196 = vmatprep.subr.bf16.mxu1 %v7650_v47  ;;  %v885_v44 = vld [vmem:[%s8955_s20 + $0xf28] sm:$0xff]  ;;  %v7695_v46 = vcombine.low %v872_v31, %v876_v33  ;;  %v7697_v47 = vcombine.low %v873_v34, %v877_v0 }
 0x17d   : > { %v7706_v49 = vcombine.high %v881_v43, %v885_v44  ;;  %v921_v31 = vld [vmem:[%s8955_s20 + $0x1048] sm:$0xff] }
 0x17e   : > { %v925_v33 = vld [vmem:[%s8955_s20 + $0x1068] sm:$0xff] }
 0x17f   : > { %5910 = vmatpush1.bf16.msra.mxu0 %v7647_v17  ;;  %6197 = vmatpush1.bf16.msra.mxu1 %v7649_v53  ;;  %v889_v17 = vld [vmem:[%s8955_s20 + $0xf48] sm:$0xff] }
 0x180   : > { %5911 = vmatprep.subr.bf16.mxu0 %v7656_v55  ;;  %6198 = vmatprep.subr.bf16.mxu1 %v7658_v24  ;;  %v893_v53 = vld [vmem:[%s8955_s20 + $0xf68] sm:$0xff]  ;;  %v7703_v55 = vcombine.low %v880_v40, %v884_v41  ;;  %v7705_v24 = vcombine.low %v881_v43, %v885_v44  ;;  %v7745_v44 = vcombine.low %v921_v31, %v925_v33 }
 0x181   : > { %v7714_v58 = vcombine.high %v889_v17, %v893_v53  ;;  %v933_v41 = vld [vmem:[%s8955_s20 + $0x10a8] sm:$0xff] }
 0x183   : > { %5912 = vmatpush1.bf16.msra.mxu0 %v7655_v62  ;;  %6199 = vmatpush1.bf16.msra.mxu1 %v7657_v63  ;;  %v897_v62 = vld [vmem:[%s8955_s20 + $0xf88] sm:$0xff] }
 0x184   : > { %5913 = vmatprep.subr.bf16.mxu0 %v7664_v1  ;;  %6200 = vmatprep.subr.bf16.mxu1 %v7666_v2  ;;  %v901_v63 = vld [vmem:[%s8955_s20 + $0xfa8] sm:$0xff]  ;;  %v7711_v1 = vcombine.low %v888_v50, %v892_v51  ;;  %v7713_v2 = vcombine.low %v889_v17, %v893_v53 }
 0x185   : > { %v7722_v5 = vcombine.high %v897_v62, %v901_v63  ;;  %v7721_v32 = vcombine.low %v897_v62, %v901_v63  ;;  %v937_v50 = vld [vmem:[%s8955_s20 + $0x10c8] sm:$0xff] }
 0x186   : > { %v941_v51 = vld [vmem:[%s8955_s20 + $0x10e8] sm:$0xff] }
 0x187   : > { %5914 = vmatpush1.bf16.msra.mxu0 %v7663_v8  ;;  %6201 = vmatpush1.bf16.msra.mxu1 %v7665_v9  ;;  %v905_v8 = vld [vmem:[%s8955_s20 + $0xfc8] sm:$0xff]  ;;  %v7761_v63 = vcombine.low %v937_v50, %v941_v51 }
 0x188   : > { %5915 = vmatprep.subr.bf16.mxu0 %v7672_v11  ;;  %6202 = vmatprep.subr.bf16.mxu1 %v7674_v12  ;;  %v909_v9 = vld [vmem:[%s8955_s20 + $0xfe8] sm:$0xff]  ;;  %v9305_v11 = vld [vmem:[%s8947_s6 + $0x10] sm:$0xff]  ;;  %v7719_v12 = vcombine.low %v896_v59, %v900_v61 }
 0x189   : > { %v7730_v15 = vcombine.high %v905_v8, %v909_v9  ;;  %v7729_v22 = vcombine.low %v905_v8, %v909_v9  ;;  %v945_v59 = vld [vmem:[%s8955_s20 + $0x1108] sm:$0xff] }
 0x18a   : > { %v949_v61 = vld [vmem:[%s8955_s20 + $0x1128] sm:$0xff] }
 0x18b   : > { %5916 = vmatpush1.bf16.msra.mxu0 %v7671_v60  ;;  %6203 = vmatpush1.bf16.msra.mxu1 %v7673_v18  ;;  %v916_v60 = vld [vmem:[%s8955_s20 + $0x1020] sm:$0xff]  ;;  %v9311_v18 = vrot.slane %v9305_v11, %v9006_v54  ;;  %v7769_v9 = vcombine.low %v945_v59, %v949_v61 }
 0x18c   : > { %5917 = vmatprep.subr.bf16.mxu0 %v7680_v19  ;;  %6204 = vmatprep.subr.bf16.mxu1 %v7682_v20  ;;  %v913_v19 = vld [vmem:[%s8955_s20 + $0x1008] sm:$0xff]  ;;  %v7736_v23 = vcombine.high %v912_v16, %v916_v60  ;;  %v7735_v34 = vcombine.low %v912_v16, %v916_v60 }
 0x18d   : > { %v917_v20 = vld [vmem:[%s8955_s20 + $0x1028] sm:$0xff] }
 0x18e   : > { %v7738_v25 = vcombine.high %v913_v19, %v917_v20  ;;  %v7737_v0 = vcombine.low %v913_v19, %v917_v20  ;;  %v961_v16 = vld [vmem:[%s8955_s20 + $0x1188] sm:$0xff]  ;;  %v7777_v20 = vcombine.low %v953_v6, %v957_v7 }
 0x18f   : > { %5918 = vmatpush1.bf16.msra.mxu0 %v7679_v27  ;;  %6205 = vmatpush1.bf16.msra.mxu1 %v7681_v28  ;;  %v920_v27 = vld [vmem:[%s8955_s20 + $0x1040] sm:$0xff]  ;;  %v965_v60 = vld [vmem:[%s8955_s20 + $0x11a8] sm:$0xff] }
 0x190   : > { %5919 = vmatprep.subr.bf16.mxu0 %v7688_v29  ;;  %6206 = vmatprep.subr.bf16.mxu1 %v7690_v30  ;;  %v924_v28 = vld [vmem:[%s8955_s20 + $0x1060] sm:$0xff]  ;;  %v362_v29 = vcombine.high %v9311_v18, %v9311_v18  ;;  %v9321_v30 = vpack.c.bf16 %v9228_v56, %v9228_v56  ;;  %v929_v56 = vld [vmem:[%s8955_s20 + $0x1088] sm:$0xff] }
 0x191   : > { %v7743_v43 = vcombine.low %v920_v27, %v924_v28  ;;  %v7753_v53 = vcombine.low %v929_v56, %v933_v41 }
 0x192   : > { %v9327_v40 = vpack.c.bf16 %v362_v29, %v362_v29 }
 0x193   : > { %5920 = vmatpush1.bf16.msra.mxu0 %v7687_v36  ;;  %6207 = vmatpush1.bf16.msra.mxu1 %v7689_v37  ;;  %v7744_v36 = vcombine.high %v920_v27, %v924_v28  ;;  %v7746_v37 = vcombine.high %v921_v31, %v925_v33  ;;  %v969_v27 = vld [vmem:[%s8955_s20 + $0x11c8] sm:$0xff]  ;;  %v7785_v31 = vcombine.low %v961_v16, %v965_v60 }
 0x194   : > { %5921 = vmatprep.subr.bf16.mxu0 %v7696_v38  ;;  %6208 = vmatprep.subr.bf16.mxu1 %v7698_v39  ;;  %v928_v38 = vld [vmem:[%s8955_s20 + $0x1080] sm:$0xff]  ;;  %v973_v28 = vld [vmem:[%s8955_s20 + $0x11e8] sm:$0xff] }
 0x195   : > { %v932_v39 = vld [vmem:[%s8955_s20 + $0x10a0] sm:$0xff] }
 0x196   : > { %v7751_v17 = vcombine.low %v928_v38, %v932_v39 }
 0x197   : > { %5922 = vmatpush1.bf16.msra.mxu0 %v7695_v46  ;;  %6209 = vmatpush1.bf16.msra.mxu1 %v7697_v47  ;;  %v7752_v46 = vcombine.high %v928_v38, %v932_v39  ;;  %v7754_v47 = vcombine.high %v929_v56, %v933_v41  ;;  %v981_v38 = vld [vmem:[%s8955_s20 + $0x1228] sm:$0xff]  ;;  %v7793_v56 = vcombine.low %v969_v27, %v973_v28 }
 0x198   : > { %5923 = vmatprep.subr.bf16.mxu0 %v7704_v48  ;;  %6210 = vmatprep.subr.bf16.mxu1 %v7706_v49  ;;  %v936_v48 = vld [vmem:[%s8955_s20 + $0x10c0] sm:$0xff] }
 0x199   : > { %v940_v49 = vld [vmem:[%s8955_s20 + $0x10e0] sm:$0xff] }
 0x19a   : > { %v7759_v62 = vcombine.low %v936_v48, %v940_v49 }
 0x19b   : > { %5924 = vmatpush1.bf16.msra.mxu0 %v7703_v55  ;;  %6211 = vmatpush1.bf16.msra.mxu1 %v7705_v24  ;;  %v7760_v55 = vcombine.high %v936_v48, %v940_v49  ;;  %v7762_v24 = vcombine.high %v937_v50, %v941_v51  ;;  %v989_v48 = vld [vmem:[%s8955_s20 + $0x1268] sm:$0xff] }
 0x19c   : > { %5925 = vmatprep.subr.bf16.mxu0 %v7712_v57  ;;  %6212 = vmatprep.subr.bf16.mxu1 %v7714_v58  ;;  %v944_v57 = vld [vmem:[%s8955_s20 + $0x1100] sm:$0xff] }
 0x19d   : > { %v948_v58 = vld [vmem:[%s8955_s20 + $0x1120] sm:$0xff] }
 0x19e   : > { %v7767_v8 = vcombine.low %v944_v57, %v948_v58 }
 0x19f   : > { %5926 = vmatpush1.bf16.msra.mxu0 %v7711_v1  ;;  %6213 = vmatpush1.bf16.msra.mxu1 %v7713_v2  ;;  %v7768_v1 = vcombine.high %v944_v57, %v948_v58  ;;  %v7770_v2 = vcombine.high %v945_v59, %v949_v61  ;;  %v997_v57 = vld [vmem:[%s8955_s20 + $0x12a8] sm:$0xff] }
 0x1a0   : > { %5927 = vmatprep.subr.bf16.mxu0 %v7720_v4  ;;  %6214 = vmatprep.subr.bf16.mxu1 %v7722_v5  ;;  %v952_v4 = vld [vmem:[%s8955_s20 + $0x1140] sm:$0xff] }
 0x1a1   : > { %v956_v5 = vld [vmem:[%s8955_s20 + $0x1160] sm:$0xff] }
 0x1a2   : > { %v7775_v19 = vcombine.low %v952_v4, %v956_v5 }
 0x1a3   : > { %5928 = vmatpush1.bf16.msra.mxu0 %v7719_v12  ;;  %6215 = vmatpush1.bf16.msra.mxu1 %v7721_v32  ;;  %v7776_v12 = vcombine.high %v952_v4, %v956_v5  ;;  %v7778_v32 = vcombine.high %v953_v6, %v957_v7  ;;  %v1005_v4 = vld [vmem:[%s8955_s20 + $0x12e8] sm:$0xff] }
 0x1a4   : > { %5929 = vmatprep.subr.bf16.mxu0 %v7728_v14  ;;  %6216 = vmatprep.subr.bf16.mxu1 %v7730_v15  ;;  %v960_v14 = vld [vmem:[%s8955_s20 + $0x1180] sm:$0xff] }
 0x1a5   : > { %v964_v15 = vld [vmem:[%s8955_s20 + $0x11a0] sm:$0xff] }
 0x1a6   : > { %v7783_v29 = vcombine.low %v960_v14, %v964_v15 }
 0x1a7   : > { %5930 = vmatpush1.bf16.msra.mxu0 %v7727_v21  ;;  %6217 = vmatpush1.bf16.msra.mxu1 %v7729_v22  ;;  %v7784_v21 = vcombine.high %v960_v14, %v964_v15  ;;  %v7786_v22 = vcombine.high %v961_v16, %v965_v60  ;;  %v1013_v14 = vld [vmem:[%s8955_s20 + $0x1328] sm:$0xff] }
 0x1a8   : > { %5940 = vmatprep.subr.bf16.mxu0 %v7736_v23  ;;  %6227 = vmatprep.subr.bf16.mxu1 %v7738_v25  ;;  %v968_v23 = vld [vmem:[%s8955_s20 + $0x11c0] sm:$0xff] }
 0x1a9   : > { %v972_v25 = vld [vmem:[%s8955_s20 + $0x11e0] sm:$0xff] }
 0x1aa   : > { %5932 = vmatmul.mubr.bf16.vlgmr.msra.gmra.mrb[0].mxu0 %v9321_v30  ;;  %6219 = vmatmul.mubr.bf16.vlgmr.msra.gmra.mrb[0].mxu1 %v9321_v30  ;;  %v7792_v33 = vcombine.high %v968_v23, %v972_v25  ;;  %v7791_v39 = vcombine.low %v968_v23, %v972_v25  ;;  %v1021_v23 = vld [vmem:[%s8955_s20 + $0x1368] sm:$0xff] }
 0x1ab   : > { %5941 = vmatpush1.bf16.msra.mxu0 %v7735_v34  ;;  %6228 = vmatpush1.bf16.msra.mxu1 %v7737_v0  ;;  %v7794_v34 = vcombine.high %v969_v27, %v973_v28  ;;  %v976_v0 = vld [vmem:[%s8955_s20 + $0x1200] sm:$0xff] }
 0x1ac   : > { %5942 = vmatprep.subr.bf16.mxu0 %v7744_v36  ;;  %6229 = vmatprep.subr.bf16.mxu1 %v7746_v37  ;;  %v980_v36 = vld [vmem:[%s8955_s20 + $0x1220] sm:$0xff]  ;;  %v977_v37 = vld [vmem:[%s8955_s20 + $0x1208] sm:$0xff] }
 0x1ad   : > { %5972 = vmatprep.mubr.bf16.mxu0 %v9327_v40  ;;  %6259 = vmatprep.mubr.bf16.mxu1 %v9327_v40  ;;  %v7800_v41 = vcombine.high %v976_v0, %v980_v36  ;;  %v7799_v49 = vcombine.low %v976_v0, %v980_v36  ;;  %v7801_v50 = vcombine.low %v977_v37, %v981_v38  ;;  %v1029_v0 = vld [vmem:[%s8955_s20 + $0x13a8] sm:$0xff] }
 0x1af   : > { %5943 = vmatpush1.bf16.msra.mxu0 %v7743_v43  ;;  %6230 = vmatpush1.bf16.msra.mxu1 %v7745_v44  ;;  %v7802_v43 = vcombine.high %v977_v37, %v981_v38  ;;  %v984_v44 = vld [vmem:[%s8955_s20 + $0x1240] sm:$0xff] }
 0x1b0   : > { %5944 = vmatprep.subr.bf16.mxu0 %v7752_v46  ;;  %6231 = vmatprep.subr.bf16.mxu1 %v7754_v47  ;;  %v988_v46 = vld [vmem:[%s8955_s20 + $0x1260] sm:$0xff]  ;;  %v985_v47 = vld [vmem:[%s8955_s20 + $0x1248] sm:$0xff] }
 0x1b1   : > { %v7808_v51 = vcombine.high %v984_v44, %v988_v46  ;;  %v7807_v58 = vcombine.low %v984_v44, %v988_v46  ;;  %v7809_v59 = vcombine.low %v985_v47, %v989_v48  ;;  %v1033_v44 = vld [vmem:[%s8955_s20 + $0x13c8] sm:$0xff] }
 0x1b2   : > { %v1037_v46 = vld [vmem:[%s8955_s20 + $0x13e8] sm:$0xff] }
 0x1b3   : > { %5945 = vmatpush1.bf16.msra.mxu0 %v7751_v17  ;;  %6232 = vmatpush1.bf16.msra.mxu1 %v7753_v53  ;;  %v7810_v17 = vcombine.high %v985_v47, %v989_v48  ;;  %v992_v53 = vld [vmem:[%s8955_s20 + $0x1280] sm:$0xff] }
 0x1b4   : > { %5946 = vmatprep.subr.bf16.mxu0 %v7760_v55  ;;  %6233 = vmatprep.subr.bf16.mxu1 %v7762_v24  ;;  %v996_v55 = vld [vmem:[%s8955_s20 + $0x12a0] sm:$0xff]  ;;  %v993_v24 = vld [vmem:[%s8955_s20 + $0x1288] sm:$0xff] }
 0x1b5   : > { %v7816_v61 = vcombine.high %v992_v53, %v996_v55  ;;  %v7815_v5 = vcombine.low %v992_v53, %v996_v55  ;;  %v7817_v6 = vcombine.low %v993_v24, %v997_v57  ;;  %v1045_v55 = vld [vmem:[%s8955_s20 + $0x1428] sm:$0xff] }
 0x1b7   : > { %5947 = vmatpush1.bf16.msra.mxu0 %v7759_v62  ;;  %6234 = vmatpush1.bf16.msra.mxu1 %v7761_v63  ;;  %v7818_v62 = vcombine.high %v993_v24, %v997_v57  ;;  %v1000_v63 = vld [vmem:[%s8955_s20 + $0x12c0] sm:$0xff]  ;;  %v7857_v57 = vcombine.low %v1033_v44, %v1037_v46 }
 0x1b8   : > { %5948 = vmatprep.subr.bf16.mxu0 %v7768_v1  ;;  %6235 = vmatprep.subr.bf16.mxu1 %v7770_v2  ;;  %v1004_v1 = vld [vmem:[%s8955_s20 + $0x12e0] sm:$0xff]  ;;  %v1001_v2 = vld [vmem:[%s8955_s20 + $0x12c8] sm:$0xff] }
 0x1b9   : > { %v7824_v7 = vcombine.high %v1000_v63, %v1004_v1  ;;  %v7823_v15 = vcombine.low %v1000_v63, %v1004_v1  ;;  %v7825_v16 = vcombine.low %v1001_v2, %v1005_v4  ;;  %v9402_v1 = vpack.c.bf16 %v9311_v18, %v9311_v18  ;;  %v1057_v18 = vld [vmem:[%s8955_s20 + $0x1488] sm:$0xff] }
 0x1bb   : > { %5949 = vmatpush1.bf16.msra.mxu0 %v7767_v8  ;;  %6236 = vmatpush1.bf16.msra.mxu1 %v7769_v9  ;;  %v7826_v8 = vcombine.high %v1001_v2, %v1005_v4  ;;  %v1008_v9 = vld [vmem:[%s8955_s20 + $0x1300] sm:$0xff]  ;;  %v1049_v2 = vld [vmem:[%s8955_s20 + $0x1448] sm:$0xff] }
 0x1bc   : > { %5950 = vmatprep.subr.bf16.mxu0 %v7776_v12  ;;  %6237 = vmatprep.subr.bf16.mxu1 %v7778_v32  ;;  %v1012_v12 = vld [vmem:[%s8955_s20 + $0x1320] sm:$0xff]  ;;  %v1009_v32 = vld [vmem:[%s8955_s20 + $0x1308] sm:$0xff] }
 0x1bd   : > { %v7832_v60 = vcombine.high %v1008_v9, %v1012_v12  ;;  %v7831_v25 = vcombine.low %v1008_v9, %v1012_v12  ;;  %v7833_v27 = vcombine.low %v1009_v32, %v1013_v14  ;;  %v1053_v4 = vld [vmem:[%s8955_s20 + $0x1468] sm:$0xff]  ;;  %v1056_v9 = vld [vmem:[%s8955_s20 + $0x1480] sm:$0xff] }
 0x1be   : > { %v1060_v12 = vld [vmem:[%s8955_s20 + $0x14a0] sm:$0xff] }
 0x1bf   : > { %5951 = vmatpush1.bf16.msra.mxu0 %v7775_v19  ;;  %6238 = vmatpush1.bf16.msra.mxu1 %v7777_v20  ;;  %v7834_v19 = vcombine.high %v1009_v32, %v1013_v14  ;;  %v1016_v20 = vld [vmem:[%s8955_s20 + $0x1340] sm:$0xff]  ;;  %v1061_v14 = vld [vmem:[%s8955_s20 + $0x14a8] sm:$0xff] }
 0x1c0   : > { %5952 = vmatprep.subr.bf16.mxu0 %v7784_v21  ;;  %6239 = vmatprep.subr.bf16.mxu1 %v7786_v22  ;;  %v1020_v21 = vld [vmem:[%s8955_s20 + $0x1360] sm:$0xff]  ;;  %v1017_v22 = vld [vmem:[%s8955_s20 + $0x1348] sm:$0xff] }
 0x1c1   : > { %v7840_v28 = vcombine.high %v1016_v20, %v1020_v21  ;;  %v7839_v36 = vcombine.low %v1016_v20, %v1020_v21  ;;  %v7841_v37 = vcombine.low %v1017_v22, %v1021_v23  ;;  %v1064_v20 = vld [vmem:[%s8955_s20 + $0x14c0] sm:$0xff] }
 0x1c2   : > { %v1068_v21 = vld [vmem:[%s8955_s20 + $0x14e0] sm:$0xff] }
 0x1c3   : > { %5953 = vmatpush1.bf16.msra.mxu0 %v7783_v29  ;;  %6240 = vmatpush1.bf16.msra.mxu1 %v7785_v31  ;;  %v7842_v29 = vcombine.high %v1017_v22, %v1021_v23  ;;  %v1024_v31 = vld [vmem:[%s8955_s20 + $0x1380] sm:$0xff]  ;;  %v1065_v22 = vld [vmem:[%s8955_s20 + $0x14c8] sm:$0xff] }
 0x1c4   : > { %5954 = vmatprep.subr.bf16.mxu0 %v7792_v33  ;;  %6241 = vmatprep.subr.bf16.mxu1 %v7794_v34  ;;  %v1028_v33 = vld [vmem:[%s8955_s20 + $0x13a0] sm:$0xff]  ;;  %v1025_v34 = vld [vmem:[%s8955_s20 + $0x1388] sm:$0xff] }
 0x1c5   : > { %v7848_v38 = vcombine.high %v1024_v31, %v1028_v33  ;;  %v7847_v47 = vcombine.low %v1024_v31, %v1028_v33  ;;  %v7849_v48 = vcombine.low %v1025_v34, %v1029_v0  ;;  %v1069_v23 = vld [vmem:[%s8955_s20 + $0x14e8] sm:$0xff]  ;;  %v1072_v31 = vld [vmem:[%s8955_s20 + $0x1500] sm:$0xff] }
 0x1c6   : > { %v1076_v33 = vld [vmem:[%s8955_s20 + $0x1520] sm:$0xff] }
 0x1c7   : > { %5955 = vmatpush1.bf16.msra.mxu0 %v7791_v39  ;;  %6242 = vmatpush1.bf16.msra.mxu1 %v7793_v56  ;;  %v7850_v39 = vcombine.high %v1025_v34, %v1029_v0  ;;  %v1032_v56 = vld [vmem:[%s8955_s20 + $0x13c0] sm:$0xff]  ;;  %v1073_v34 = vld [vmem:[%s8955_s20 + $0x1508] sm:$0xff] }
 0x1c8   : > { %5956 = vmatprep.subr.bf16.mxu0 %v7800_v41  ;;  %6243 = vmatprep.subr.bf16.mxu1 %v7802_v43  ;;  %v1036_v41 = vld [vmem:[%s8955_s20 + $0x13e0] sm:$0xff]  ;;  %v347_v43 = vcombine.high %v9305_v11, %v9305_v11  ;;  %v1041_v11 = vld [vmem:[%s8955_s20 + $0x1408] sm:$0xff] }
 0x1c9   : > { %v7855_v24 = vcombine.low %v1032_v56, %v1036_v41  ;;  %v1077_v0 = vld [vmem:[%s8955_s20 + $0x1528] sm:$0xff] }
 0x1ca   : > { %v9392_v53 = vrot.slane %v347_v43, %v9006_v54  ;;  %v1081_v43 = vld [vmem:[%s8955_s20 + $0x1548] sm:$0xff] }
 0x1cb   : > { %5957 = vmatpush1.bf16.msra.mxu0 %v7799_v49  ;;  %6244 = vmatpush1.bf16.msra.mxu1 %v7801_v50  ;;  %v7856_v49 = vcombine.high %v1032_v56, %v1036_v41  ;;  %v7858_v50 = vcombine.high %v1033_v44, %v1037_v46  ;;  %v1080_v56 = vld [vmem:[%s8955_s20 + $0x1540] sm:$0xff]  ;;  %v1085_v44 = vld [vmem:[%s8955_s20 + $0x1568] sm:$0xff]  ;;  %v7895_v46 = vcombine.low %v1072_v31, %v1076_v33 }
 0x1cc   : > { %5958 = vmatprep.subr.bf16.mxu0 %v7808_v51  ;;  %6245 = vmatprep.subr.bf16.mxu1 %v7810_v17  ;;  %v1040_v51 = vld [vmem:[%s8955_s20 + $0x1400] sm:$0xff]  ;;  %v363_v63 = vcombine.high %v9392_v53, %v9392_v53 }
 0x1cd   : > { %v1044_v17 = vld [vmem:[%s8955_s20 + $0x1420] sm:$0xff] }
 0x1ce   : > { %v9408_v32 = vpack.c.bf16 %v363_v63, %v363_v63  ;;  %v1084_v41 = vld [vmem:[%s8955_s20 + $0x1560] sm:$0xff]  ;;  %v1101_v63 = vld [vmem:[%s8955_s20 + $0x15e8] sm:$0xff] }
 0x1cf   : > { %5959 = vmatpush1.bf16.msra.mxu0 %v7807_v58  ;;  %6246 = vmatpush1.bf16.msra.mxu1 %v7809_v59  ;;  %v7864_v58 = vcombine.high %v1040_v51, %v1044_v17  ;;  %v7866_v59 = vcombine.high %v1041_v11, %v1045_v55 }
 0x1d0   : > { %5960 = vmatprep.subr.bf16.mxu0 %v7816_v61  ;;  %6247 = vmatprep.subr.bf16.mxu1 %v7818_v62  ;;  %v1048_v61 = vld [vmem:[%s8955_s20 + $0x1440] sm:$0xff] }
 0x1d1   : > { %v1052_v62 = vld [vmem:[%s8955_s20 + $0x1460] sm:$0xff] }
 0x1d3   : > { %5961 = vmatpush1.bf16.msra.mxu0 %v7815_v5  ;;  %6248 = vmatpush1.bf16.msra.mxu1 %v7817_v6  ;;  %v7863_v5 = vcombine.low %v1040_v51, %v1044_v17  ;;  %v7865_v6 = vcombine.low %v1041_v11, %v1045_v55  ;;  %v1092_v51 = vld [vmem:[%s8955_s20 + $0x15a0] sm:$0xff]  ;;  %v1089_v17 = vld [vmem:[%s8955_s20 + $0x1588] sm:$0xff]  ;;  %v7903_v55 = vcombine.low %v1080_v56, %v1084_v41 }
 0x1d4   : > { %5962 = vmatprep.subr.bf16.mxu0 %v7824_v7  ;;  %6249 = vmatprep.subr.bf16.mxu1 %v7826_v8  ;;  %v7872_v7 = vcombine.high %v1048_v61, %v1052_v62  ;;  %v7874_v8 = vcombine.high %v1049_v2, %v1053_v4  ;;  %v1093_v11 = vld [vmem:[%s8955_s20 + $0x15a8] sm:$0xff] }
 0x1d7   : > { %5963 = vmatpush1.bf16.msra.mxu0 %v7823_v15  ;;  %6250 = vmatpush1.bf16.msra.mxu1 %v7825_v16  ;;  %v7871_v15 = vcombine.low %v1048_v61, %v1052_v62  ;;  %v7873_v16 = vcombine.low %v1049_v2, %v1053_v4  ;;  %v1100_v61 = vld [vmem:[%s8955_s20 + $0x15e0] sm:$0xff]  ;;  %v1097_v62 = vld [vmem:[%s8955_s20 + $0x15c8] sm:$0xff]  ;;  %v7913_v4 = vcombine.low %v1089_v17, %v1093_v11 }
 0x1d8   : > { %5964 = vmatprep.subr.bf16.mxu0 %v7832_v60  ;;  %6251 = vmatprep.subr.bf16.mxu1 %v7834_v19  ;;  %v7880_v60 = vcombine.high %v1056_v9, %v1060_v12  ;;  %v7882_v19 = vcombine.high %v1057_v18, %v1061_v14 }
 0x1db   : > { %5965 = vmatpush1.bf16.msra.mxu0 %v7831_v25  ;;  %6252 = vmatpush1.bf16.msra.mxu1 %v7833_v27  ;;  %v7879_v25 = vcombine.low %v1056_v9, %v1060_v12  ;;  %v7881_v27 = vcombine.low %v1057_v18, %v1061_v14  ;;  %v1105_v9 = vld [vmem:[%s8955_s20 + $0x1608] sm:$0xff]  ;;  %v7921_v14 = vcombine.low %v1097_v62, %v1101_v63 }
 0x1dc   : > { %5966 = vmatprep.subr.bf16.mxu0 %v7840_v28  ;;  %6253 = vmatprep.subr.bf16.mxu1 %v7842_v29  ;;  %v7888_v28 = vcombine.high %v1064_v20, %v1068_v21  ;;  %v7890_v29 = vcombine.high %v1065_v22, %v1069_v23  ;;  %v1109_v12 = vld [vmem:[%s8955_s20 + $0x1628] sm:$0xff] }
 0x1df   : > { %5967 = vmatpush1.bf16.msra.mxu0 %v7839_v36  ;;  %6254 = vmatpush1.bf16.msra.mxu1 %v7841_v37  ;;  %v7887_v36 = vcombine.low %v1064_v20, %v1068_v21  ;;  %v7889_v37 = vcombine.low %v1065_v22, %v1069_v23  ;;  %v1113_v20 = vld [vmem:[%s8955_s20 + $0x1648] sm:$0xff]  ;;  %v7929_v23 = vcombine.low %v1105_v9, %v1109_v12 }
 0x1e0   : > { %5968 = vmatprep.subr.bf16.mxu0 %v7848_v38  ;;  %6255 = vmatprep.subr.bf16.mxu1 %v7850_v39  ;;  %v7896_v38 = vcombine.high %v1072_v31, %v1076_v33  ;;  %v7898_v39 = vcombine.high %v1073_v34, %v1077_v0  ;;  %v1117_v21 = vld [vmem:[%s8955_s20 + $0x1668] sm:$0xff] }
 0x1e1   : > { %v1121_v31 = vld [vmem:[%s8955_s20 + $0x1688] sm:$0xff] }
 0x1e2   : > { %v1125_v33 = vld [vmem:[%s8955_s20 + $0x16a8] sm:$0xff] }
 0x1e3   : > { %5969 = vmatpush1.bf16.msra.mxu0 %v7847_v47  ;;  %6256 = vmatpush1.bf16.msra.mxu1 %v7849_v48  ;;  %v7897_v47 = vcombine.low %v1073_v34, %v1077_v0  ;;  %v7904_v48 = vcombine.high %v1080_v56, %v1084_v41  ;;  %v7937_v0 = vcombine.low %v1113_v20, %v1117_v21  ;;  %v1129_v56 = vld [vmem:[%s8955_s20 + $0x16c8] sm:$0xff] }
 0x1e4   : > { %5970 = vmatprep.subr.bf16.mxu0 %v7856_v49  ;;  %6257 = vmatprep.subr.bf16.mxu1 %v7858_v50  ;;  %v7906_v49 = vcombine.high %v1081_v43, %v1085_v44  ;;  %v1088_v50 = vld [vmem:[%s8955_s20 + $0x1580] sm:$0xff]  ;;  %v1133_v41 = vld [vmem:[%s8955_s20 + $0x16e8] sm:$0xff] }
 0x1e5   : > { %v7911_v2 = vcombine.low %v1088_v50, %v1092_v51 }
 0x1e7   : > { %5971 = vmatpush1.bf16.msra.mxu0 %v7855_v24  ;;  %6258 = vmatpush1.bf16.msra.mxu1 %v7857_v57  ;;  %v7905_v24 = vcombine.low %v1081_v43, %v1085_v44  ;;  %v7912_v57 = vcombine.high %v1088_v50, %v1092_v51  ;;  %v7945_v44 = vcombine.low %v1121_v31, %v1125_v33  ;;  %v1137_v50 = vld [vmem:[%s8955_s20 + $0x1708] sm:$0xff] }
 0x1e8   : > { %5981 = vmatprep.subr.bf16.mxu0 %v7864_v58  ;;  %6268 = vmatprep.subr.bf16.mxu1 %v7866_v59  ;;  %v7914_v58 = vcombine.high %v1089_v17, %v1093_v11  ;;  %v1096_v59 = vld [vmem:[%s8955_s20 + $0x15c0] sm:$0xff]  ;;  %v1141_v51 = vld [vmem:[%s8955_s20 + $0x1728] sm:$0xff]  ;;  %v7953_v11 = vcombine.low %v1129_v56, %v1133_v41 }
 0x1e9   : > { %v7919_v18 = vcombine.low %v1096_v59, %v1100_v61 }
 0x1ea   : > { %5973 = vmatmul.mubr.bf16.vlgmr.msra.gmra.mrb[0].mxu0 %v9402_v1  ;;  %6260 = vmatmul.mubr.bf16.vlgmr.msra.gmra.mrb[0].mxu1 %v9402_v1 }
 0x1eb   : > { %5982 = vmatpush1.bf16.msra.mxu0 %v7863_v5  ;;  %6269 = vmatpush1.bf16.msra.mxu1 %v7865_v6  ;;  %v7920_v5 = vcombine.high %v1096_v59, %v1100_v61  ;;  %v7922_v6 = vcombine.high %v1097_v62, %v1101_v63  ;;  %v1145_v59 = vld [vmem:[%s8955_s20 + $0x1748] sm:$0xff]  ;;  %v7961_v63 = vcombine.low %v1137_v50, %v1141_v51 }
 0x1ec   : > { %5983 = vmatprep.subr.bf16.mxu0 %v7872_v7  ;;  %6270 = vmatprep.subr.bf16.mxu1 %v7874_v8  ;;  %v1104_v7 = vld [vmem:[%s8955_s20 + $0x1600] sm:$0xff]  ;;  %v1149_v61 = vld [vmem:[%s8955_s20 + $0x1768] sm:$0xff] }
 0x1ed   : > { %6013 = vmatprep.mubr.bf16.mxu0 %v9408_v32  ;;  %6300 = vmatprep.mubr.bf16.mxu1 %v9408_v32  ;;  %v1108_v8 = vld [vmem:[%s8955_s20 + $0x1620] sm:$0xff] }
 0x1ee   : > { %v7927_v22 = vcombine.low %v1104_v7, %v1108_v8 }
 0x1ef   : > { %5984 = vmatpush1.bf16.msra.mxu0 %v7871_v15  ;;  %6271 = vmatpush1.bf16.msra.mxu1 %v7873_v16  ;;  %v7928_v15 = vcombine.high %v1104_v7, %v1108_v8  ;;  %v7930_v16 = vcombine.high %v1105_v9, %v1109_v12  ;;  %v1153_v7 = vld [vmem:[%s8955_s20 + $0x1788] sm:$0xff]  ;;  %v7969_v12 = vcombine.low %v1145_v59, %v1149_v61 }
 0x1f0   : > { %5985 = vmatprep.subr.bf16.mxu0 %v7880_v60  ;;  %6272 = vmatprep.subr.bf16.mxu1 %v7882_v19  ;;  %v1112_v60 = vld [vmem:[%s8955_s20 + $0x1640] sm:$0xff]  ;;  %v1157_v8 = vld [vmem:[%s8955_s20 + $0x17a8] sm:$0xff] }
 0x1f1   : > { %v1116_v19 = vld [vmem:[%s8955_s20 + $0x1660] sm:$0xff] }
 0x1f2   : > { %v7935_v34 = vcombine.low %v1112_v60, %v1116_v19 }
 0x1f3   : > { %5986 = vmatpush1.bf16.msra.mxu0 %v7879_v25  ;;  %6273 = vmatpush1.bf16.msra.mxu1 %v7881_v27  ;;  %v7936_v25 = vcombine.high %v1112_v60, %v1116_v19  ;;  %v7938_v27 = vcombine.high %v1113_v20, %v1117_v21  ;;  %v1161_v60 = vld [vmem:[%s8955_s20 + $0x17c8] sm:$0xff]  ;;  %v7977_v21 = vcombine.low %v1153_v7, %v1157_v8 }
 0x1f4   : > { %5987 = vmatprep.subr.bf16.mxu0 %v7888_v28  ;;  %6274 = vmatprep.subr.bf16.mxu1 %v7890_v29  ;;  %v1120_v28 = vld [vmem:[%s8955_s20 + $0x1680] sm:$0xff]  ;;  %v1165_v19 = vld [vmem:[%s8955_s20 + $0x17e8] sm:$0xff] }
 0x1f5   : > { %v1124_v29 = vld [vmem:[%s8955_s20 + $0x16a0] sm:$0xff] }
 0x1f6   : > { %v7943_v43 = vcombine.low %v1120_v28, %v1124_v29 }
 0x1f7   : > { %5988 = vmatpush1.bf16.msra.mxu0 %v7887_v36  ;;  %6275 = vmatpush1.bf16.msra.mxu1 %v7889_v37  ;;  %v7944_v36 = vcombine.high %v1120_v28, %v1124_v29  ;;  %v7946_v37 = vcombine.high %v1121_v31, %v1125_v33  ;;  %v1169_v28 = vld [vmem:[%s8955_s20 + $0x1808] sm:$0xff]  ;;  %v9473_v31 = vld.sshfl [vmem:[%s8947_s6 + $0x18] sm:$0x33 pattern:$0x76325410] }
 0x1f8   : > { %5989 = vmatprep.subr.bf16.mxu0 %v7896_v38  ;;  %6276 = vmatprep.subr.bf16.mxu1 %v7898_v39  ;;  %v1128_v38 = vld [vmem:[%s8955_s20 + $0x16c0] sm:$0xff]  ;;  %v1173_v29 = vld [vmem:[%s8955_s20 + $0x1828] sm:$0xff] }
 0x1f9   : > { %v1132_v39 = vld [vmem:[%s8955_s20 + $0x16e0] sm:$0xff] }
 0x1fa   : > { %v7951_v17 = vcombine.low %v1128_v38, %v1132_v39 }
 0x1fb   : > { %5990 = vmatpush1.bf16.msra.mxu0 %v7895_v46  ;;  %6277 = vmatpush1.bf16.msra.mxu1 %v7897_v47  ;;  %v7952_v46 = vcombine.high %v1128_v38, %v1132_v39  ;;  %v7954_v47 = vcombine.high %v1129_v56, %v1133_v41  ;;  %v1180_v38 = vld [vmem:[%s8955_s20 + $0x1860] sm:$0xff]  ;;  %v371_v39 = vcombine.high %v9473_v31, %v9473_v31  ;;  %v1177_v41 = vld [vmem:[%s8955_s20 + $0x1848] sm:$0xff] }
 0x1fc   : > { %5991 = vmatprep.subr.bf16.mxu0 %v7904_v48  ;;  %6278 = vmatprep.subr.bf16.mxu1 %v7906_v49  ;;  %v1136_v48 = vld [vmem:[%s8955_s20 + $0x1700] sm:$0xff]  ;;  %v9481_v56 = vpack.c.bf16 %v9392_v53, %v9392_v53  ;;  %v1185_v53 = vld [vmem:[%s8955_s20 + $0x1888] sm:$0xff] }
 0x1fd   : > { %v1140_v49 = vld [vmem:[%s8955_s20 + $0x1720] sm:$0xff] }
 0x1fe   : > { %v7959_v62 = vcombine.low %v1136_v48, %v1140_v49 }
 0x1ff   : > { %5992 = vmatpush1.bf16.msra.mxu0 %v7903_v55  ;;  %6279 = vmatpush1.bf16.msra.mxu1 %v7905_v24  ;;  %v7960_v55 = vcombine.high %v1136_v48, %v1140_v49  ;;  %v7962_v24 = vcombine.high %v1137_v50, %v1141_v51  ;;  %v1184_v49 = vld [vmem:[%s8955_s20 + $0x1880] sm:$0xff]  ;;  %v9487_v51 = vpack.c.bf16 %v371_v39, %v371_v39 }
 0x200   : > { %5993 = vmatprep.subr.bf16.mxu0 %v7912_v57  ;;  %6280 = vmatprep.subr.bf16.mxu1 %v7914_v58  ;;  %v1144_v57 = vld [vmem:[%s8955_s20 + $0x1740] sm:$0xff] }
 0x201   : > { %v1148_v58 = vld [vmem:[%s8955_s20 + $0x1760] sm:$0xff] }
 0x202   : > { %v7967_v9 = vcombine.low %v1144_v57, %v1148_v58  ;;  %v1188_v50 = vld [vmem:[%s8955_s20 + $0x18a0] sm:$0xff] }
 0x203   : > { %5994 = vmatpush1.bf16.msra.mxu0 %v7911_v2  ;;  %6281 = vmatpush1.bf16.msra.mxu1 %v7913_v4  ;;  %v7968_v2 = vcombine.high %v1144_v57, %v1148_v58  ;;  %v7970_v4 = vcombine.high %v1145_v59, %v1149_v61  ;;  %v1192_v58 = vld [vmem:[%s8955_s20 + $0x18c0] sm:$0xff]  ;;  %v1193_v61 = vld [vmem:[%s8955_s20 + $0x18c8] sm:$0xff] }
 0x204   : > { %5995 = vmatprep.subr.bf16.mxu0 %v7920_v5  ;;  %6282 = vmatprep.subr.bf16.mxu1 %v7922_v6  ;;  %v1152_v5 = vld [vmem:[%s8955_s20 + $0x1780] sm:$0xff] }
 0x205   : > { %v1156_v6 = vld [vmem:[%s8955_s20 + $0x17a0] sm:$0xff] }
 0x206   : > { %v7975_v20 = vcombine.low %v1152_v5, %v1156_v6  ;;  %v1196_v59 = vld [vmem:[%s8955_s20 + $0x18e0] sm:$0xff] }
 0x207   : > { %5996 = vmatpush1.bf16.msra.mxu0 %v7919_v18  ;;  %6283 = vmatpush1.bf16.msra.mxu1 %v7921_v14  ;;  %v7976_v18 = vcombine.high %v1152_v5, %v1156_v6  ;;  %v7978_v14 = vcombine.high %v1153_v7, %v1157_v8  ;;  %v1200_v6 = vld [vmem:[%s8955_s20 + $0x1900] sm:$0xff]  ;;  %v1201_v8 = vld [vmem:[%s8955_s20 + $0x1908] sm:$0xff] }
 0x208   : > { %5997 = vmatprep.subr.bf16.mxu0 %v7928_v15  ;;  %6284 = vmatprep.subr.bf16.mxu1 %v7930_v16  ;;  %v1160_v15 = vld [vmem:[%s8955_s20 + $0x17c0] sm:$0xff] }
 0x209   : > { %v1164_v16 = vld [vmem:[%s8955_s20 + $0x17e0] sm:$0xff] }
 0x20a   : > { %v7983_v33 = vcombine.low %v1160_v15, %v1164_v16  ;;  %v1204_v7 = vld [vmem:[%s8955_s20 + $0x1920] sm:$0xff] }
 0x20b   : > { %5998 = vmatpush1.bf16.msra.mxu0 %v7927_v22  ;;  %6285 = vmatpush1.bf16.msra.mxu1 %v7929_v23  ;;  %v7984_v22 = vcombine.high %v1160_v15, %v1164_v16  ;;  %v7986_v23 = vcombine.high %v1161_v60, %v1165_v19  ;;  %v1208_v16 = vld [vmem:[%s8955_s20 + $0x1940] sm:$0xff] }
 0x20c   : > { %5999 = vmatprep.subr.bf16.mxu0 %v7936_v25  ;;  %6286 = vmatprep.subr.bf16.mxu1 %v7938_v27  ;;  %v1168_v25 = vld [vmem:[%s8955_s20 + $0x1800] sm:$0xff] }
 0x20d   : > { %v1172_v27 = vld [vmem:[%s8955_s20 + $0x1820] sm:$0xff] }
 0x20e   : > { %v1228_v39 = vld [vmem:[%s8955_s20 + $0x19e0] sm:$0xff] }
 0x20f   : > { %6000 = vmatpush1.bf16.msra.mxu0 %v7935_v34  ;;  %6287 = vmatpush1.bf16.msra.mxu1 %v7937_v0  ;;  %v7985_v34 = vcombine.low %v1161_v60, %v1165_v19  ;;  %v7992_v0 = vcombine.high %v1168_v25, %v1172_v27  ;;  %v1212_v60 = vld [vmem:[%s8955_s20 + $0x1960] sm:$0xff]  ;;  %v1209_v19 = vld [vmem:[%s8955_s20 + $0x1948] sm:$0xff] }
 0x210   : > { %6001 = vmatprep.subr.bf16.mxu0 %v7944_v36  ;;  %6288 = vmatprep.subr.bf16.mxu1 %v7946_v37  ;;  %v7994_v36 = vcombine.high %v1169_v28, %v1173_v29  ;;  %v1176_v37 = vld [vmem:[%s8955_s20 + $0x1840] sm:$0xff] }
 0x213   : > { %6002 = vmatpush1.bf16.msra.mxu0 %v7943_v43  ;;  %6289 = vmatpush1.bf16.msra.mxu1 %v7945_v44  ;;  %v1181_v43 = vld [vmem:[%s8955_s20 + $0x1868] sm:$0xff]  ;;  %v7991_v44 = vcombine.low %v1168_v25, %v1172_v27  ;;  %v1216_v27 = vld [vmem:[%s8955_s20 + $0x1980] sm:$0xff] }
 0x214   : > { %6003 = vmatprep.subr.bf16.mxu0 %v7952_v46  ;;  %6290 = vmatprep.subr.bf16.mxu1 %v7954_v47  ;;  %v7993_v46 = vcombine.low %v1169_v28, %v1173_v29  ;;  %v8000_v47 = vcombine.high %v1176_v37, %v1180_v38  ;;  %v8002_v48 = vcombine.high %v1177_v41, %v1181_v43  ;;  %v1220_v28 = vld [vmem:[%s8955_s20 + $0x19a0] sm:$0xff]  ;;  %v1217_v29 = vld [vmem:[%s8955_s20 + $0x1988] sm:$0xff] }
 0x217   : > { %6004 = vmatpush1.bf16.msra.mxu0 %v7951_v17  ;;  %6291 = vmatpush1.bf16.msra.mxu1 %v7953_v11  ;;  %v1189_v17 = vld [vmem:[%s8955_s20 + $0x18a8] sm:$0xff]  ;;  %v7999_v11 = vcombine.low %v1176_v37, %v1180_v38  ;;  %v1224_v38 = vld [vmem:[%s8955_s20 + $0x19c0] sm:$0xff] }
 0x218   : > { %6005 = vmatprep.subr.bf16.mxu0 %v7960_v55  ;;  %6292 = vmatprep.subr.bf16.mxu1 %v7962_v24  ;;  %v8001_v55 = vcombine.low %v1177_v41, %v1181_v43  ;;  %v8008_v24 = vcombine.high %v1184_v49, %v1188_v50  ;;  %v8010_v57 = vcombine.high %v1185_v53, %v1189_v17  ;;  %v1225_v41 = vld [vmem:[%s8955_s20 + $0x19c8] sm:$0xff] }
 0x219   : > { %v1229_v43 = vld [vmem:[%s8955_s20 + $0x19e8] sm:$0xff] }
 0x21b   : > { %6006 = vmatpush1.bf16.msra.mxu0 %v7959_v62  ;;  %6293 = vmatpush1.bf16.msra.mxu1 %v7961_v63  ;;  %v1197_v62 = vld [vmem:[%s8955_s20 + $0x18e8] sm:$0xff]  ;;  %v8007_v63 = vcombine.low %v1184_v49, %v1188_v50  ;;  %v1232_v49 = vld [vmem:[%s8955_s20 + $0x1a00] sm:$0xff] }
 0x21c   : > { %6007 = vmatprep.subr.bf16.mxu0 %v7968_v2  ;;  %6294 = vmatprep.subr.bf16.mxu1 %v7970_v4  ;;  %v8009_v2 = vcombine.low %v1185_v53, %v1189_v17  ;;  %v8016_v4 = vcombine.high %v1192_v58, %v1196_v59  ;;  %v8018_v5 = vcombine.high %v1193_v61, %v1197_v62  ;;  %v1236_v50 = vld [vmem:[%s8955_s20 + $0x1a20] sm:$0xff]  ;;  %v1233_v53 = vld [vmem:[%s8955_s20 + $0x1a08] sm:$0xff] }
 0x21d   : > { %v1237_v17 = vld [vmem:[%s8955_s20 + $0x1a28] sm:$0xff] }
 0x21f   : > { %6008 = vmatpush1.bf16.msra.mxu0 %v7967_v9  ;;  %6295 = vmatpush1.bf16.msra.mxu1 %v7969_v12  ;;  %v1205_v9 = vld [vmem:[%s8955_s20 + $0x1928] sm:$0xff]  ;;  %v8015_v12 = vcombine.low %v1192_v58, %v1196_v59  ;;  %v1240_v58 = vld [vmem:[%s8955_s20 + $0x1a40] sm:$0xff] }
 0x220   : > { %6009 = vmatprep.subr.bf16.mxu0 %v7976_v18  ;;  %6296 = vmatprep.subr.bf16.mxu1 %v7978_v14  ;;  %v8017_v18 = vcombine.low %v1193_v61, %v1197_v62  ;;  %v8024_v14 = vcombine.high %v1200_v6, %v1204_v7  ;;  %v8026_v15 = vcombine.high %v1201_v8, %v1205_v9  ;;  %v1244_v59 = vld [vmem:[%s8955_s20 + $0x1a60] sm:$0xff]  ;;  %v1241_v61 = vld [vmem:[%s8955_s20 + $0x1a48] sm:$0xff] }
 0x221   : > { %v1245_v62 = vld [vmem:[%s8955_s20 + $0x1a68] sm:$0xff] }
 0x223   : > { %6010 = vmatpush1.bf16.msra.mxu0 %v7975_v20  ;;  %6297 = vmatpush1.bf16.msra.mxu1 %v7977_v21  ;;  %v1213_v20 = vld [vmem:[%s8955_s20 + $0x1968] sm:$0xff]  ;;  %v8023_v21 = vcombine.low %v1200_v6, %v1204_v7  ;;  %v1248_v6 = vld [vmem:[%s8955_s20 + $0x1a80] sm:$0xff] }
 0x224   : > { %6011 = vmatprep.subr.bf16.mxu0 %v7984_v22  ;;  %6298 = vmatprep.subr.bf16.mxu1 %v7986_v23  ;;  %v8025_v22 = vcombine.low %v1201_v8, %v1205_v9  ;;  %v8032_v23 = vcombine.high %v1208_v16, %v1212_v60  ;;  %v8034_v25 = vcombine.high %v1209_v19, %v1213_v20  ;;  %v1252_v7 = vld [vmem:[%s8955_s20 + $0x1aa0] sm:$0xff]  ;;  %v1249_v8 = vld [vmem:[%s8955_s20 + $0x1a88] sm:$0xff] }
 0x225   : > { %v1253_v9 = vld [vmem:[%s8955_s20 + $0x1aa8] sm:$0xff] }
 0x227   : > { %6012 = vmatpush1.bf16.msra.mxu0 %v7983_v33  ;;  %6299 = vmatpush1.bf16.msra.mxu1 %v7985_v34  ;;  %v1221_v33 = vld [vmem:[%s8955_s20 + $0x19a8] sm:$0xff]  ;;  %v8031_v34 = vcombine.low %v1208_v16, %v1212_v60  ;;  %v1256_v16 = vld [vmem:[%s8955_s20 + $0x1ac0] sm:$0xff] }
 0x228   : > { %6022 = vmatprep.subr.bf16.mxu0 %v7992_v0  ;;  %6309 = vmatprep.subr.bf16.mxu1 %v7994_v36  ;;  %v8033_v0 = vcombine.low %v1209_v19, %v1213_v20  ;;  %v8040_v36 = vcombine.high %v1216_v27, %v1220_v28  ;;  %v8042_v37 = vcombine.high %v1217_v29, %v1221_v33  ;;  %v1260_v60 = vld [vmem:[%s8955_s20 + $0x1ae0] sm:$0xff]  ;;  %v1257_v19 = vld [vmem:[%s8955_s20 + $0x1ac8] sm:$0xff] }
 0x229   : > { %v1261_v20 = vld [vmem:[%s8955_s20 + $0x1ae8] sm:$0xff] }
 0x22a   : > { %6014 = vmatmul.mubr.bf16.vlgmr.msra.gmra.mrb[0].mxu0 %v9481_v56  ;;  %6301 = vmatmul.mubr.bf16.vlgmr.msra.gmra.mrb[0].mxu1 %v9481_v56 }
 0x22b   : > { %6023 = vmatpush1.bf16.msra.mxu0 %v7991_v44  ;;  %6310 = vmatpush1.bf16.msra.mxu1 %v7993_v46  ;;  %v8039_v44 = vcombine.low %v1216_v27, %v1220_v28  ;;  %v8041_v46 = vcombine.low %v1217_v29, %v1221_v33  ;;  %v1264_v27 = vld [vmem:[%s8955_s20 + $0x1b00] sm:$0xff]  ;;  %v1265_v29 = vld [vmem:[%s8955_s20 + $0x1b08] sm:$0xff] }
 0x22c   : > { %6024 = vmatprep.subr.bf16.mxu0 %v8000_v47  ;;  %6311 = vmatprep.subr.bf16.mxu1 %v8002_v48  ;;  %v8048_v47 = vcombine.high %v1224_v38, %v1228_v39  ;;  %v8050_v48 = vcombine.high %v1225_v41, %v1229_v43  ;;  %v1268_v28 = vld [vmem:[%s8955_s20 + $0x1b20] sm:$0xff]  ;;  %v1269_v33 = vld [vmem:[%s8955_s20 + $0x1b28] sm:$0xff] }
 0x22d   : > { %6054 = vmatprep.mubr.bf16.mxu0 %v9487_v51  ;;  %6341 = vmatprep.mubr.bf16.mxu1 %v9487_v51 }
 0x22f   : > { %6025 = vmatpush1.bf16.msra.mxu0 %v7999_v11  ;;  %6312 = vmatpush1.bf16.msra.mxu1 %v8001_v55  ;;  %v8047_v11 = vcombine.low %v1224_v38, %v1228_v39  ;;  %v8049_v55 = vcombine.low %v1225_v41, %v1229_v43  ;;  %v1272_v38 = vld [vmem:[%s8955_s20 + $0x1b40] sm:$0xff]  ;;  %v1273_v41 = vld [vmem:[%s8955_s20 + $0x1b48] sm:$0xff] }
 0x230   : > { %6026 = vmatprep.subr.bf16.mxu0 %v8008_v24  ;;  %6313 = vmatprep.subr.bf16.mxu1 %v8010_v57  ;;  %v8056_v24 = vcombine.high %v1232_v49, %v1236_v50  ;;  %v8058_v57 = vcombine.high %v1233_v53, %v1237_v17  ;;  %v1276_v39 = vld [vmem:[%s8955_s20 + $0x1b60] sm:$0xff]  ;;  %v1277_v43 = vld [vmem:[%s8955_s20 + $0x1b68] sm:$0xff] }
 0x233   : > { %6027 = vmatpush1.bf16.msra.mxu0 %v8007_v63  ;;  %6314 = vmatpush1.bf16.msra.mxu1 %v8009_v2  ;;  %v8055_v63 = vcombine.low %v1232_v49, %v1236_v50  ;;  %v8057_v2 = vcombine.low %v1233_v53, %v1237_v17  ;;  %v1280_v49 = vld [vmem:[%s8955_s20 + $0x1b80] sm:$0xff]  ;;  %v1281_v53 = vld [vmem:[%s8955_s20 + $0x1b88] sm:$0xff] }
 0x234   : > { %6028 = vmatprep.subr.bf16.mxu0 %v8016_v4  ;;  %6315 = vmatprep.subr.bf16.mxu1 %v8018_v5  ;;  %v8064_v4 = vcombine.high %v1240_v58, %v1244_v59  ;;  %v8066_v5 = vcombine.high %v1241_v61, %v1245_v62  ;;  %v1284_v50 = vld [vmem:[%s8955_s20 + $0x1ba0] sm:$0xff]  ;;  %v1285_v17 = vld [vmem:[%s8955_s20 + $0x1ba8] sm:$0xff] }
 0x237   : > { %6029 = vmatpush1.bf16.msra.mxu0 %v8015_v12  ;;  %6316 = vmatpush1.bf16.msra.mxu1 %v8017_v18  ;;  %v8063_v12 = vcombine.low %v1240_v58, %v1244_v59  ;;  %v8065_v18 = vcombine.low %v1241_v61, %v1245_v62  ;;  %v1288_v58 = vld [vmem:[%s8955_s20 + $0x1bc0] sm:$0xff]  ;;  %v1289_v61 = vld [vmem:[%s8955_s20 + $0x1bc8] sm:$0xff] }
 0x238   : > { %6030 = vmatprep.subr.bf16.mxu0 %v8024_v14  ;;  %6317 = vmatprep.subr.bf16.mxu1 %v8026_v15  ;;  %v8072_v14 = vcombine.high %v1248_v6, %v1252_v7  ;;  %v8074_v15 = vcombine.high %v1249_v8, %v1253_v9  ;;  %v1292_v59 = vld [vmem:[%s8955_s20 + $0x1be0] sm:$0xff]  ;;  %v1293_v62 = vld [vmem:[%s8955_s20 + $0x1be8] sm:$0xff] }
 0x23b   : > { %6031 = vmatpush1.bf16.msra.mxu0 %v8023_v21  ;;  %6318 = vmatpush1.bf16.msra.mxu1 %v8025_v22  ;;  %v8071_v21 = vcombine.low %v1248_v6, %v1252_v7  ;;  %v8073_v22 = vcombine.low %v1249_v8, %v1253_v9  ;;  %v402_v6 = vld [vmem:[%s8955_s20 + $0x10] sm:$0xff]  ;;  %v403_v8 = vld [vmem:[%s8955_s20 + $0x18] sm:$0xff] }
 0x23c   : > { %6032 = vmatprep.subr.bf16.mxu0 %v8032_v23  ;;  %6319 = vmatprep.subr.bf16.mxu1 %v8034_v25  ;;  %v8080_v23 = vcombine.high %v1256_v16, %v1260_v60  ;;  %v8082_v25 = vcombine.high %v1257_v19, %v1261_v20  ;;  %v406_v7 = vld [vmem:[%s8955_s20 + $0x30] sm:$0xff]  ;;  %v407_v9 = vld [vmem:[%s8955_s20 + $0x38] sm:$0xff] }
 0x23f   : > { %6033 = vmatpush1.bf16.msra.mxu0 %v8031_v34  ;;  %6320 = vmatpush1.bf16.msra.mxu1 %v8033_v0  ;;  %v8079_v34 = vcombine.low %v1256_v16, %v1260_v60  ;;  %v8081_v0 = vcombine.low %v1257_v19, %v1261_v20  ;;  %v410_v16 = vld [vmem:[%s8955_s20 + $0x50] sm:$0xff]  ;;  %v9555_v19 = vpack.c.bf16 %v9473_v31, %v9473_v31  ;;  %v411_v20 = vld [vmem:[%s8955_s20 + $0x58] sm:$0xff] }
 0x240   : > { %6034 = vmatprep.subr.bf16.mxu0 %v8040_v36  ;;  %6321 = vmatprep.subr.bf16.mxu1 %v8042_v37  ;;  %v8088_v36 = vcombine.high %v1264_v27, %v1268_v28  ;;  %v8090_v37 = vcombine.high %v1265_v29, %v1269_v33  ;;  %v414_v60 = vld [vmem:[%s8955_s20 + $0x70] sm:$0xff]  ;;  %v419_v31 = vld [vmem:[%s8955_s20 + $0x98] sm:$0xff] }
 0x243   : > { %6035 = vmatpush1.bf16.msra.mxu0 %v8039_v44  ;;  %6322 = vmatpush1.bf16.msra.mxu1 %v8041_v46  ;;  %v8087_v44 = vcombine.low %v1264_v27, %v1268_v28  ;;  %v8089_v46 = vcombine.low %v1265_v29, %v1269_v33  ;;  %v418_v28 = vld [vmem:[%s8955_s20 + $0x90] sm:$0xff]  ;;  %v423_v33 = vld [vmem:[%s8955_s20 + $0xb8] sm:$0xff] }
 0x244   : > { %6036 = vmatprep.subr.bf16.mxu0 %v8048_v47  ;;  %6323 = vmatprep.subr.bf16.mxu1 %v8050_v48  ;;  %v8096_v47 = vcombine.high %v1272_v38, %v1276_v39  ;;  %v8098_v48 = vcombine.high %v1273_v41, %v1277_v43  ;;  %v422_v29 = vld [vmem:[%s8955_s20 + $0xb0] sm:$0xff] }
 0x247   : > { %6037 = vmatpush1.bf16.msra.mxu0 %v8047_v11  ;;  %6324 = vmatpush1.bf16.msra.mxu1 %v8049_v55  ;;  %v8095_v11 = vcombine.low %v1272_v38, %v1276_v39  ;;  %v8097_v55 = vcombine.low %v1273_v41, %v1277_v43  ;;  %v426_v38 = vld [vmem:[%s8955_s20 + $0xd0] sm:$0xff]  ;;  %v427_v41 = vld [vmem:[%s8955_s20 + $0xd8] sm:$0xff] }
 0x248   : > { %6038 = vmatprep.subr.bf16.mxu0 %v8056_v24  ;;  %6325 = vmatprep.subr.bf16.mxu1 %v8058_v57  ;;  %v8104_v24 = vcombine.high %v1280_v49, %v1284_v50  ;;  %v8106_v57 = vcombine.high %v1281_v53, %v1285_v17  ;;  %v430_v39 = vld [vmem:[%s8955_s20 + $0xf0] sm:$0xff]  ;;  %v431_v43 = vld [vmem:[%s8955_s20 + $0xf8] sm:$0xff] }
 0x24b   : > { %6039 = vmatpush1.bf16.msra.mxu0 %v8055_v63  ;;  %6326 = vmatpush1.bf16.msra.mxu1 %v8057_v2  ;;  %v8103_v63 = vcombine.low %v1280_v49, %v1284_v50  ;;  %v8105_v2 = vcombine.low %v1281_v53, %v1285_v17  ;;  %v434_v49 = vld [vmem:[%s8955_s20 + $0x110] sm:$0xff]  ;;  %v435_v53 = vld [vmem:[%s8955_s20 + $0x118] sm:$0xff] }
 0x24c   : > { %6040 = vmatprep.subr.bf16.mxu0 %v8064_v4  ;;  %6327 = vmatprep.subr.bf16.mxu1 %v8066_v5  ;;  %v8112_v4 = vcombine.high %v1288_v58, %v1292_v59  ;;  %v8114_v5 = vcombine.high %v1289_v61, %v1293_v62  ;;  %v438_v50 = vld [vmem:[%s8955_s20 + $0x130] sm:$0xff]  ;;  %v439_v17 = vld [vmem:[%s8955_s20 + $0x138] sm:$0xff] }
 0x24f   : > { %6041 = vmatpush1.bf16.msra.mxu0 %v8063_v12  ;;  %6328 = vmatpush1.bf16.msra.mxu1 %v8065_v18  ;;  %v8111_v12 = vcombine.low %v1288_v58, %v1292_v59  ;;  %v8113_v18 = vcombine.low %v1289_v61, %v1293_v62  ;;  %v446_v58 = vld [vmem:[%s8955_s20 + $0x170] sm:$0xff]  ;;  %v443_v59 = vld [vmem:[%s8955_s20 + $0x158] sm:$0xff]  ;;  %v7259_v62 = vcombine.low %v434_v49, %v438_v50 }
 0x250   : > { %6042 = vmatprep.subr.bf16.mxu0 %v8072_v14  ;;  %6329 = vmatprep.subr.bf16.mxu1 %v8074_v15  ;;  %v7228_v14 = vcombine.high %v402_v6, %v406_v7  ;;  %v7230_v15 = vcombine.high %v403_v8, %v407_v9  ;;  %v447_v61 = vld [vmem:[%s8955_s20 + $0x178] sm:$0xff] }
 0x253   : > { %6043 = vmatpush1.bf16.msra.mxu0 %v8071_v21  ;;  %6330 = vmatpush1.bf16.msra.mxu1 %v8073_v22  ;;  %v415_v21 = vld [vmem:[%s8955_s20 + $0x78] sm:$0xff]  ;;  %v7227_v22 = vcombine.low %v402_v6, %v406_v7  ;;  %v454_v6 = vld [vmem:[%s8955_s20 + $0x1b0] sm:$0xff] }
 0x254   : > { %6044 = vmatprep.subr.bf16.mxu0 %v8080_v23  ;;  %6331 = vmatprep.subr.bf16.mxu1 %v8082_v25  ;;  %v7229_v23 = vcombine.low %v403_v8, %v407_v9  ;;  %v7236_v25 = vcombine.high %v410_v16, %v414_v60  ;;  %v7238_v27 = vcombine.high %v411_v20, %v415_v21  ;;  %v451_v7 = vld [vmem:[%s8955_s20 + $0x198] sm:$0xff] }
 0x255   : > { %v455_v8 = vld [vmem:[%s8955_s20 + $0x1b8] sm:$0xff] }
 0x257   : > { %6045 = vmatpush1.bf16.msra.mxu0 %v8079_v34  ;;  %6332 = vmatpush1.bf16.msra.mxu1 %v8081_v0  ;;  %v7235_v34 = vcombine.low %v410_v16, %v414_v60  ;;  %v7237_v0 = vcombine.low %v411_v20, %v415_v21  ;;  %v462_v16 = vld [vmem:[%s8955_s20 + $0x1f0] sm:$0xff]  ;;  %v459_v60 = vld [vmem:[%s8955_s20 + $0x1d8] sm:$0xff] }
 0x258   : > { %6046 = vmatprep.subr.bf16.mxu0 %v8088_v36  ;;  %6333 = vmatprep.subr.bf16.mxu1 %v8090_v37  ;;  %v7244_v36 = vcombine.high %v418_v28, %v422_v29  ;;  %v7246_v37 = vcombine.high %v419_v31, %v423_v33  ;;  %v463_v20 = vld [vmem:[%s8955_s20 + $0x1f8] sm:$0xff] }
 0x25b   : > { %6047 = vmatpush1.bf16.msra.mxu0 %v8087_v44  ;;  %6334 = vmatpush1.bf16.msra.mxu1 %v8089_v46  ;;  %v7243_v44 = vcombine.low %v418_v28, %v422_v29  ;;  %v7245_v46 = vcombine.low %v419_v31, %v423_v33  ;;  %v470_v28 = vld [vmem:[%s8955_s20 + $0x230] sm:$0xff]  ;;  %v467_v29 = vld [vmem:[%s8955_s20 + $0x218] sm:$0xff] }
 0x25c   : > { %6048 = vmatprep.subr.bf16.mxu0 %v8096_v47  ;;  %6335 = vmatprep.subr.bf16.mxu1 %v8098_v48  ;;  %v7252_v47 = vcombine.high %v426_v38, %v430_v39  ;;  %v7254_v48 = vcombine.high %v427_v41, %v431_v43  ;;  %v471_v31 = vld [vmem:[%s8955_s20 + $0x238] sm:$0xff] }
 0x25f   : > { %6049 = vmatpush1.bf16.msra.mxu0 %v8095_v11  ;;  %6336 = vmatpush1.bf16.msra.mxu1 %v8097_v55  ;;  %v7251_v11 = vcombine.low %v426_v38, %v430_v39  ;;  %v7260_v55 = vcombine.high %v434_v49, %v438_v50  ;;  %v478_v38 = vld [vmem:[%s8955_s20 + $0x270] sm:$0xff]  ;;  %v475_v39 = vld [vmem:[%s8955_s20 + $0x258] sm:$0xff] }
 0x260   : > { %6050 = vmatprep.subr.bf16.mxu0 %v8104_v24  ;;  %6337 = vmatprep.subr.bf16.mxu1 %v8106_v57  ;;  %v7262_v24 = vcombine.high %v435_v53, %v439_v17  ;;  %v442_v57 = vld [vmem:[%s8955_s20 + $0x150] sm:$0xff]  ;;  %v483_v50 = vld [vmem:[%s8955_s20 + $0x298] sm:$0xff] }
 0x261   : > { %v7267_v9 = vcombine.low %v442_v57, %v446_v58  ;;  %v486_v49 = vld [vmem:[%s8955_s20 + $0x2b0] sm:$0xff] }
 0x263   : > { %6051 = vmatpush1.bf16.msra.mxu0 %v8103_v63  ;;  %6338 = vmatpush1.bf16.msra.mxu1 %v8105_v2  ;;  %v7261_v63 = vcombine.low %v435_v53, %v439_v17  ;;  %v7268_v2 = vcombine.high %v442_v57, %v446_v58  ;;  %v487_v53 = vld [vmem:[%s8955_s20 + $0x2b8] sm:$0xff]  ;;  %v494_v57 = vld [vmem:[%s8955_s20 + $0x2f0] sm:$0xff] }
 0x264   : > { %6052 = vmatprep.subr.bf16.mxu0 %v8112_v4  ;;  %6339 = vmatprep.subr.bf16.mxu1 %v8114_v5  ;;  %v7270_v4 = vcombine.high %v443_v59, %v447_v61  ;;  %v450_v5 = vld [vmem:[%s8955_s20 + $0x190] sm:$0xff]  ;;  %v491_v58 = vld [vmem:[%s8955_s20 + $0x2d8] sm:$0xff] }
 0x265   : > { %v7275_v21 = vcombine.low %v450_v5, %v454_v6 }
 0x267   : > { %6053 = vmatpush1.bf16.msra.mxu0 %v8111_v12  ;;  %6340 = vmatpush1.bf16.msra.mxu1 %v8113_v18  ;;  %v7269_v12 = vcombine.low %v443_v59, %v447_v61  ;;  %v7276_v18 = vcombine.high %v450_v5, %v454_v6  ;;  %v495_v59 = vld [vmem:[%s8955_s20 + $0x2f8] sm:$0xff]  ;;  %v502_v5 = vld [vmem:[%s8955_s20 + $0x330] sm:$0xff] }
 0x268   : > { %6350 = vmatprep.subr.bf16.mxu0 %v7228_v14  ;;  %6637 = vmatprep.subr.bf16.mxu1 %v7230_v15  ;;  %v7278_v14 = vcombine.high %v451_v7, %v455_v8  ;;  %v458_v15 = vld [vmem:[%s8955_s20 + $0x1d0] sm:$0xff]  ;;  %v499_v6 = vld [vmem:[%s8955_s20 + $0x318] sm:$0xff] }
 0x269   : > { %v7283_v33 = vcombine.low %v458_v15, %v462_v16 }
 0x26a   : > { %6055 = vmatmul.mubr.bf16.vlgmr.msra.gmra.mrb[0].mxu0 %v9555_v19  ;;  %6342 = vmatmul.mubr.bf16.vlgmr.msra.gmra.mrb[0].mxu1 %v9555_v19 }
 0x26b   : > { %6351 = vmatpush1.bf16.msra.mxu0 %v7227_v22  ;;  %6638 = vmatpush1.bf16.msra.mxu1 %v7229_v23  ;;  %v7277_v22 = vcombine.low %v451_v7, %v455_v8  ;;  %v7284_v23 = vcombine.high %v458_v15, %v462_v16  ;;  %v503_v7 = vld [vmem:[%s8955_s20 + $0x338] sm:$0xff]  ;;  %v510_v15 = vld [vmem:[%s8955_s20 + $0x370] sm:$0xff] }
 0x26c   : > { %6352 = vmatprep.subr.bf16.mxu0 %v7236_v25  ;;  %6639 = vmatprep.subr.bf16.mxu1 %v7238_v27  ;;  %v7286_v25 = vcombine.high %v459_v60, %v463_v20  ;;  %v466_v27 = vld [vmem:[%s8955_s20 + $0x210] sm:$0xff]  ;;  %v507_v16 = vld [vmem:[%s8955_s20 + $0x358] sm:$0xff] }
 0x26d   : > { %6382 = vmatprep.mubr.bf16.mxu0 %v9025_v10  ;;  %6669 = vmatprep.mubr.bf16.mxu1 %v9025_v10  ;;  %v7253_v10 = vcombine.low %v427_v41, %v431_v43  ;;  %v479_v41 = vld [vmem:[%s8955_s20 + $0x278] sm:$0xff]  ;;  %v7291_v43 = vcombine.low %v466_v27, %v470_v28 }
 0x26f   : > { %6353 = vmatpush1.bf16.msra.mxu0 %v7235_v34  ;;  %6640 = vmatpush1.bf16.msra.mxu1 %v7237_v0  ;;  %v7285_v34 = vcombine.low %v459_v60, %v463_v20  ;;  %v7292_v0 = vcombine.high %v466_v27, %v470_v28  ;;  %v511_v60 = vld [vmem:[%s8955_s20 + $0x378] sm:$0xff]  ;;  %v518_v27 = vld [vmem:[%s8955_s20 + $0x3b0] sm:$0xff] }
 0x270   : > { %6354 = vmatprep.subr.bf16.mxu0 %v7244_v36  ;;  %6641 = vmatprep.subr.bf16.mxu1 %v7246_v37  ;;  %v7294_v36 = vcombine.high %v467_v29, %v471_v31  ;;  %v474_v37 = vld [vmem:[%s8955_s20 + $0x250] sm:$0xff]  ;;  %v515_v28 = vld [vmem:[%s8955_s20 + $0x398] sm:$0xff] }
 0x271   : > { %v7299_v17 = vcombine.low %v474_v37, %v478_v38 }
 0x273   : > { %6355 = vmatpush1.bf16.msra.mxu0 %v7243_v44  ;;  %6642 = vmatpush1.bf16.msra.mxu1 %v7245_v46  ;;  %v7293_v44 = vcombine.low %v467_v29, %v471_v31  ;;  %v7300_v46 = vcombine.high %v474_v37, %v478_v38  ;;  %v519_v29 = vld [vmem:[%s8955_s20 + $0x3b8] sm:$0xff]  ;;  %v526_v37 = vld [vmem:[%s8955_s20 + $0x3f0] sm:$0xff] }
 0x274   : > { %6356 = vmatprep.subr.bf16.mxu0 %v7252_v47  ;;  %6643 = vmatprep.subr.bf16.mxu1 %v7254_v48  ;;  %v7302_v47 = vcombine.high %v475_v39, %v479_v41  ;;  %v482_v48 = vld [vmem:[%s8955_s20 + $0x290] sm:$0xff]  ;;  %v523_v38 = vld [vmem:[%s8955_s20 + $0x3d8] sm:$0xff] }
 0x275   : > { %v7307_v61 = vcombine.low %v482_v48, %v486_v49 }
 0x277   : > { %6357 = vmatpush1.bf16.msra.mxu0 %v7251_v11  ;;  %6644 = vmatpush1.bf16.msra.mxu1 %v7253_v10  ;;  %v7301_v11 = vcombine.low %v475_v39, %v479_v41  ;;  %v7308_v10 = vcombine.high %v482_v48, %v486_v49  ;;  %v527_v39 = vld [vmem:[%s8955_s20 + $0x3f8] sm:$0xff]  ;;  %v534_v48 = vld [vmem:[%s8955_s20 + $0x430] sm:$0xff] }
 0x278   : > { %6358 = vmatprep.subr.bf16.mxu0 %v7260_v55  ;;  %6645 = vmatprep.subr.bf16.mxu1 %v7262_v24  ;;  %v7310_v55 = vcombine.high %v483_v50, %v487_v53  ;;  %v490_v24 = vld [vmem:[%s8955_s20 + $0x2d0] sm:$0xff]  ;;  %v531_v49 = vld [vmem:[%s8955_s20 + $0x418] sm:$0xff] }
 0x279   : > { %v7315_v8 = vcombine.low %v490_v24, %v494_v57 }
 0x27b   : > { %6359 = vmatpush1.bf16.msra.mxu0 %v7259_v62  ;;  %6646 = vmatpush1.bf16.msra.mxu1 %v7261_v63  ;;  %v7309_v62 = vcombine.low %v483_v50, %v487_v53  ;;  %v7316_v63 = vcombine.high %v490_v24, %v494_v57  ;;  %v535_v50 = vld [vmem:[%s8955_s20 + $0x438] sm:$0xff]  ;;  %v542_v24 = vld [vmem:[%s8955_s20 + $0x470] sm:$0xff] }
 0x27c   : > { %6360 = vmatprep.subr.bf16.mxu0 %v7268_v2  ;;  %6647 = vmatprep.subr.bf16.mxu1 %v7270_v4  ;;  %v7318_v2 = vcombine.high %v491_v58, %v495_v59  ;;  %v498_v4 = vld [vmem:[%s8955_s20 + $0x310] sm:$0xff]  ;;  %v539_v57 = vld [vmem:[%s8955_s20 + $0x458] sm:$0xff] }
 0x27d   : > { %v7323_v20 = vcombine.low %v498_v4, %v502_v5 }
 0x27f   : > { %6361 = vmatpush1.bf16.msra.mxu0 %v7267_v9  ;;  %6648 = vmatpush1.bf16.msra.mxu1 %v7269_v12  ;;  %v7317_v9 = vcombine.low %v491_v58, %v495_v59  ;;  %v7324_v12 = vcombine.high %v498_v4, %v502_v5  ;;  %v543_v58 = vld [vmem:[%s8955_s20 + $0x478] sm:$0xff]  ;;  %v550_v4 = vld [vmem:[%s8955_s20 + $0x4b0] sm:$0xff] }
 0x280   : > { %6362 = vmatprep.subr.bf16.mxu0 %v7276_v18  ;;  %6649 = vmatprep.subr.bf16.mxu1 %v7278_v14  ;;  %v7326_v18 = vcombine.high %v499_v6, %v503_v7  ;;  %v506_v14 = vld [vmem:[%s8955_s20 + $0x350] sm:$0xff]  ;;  %v547_v5 = vld [vmem:[%s8955_s20 + $0x498] sm:$0xff] }
 0x281   : > { %v7331_v31 = vcombine.low %v506_v14, %v510_v15 }
 0x283   : > { %6363 = vmatpush1.bf16.msra.mxu0 %v7275_v21  ;;  %6650 = vmatpush1.bf16.msra.mxu1 %v7277_v22  ;;  %v7325_v21 = vcombine.low %v499_v6, %v503_v7  ;;  %v7332_v22 = vcombine.high %v506_v14, %v510_v15  ;;  %v551_v6 = vld [vmem:[%s8955_s20 + $0x4b8] sm:$0xff]  ;;  %v558_v14 = vld [vmem:[%s8955_s20 + $0x4f0] sm:$0xff] }
 0x284   : > { %6364 = vmatprep.subr.bf16.mxu0 %v7284_v23  ;;  %6651 = vmatprep.subr.bf16.mxu1 %v7286_v25  ;;  %v7334_v23 = vcombine.high %v507_v16, %v511_v60  ;;  %v514_v25 = vld [vmem:[%s8955_s20 + $0x390] sm:$0xff]  ;;  %v555_v15 = vld [vmem:[%s8955_s20 + $0x4d8] sm:$0xff] }
 0x285   : > { %v7339_v41 = vcombine.low %v514_v25, %v518_v27 }
 0x287   : > { %6365 = vmatpush1.bf16.msra.mxu0 %v7283_v33  ;;  %6652 = vmatpush1.bf16.msra.mxu1 %v7285_v34  ;;  %v7333_v33 = vcombine.low %v507_v16, %v511_v60  ;;  %v7340_v34 = vcombine.high %v514_v25, %v518_v27  ;;  %v559_v16 = vld [vmem:[%s8955_s20 + $0x4f8] sm:$0xff]  ;;  %v7373_v60 = vcombine.low %v547_v5, %v551_v6 }
 0x288   : > { %6366 = vmatprep.subr.bf16.mxu0 %v7292_v0  ;;  %6653 = vmatprep.subr.bf16.mxu1 %v7294_v36  ;;  %v7342_v0 = vcombine.high %v515_v28, %v519_v29  ;;  %v522_v36 = vld [vmem:[%s8955_s20 + $0x3d0] sm:$0xff]  ;;  %v563_v25 = vld [vmem:[%s8955_s20 + $0x518] sm:$0xff] }
 0x289   : > { %v7347_v53 = vcombine.low %v522_v36, %v526_v37  ;;  %v567_v27 = vld [vmem:[%s8955_s20 + $0x538] sm:$0xff] }
 0x28b   : > { %6367 = vmatpush1.bf16.msra.mxu0 %v7291_v43  ;;  %6654 = vmatpush1.bf16.msra.mxu1 %v7293_v44  ;;  %v7341_v43 = vcombine.low %v515_v28, %v519_v29  ;;  %v7348_v44 = vcombine.high %v522_v36, %v526_v37  ;;  %v575_v36 = vld [vmem:[%s8955_s20 + $0x578] sm:$0xff] }
 0x28c   : > { %6368 = vmatprep.subr.bf16.mxu0 %v7300_v46  ;;  %6655 = vmatprep.subr.bf16.mxu1 %v7302_v47  ;;  %v7350_v46 = vcombine.high %v523_v38, %v527_v39  ;;  %v530_v47 = vld [vmem:[%s8955_s20 + $0x410] sm:$0xff] }
 0x28d   : > { %v7355_v59 = vcombine.low %v530_v47, %v534_v48 }
 0x28f   : > { %6369 = vmatpush1.bf16.msra.mxu0 %v7299_v17  ;;  %6656 = vmatpush1.bf16.msra.mxu1 %v7301_v11  ;;  %v7349_v17 = vcombine.low %v523_v38, %v527_v39  ;;  %v7356_v11 = vcombine.high %v530_v47, %v534_v48  ;;  %v7389_v38 = vcombine.low %v563_v25, %v567_v27  ;;  %v583_v47 = vld [vmem:[%s8955_s20 + $0x5b8] sm:$0xff] }
 0x290   : > { %6370 = vmatprep.subr.bf16.mxu0 %v7308_v10  ;;  %6657 = vmatprep.subr.bf16.mxu1 %v7310_v55  ;;  %v7358_v10 = vcombine.high %v531_v49, %v535_v50  ;;  %v538_v55 = vld [vmem:[%s8955_s20 + $0x450] sm:$0xff] }
 0x291   : > { %v7363_v7 = vcombine.low %v538_v55, %v542_v24 }
 0x293   : > { %6371 = vmatpush1.bf16.msra.mxu0 %v7307_v61  ;;  %6658 = vmatpush1.bf16.msra.mxu1 %v7309_v62  ;;  %v7357_v61 = vcombine.low %v531_v49, %v535_v50  ;;  %v7364_v62 = vcombine.high %v538_v55, %v542_v24  ;;  %v591_v55 = vld [vmem:[%s8955_s20 + $0x5f8] sm:$0xff] }
 0x294   : > { %6372 = vmatprep.subr.bf16.mxu0 %v7316_v63  ;;  %6659 = vmatprep.subr.bf16.mxu1 %v7318_v2  ;;  %v7366_v63 = vcombine.high %v539_v57, %v543_v58  ;;  %v546_v2 = vld [vmem:[%s8955_s20 + $0x490] sm:$0xff] }
 0x297   : > { %6373 = vmatpush1.bf16.msra.mxu0 %v7315_v8  ;;  %6660 = vmatpush1.bf16.msra.mxu1 %v7317_v9  ;;  %v7365_v8 = vcombine.low %v539_v57, %v543_v58  ;;  %v7372_v9 = vcombine.high %v546_v2, %v550_v4 }
 0x298   : > { %6374 = vmatprep.subr.bf16.mxu0 %v7324_v12  ;;  %6661 = vmatprep.subr.bf16.mxu1 %v7326_v18  ;;  %v7374_v12 = vcombine.high %v547_v5, %v551_v6  ;;  %v554_v18 = vld [vmem:[%s8955_s20 + $0x4d0] sm:$0xff] }
 0x299   : > { %v7379_v28 = vcombine.low %v554_v18, %v558_v14 }
 0x29b   : > { %6375 = vmatpush1.bf16.msra.mxu0 %v7323_v20  ;;  %6662 = vmatpush1.bf16.msra.mxu1 %v7325_v21  ;;  %v7380_v20 = vcombine.high %v554_v18, %v558_v14  ;;  %v7382_v21 = vcombine.high %v555_v15, %v559_v16  ;;  %v607_v18 = vld [vmem:[%s8955_s20 + $0x678] sm:$0xff] }
 0x29c   : > { %6376 = vmatprep.subr.bf16.mxu0 %v7332_v22  ;;  %6663 = vmatprep.subr.bf16.mxu1 %v7334_v23  ;;  %v562_v22 = vld [vmem:[%s8955_s20 + $0x510] sm:$0xff] }
 0x29d   : > { %v566_v23 = vld [vmem:[%s8955_s20 + $0x530] sm:$0xff] }
 0x29e   : > { %v7388_v29 = vcombine.high %v562_v22, %v566_v23  ;;  %v7387_v37 = vcombine.low %v562_v22, %v566_v23  ;;  %v615_v22 = vld [vmem:[%s8955_s20 + $0x6b8] sm:$0xff] }
 0x29f   : > { %6377 = vmatpush1.bf16.msra.mxu0 %v7331_v31  ;;  %6664 = vmatpush1.bf16.msra.mxu1 %v7333_v33  ;;  %v7390_v31 = vcombine.high %v563_v25, %v567_v27  ;;  %v570_v33 = vld [vmem:[%s8955_s20 + $0x550] sm:$0xff] }
 0x2a0   : > { %6378 = vmatprep.subr.bf16.mxu0 %v7340_v34  ;;  %6665 = vmatprep.subr.bf16.mxu1 %v7342_v0  ;;  %v574_v34 = vld [vmem:[%s8955_s20 + $0x570] sm:$0xff]  ;;  %v571_v0 = vld [vmem:[%s8955_s20 + $0x558] sm:$0xff] }
 0x2a1   : > { %v7396_v39 = vcombine.high %v570_v33, %v574_v34  ;;  %v7395_v48 = vcombine.low %v570_v33, %v574_v34  ;;  %v7397_v49 = vcombine.low %v571_v0, %v575_v36  ;;  %v623_v33 = vld [vmem:[%s8955_s20 + $0x6f8] sm:$0xff] }
 0x2a3   : > { %6379 = vmatpush1.bf16.msra.mxu0 %v7339_v41  ;;  %6666 = vmatpush1.bf16.msra.mxu1 %v7341_v43  ;;  %v7398_v41 = vcombine.high %v571_v0, %v575_v36  ;;  %v578_v43 = vld [vmem:[%s8955_s20 + $0x590] sm:$0xff] }
 0x2a4   : > { %6380 = vmatprep.subr.bf16.mxu0 %v7348_v44  ;;  %6667 = vmatprep.subr.bf16.mxu1 %v7350_v46  ;;  %v582_v44 = vld [vmem:[%s8955_s20 + $0x5b0] sm:$0xff]  ;;  %v579_v46 = vld [vmem:[%s8955_s20 + $0x598] sm:$0xff] }
 0x2a5   : > { %v7404_v50 = vcombine.high %v578_v43, %v582_v44  ;;  %v7403_v24 = vcombine.low %v578_v43, %v582_v44  ;;  %v7405_v57 = vcombine.low %v579_v46, %v583_v47  ;;  %v631_v43 = vld [vmem:[%s8955_s20 + $0x738] sm:$0xff] }
 0x2a7   : > { %6381 = vmatpush1.bf16.msra.mxu0 %v7347_v53  ;;  %6668 = vmatpush1.bf16.msra.mxu1 %v7349_v17  ;;  %v7406_v53 = vcombine.high %v579_v46, %v583_v47  ;;  %v586_v17 = vld [vmem:[%s8955_s20 + $0x5d0] sm:$0xff] }
 0x2a8   : > { %6391 = vmatprep.subr.bf16.mxu0 %v7356_v11  ;;  %6678 = vmatprep.subr.bf16.mxu1 %v7358_v10  ;;  %v590_v11 = vld [vmem:[%s8955_s20 + $0x5f0] sm:$0xff]  ;;  %v587_v10 = vld [vmem:[%s8955_s20 + $0x5d8] sm:$0xff] }
 0x2a9   : > { %v7412_v58 = vcombine.high %v586_v17, %v590_v11  ;;  %v7413_v5 = vcombine.low %v587_v10, %v591_v55 }
 0x2aa   : > { %6383 = vmatmul.mubr.bf16.vlgmr.msra.gmra.mrb[4].mxu0 %v9074_v26  ;;  %6670 = vmatmul.mubr.bf16.vlgmr.msra.gmra.mrb[4].mxu1 %v9074_v26  ;;  %v7371_v26 = vcombine.low %v546_v2, %v550_v4  ;;  %v599_v2 = vld [vmem:[%s8955_s20 + $0x638] sm:$0xff]  ;;  %v7411_v4 = vcombine.low %v586_v17, %v590_v11 }
 0x2ab   : > { %6392 = vmatpush1.bf16.msra.mxu0 %v7355_v59  ;;  %6679 = vmatpush1.bf16.msra.mxu1 %v7357_v61  ;;  %v7414_v59 = vcombine.high %v587_v10, %v591_v55  ;;  %v594_v61 = vld [vmem:[%s8955_s20 + $0x610] sm:$0xff]  ;;  %v639_v17 = vld [vmem:[%s8955_s20 + $0x778] sm:$0xff] }
 0x2ac   : > { %6393 = vmatprep.subr.bf16.mxu0 %v7364_v62  ;;  %6680 = vmatprep.subr.bf16.mxu1 %v7366_v63  ;;  %v598_v62 = vld [vmem:[%s8955_s20 + $0x630] sm:$0xff]  ;;  %v595_v63 = vld [vmem:[%s8955_s20 + $0x618] sm:$0xff] }
 0x2ad   : > { %6423 = vmatprep.mubr.bf16.mxu0 %v9080_v35  ;;  %6710 = vmatprep.mubr.bf16.mxu1 %v9080_v35  ;;  %v7381_v35 = vcombine.low %v555_v15, %v559_v16  ;;  %v7420_v6 = vcombine.high %v594_v61, %v598_v62  ;;  %v7419_v14 = vcombine.low %v594_v61, %v598_v62  ;;  %v647_v61 = vld [vmem:[%s8955_s20 + $0x7b8] sm:$0xff] }
 0x2ae   : > { %v7421_v15 = vcombine.low %v595_v63, %v599_v2 }
 0x2af   : > { %6394 = vmatpush1.bf16.msra.mxu0 %v7363_v7  ;;  %6681 = vmatpush1.bf16.msra.mxu1 %v7365_v8  ;;  %v7422_v7 = vcombine.high %v595_v63, %v599_v2  ;;  %v602_v8 = vld [vmem:[%s8955_s20 + $0x650] sm:$0xff] }
 0x2b0   : > { %6395 = vmatprep.subr.bf16.mxu0 %v7372_v9  ;;  %6682 = vmatprep.subr.bf16.mxu1 %v7374_v12  ;;  %v606_v9 = vld [vmem:[%s8955_s20 + $0x670] sm:$0xff]  ;;  %v603_v12 = vld [vmem:[%s8955_s20 + $0x658] sm:$0xff] }
 0x2b1   : > { %v7428_v16 = vcombine.high %v602_v8, %v606_v9  ;;  %v7427_v23 = vcombine.low %v602_v8, %v606_v9  ;;  %v7429_v25 = vcombine.low %v603_v12, %v607_v18  ;;  %v655_v8 = vld [vmem:[%s8955_s20 + $0x7f8] sm:$0xff] }
 0x2b3   : > { %6396 = vmatpush1.bf16.msra.mxu0 %v7371_v26  ;;  %6683 = vmatpush1.bf16.msra.mxu1 %v7373_v60  ;;  %v7430_v26 = vcombine.high %v603_v12, %v607_v18  ;;  %v610_v60 = vld [vmem:[%s8955_s20 + $0x690] sm:$0xff] }
 0x2b4   : > { %6397 = vmatprep.subr.bf16.mxu0 %v7380_v20  ;;  %6684 = vmatprep.subr.bf16.mxu1 %v7382_v21  ;;  %v614_v20 = vld [vmem:[%s8955_s20 + $0x6b0] sm:$0xff]  ;;  %v611_v21 = vld [vmem:[%s8955_s20 + $0x698] sm:$0xff] }
 0x2b5   : > { %v7436_v27 = vcombine.high %v610_v60, %v614_v20  ;;  %v7435_v34 = vcombine.low %v610_v60, %v614_v20  ;;  %v7437_v0 = vcombine.low %v611_v21, %v615_v22  ;;  %v663_v60 = vld [vmem:[%s8955_s20 + $0x838] sm:$0xff] }
 0x2b7   : > { %6398 = vmatpush1.bf16.msra.mxu0 %v7379_v28  ;;  %6685 = vmatpush1.bf16.msra.mxu1 %v7381_v35  ;;  %v7438_v28 = vcombine.high %v611_v21, %v615_v22  ;;  %v618_v35 = vld [vmem:[%s8955_s20 + $0x6d0] sm:$0xff] }
 0x2b8   : > { %6399 = vmatprep.subr.bf16.mxu0 %v7388_v29  ;;  %6686 = vmatprep.subr.bf16.mxu1 %v7390_v31  ;;  %v622_v29 = vld [vmem:[%s8955_s20 + $0x6f0] sm:$0xff]  ;;  %v619_v31 = vld [vmem:[%s8955_s20 + $0x6d8] sm:$0xff] }
 0x2b9   : > { %v7444_v36 = vcombine.high %v618_v35, %v622_v29  ;;  %v7443_v44 = vcombine.low %v618_v35, %v622_v29  ;;  %v7445_v46 = vcombine.low %v619_v31, %v623_v33  ;;  %v671_v35 = vld [vmem:[%s8955_s20 + $0x878] sm:$0xff] }
 0x2bb   : > { %6400 = vmatpush1.bf16.msra.mxu0 %v7387_v37  ;;  %6687 = vmatpush1.bf16.msra.mxu1 %v7389_v38  ;;  %v7446_v37 = vcombine.high %v619_v31, %v623_v33  ;;  %v626_v38 = vld [vmem:[%s8955_s20 + $0x710] sm:$0xff] }
 0x2bc   : > { %6401 = vmatprep.subr.bf16.mxu0 %v7396_v39  ;;  %6688 = vmatprep.subr.bf16.mxu1 %v7398_v41  ;;  %v630_v39 = vld [vmem:[%s8955_s20 + $0x730] sm:$0xff]  ;;  %v627_v41 = vld [vmem:[%s8955_s20 + $0x718] sm:$0xff] }
 0x2bd   : > { %v7452_v47 = vcombine.high %v626_v38, %v630_v39  ;;  %v7451_v11 = vcombine.low %v626_v38, %v630_v39  ;;  %v7453_v10 = vcombine.low %v627_v41, %v631_v43  ;;  %v679_v38 = vld [vmem:[%s8955_s20 + $0x8b8] sm:$0xff] }
 0x2bf   : > { %6402 = vmatpush1.bf16.msra.mxu0 %v7395_v48  ;;  %6689 = vmatpush1.bf16.msra.mxu1 %v7397_v49  ;;  %v7454_v48 = vcombine.high %v627_v41, %v631_v43  ;;  %v634_v49 = vld [vmem:[%s8955_s20 + $0x750] sm:$0xff] }
 0x2c0   : > { %6403 = vmatprep.subr.bf16.mxu0 %v7404_v50  ;;  %6690 = vmatprep.subr.bf16.mxu1 %v7406_v53  ;;  %v638_v50 = vld [vmem:[%s8955_s20 + $0x770] sm:$0xff]  ;;  %v635_v53 = vld [vmem:[%s8955_s20 + $0x758] sm:$0xff] }
 0x2c1   : > { %v7460_v55 = vcombine.high %v634_v49, %v638_v50  ;;  %v7459_v62 = vcombine.low %v634_v49, %v638_v50  ;;  %v7461_v63 = vcombine.low %v635_v53, %v639_v17  ;;  %v687_v49 = vld [vmem:[%s8955_s20 + $0x8f8] sm:$0xff] }
 0x2c3   : > { %6404 = vmatpush1.bf16.msra.mxu0 %v7403_v24  ;;  %6691 = vmatpush1.bf16.msra.mxu1 %v7405_v57  ;;  %v7462_v24 = vcombine.high %v635_v53, %v639_v17  ;;  %v642_v57 = vld [vmem:[%s8955_s20 + $0x790] sm:$0xff] }
 0x2c4   : > { %6405 = vmatprep.subr.bf16.mxu0 %v7412_v58  ;;  %6692 = vmatprep.subr.bf16.mxu1 %v7414_v59  ;;  %v646_v58 = vld [vmem:[%s8955_s20 + $0x7b0] sm:$0xff]  ;;  %v643_v59 = vld [vmem:[%s8955_s20 + $0x798] sm:$0xff] }
 0x2c5   : > { %v7468_v2 = vcombine.high %v642_v57, %v646_v58  ;;  %v7467_v9 = vcombine.low %v642_v57, %v646_v58  ;;  %v7469_v12 = vcombine.low %v643_v59, %v647_v61 }
 0x2c7   : > { %6406 = vmatpush1.bf16.msra.mxu0 %v7411_v4  ;;  %6693 = vmatpush1.bf16.msra.mxu1 %v7413_v5  ;;  %v7470_v4 = vcombine.high %v643_v59, %v647_v61  ;;  %v650_v5 = vld [vmem:[%s8955_s20 + $0x7d0] sm:$0xff] }
 0x2c8   : > { %6407 = vmatprep.subr.bf16.mxu0 %v7420_v6  ;;  %6694 = vmatprep.subr.bf16.mxu1 %v7422_v7  ;;  %v654_v6 = vld [vmem:[%s8955_s20 + $0x7f0] sm:$0xff]  ;;  %v651_v7 = vld [vmem:[%s8955_s20 + $0x7d8] sm:$0xff] }
 0x2c9   : > { %v7476_v18 = vcombine.high %v650_v5, %v654_v6  ;;  %v7475_v20 = vcombine.low %v650_v5, %v654_v6  ;;  %v7477_v21 = vcombine.low %v651_v7, %v655_v8  ;;  %v698_v61 = vld [vmem:[%s8955_s20 + $0x950] sm:$0xff] }
 0x2cb   : > { %6408 = vmatpush1.bf16.msra.mxu0 %v7419_v14  ;;  %6695 = vmatpush1.bf16.msra.mxu1 %v7421_v15  ;;  %v7478_v14 = vcombine.high %v651_v7, %v655_v8  ;;  %v658_v15 = vld [vmem:[%s8955_s20 + $0x810] sm:$0xff] }
 0x2cc   : > { %6409 = vmatprep.subr.bf16.mxu0 %v7428_v16  ;;  %6696 = vmatprep.subr.bf16.mxu1 %v7430_v26  ;;  %v662_v16 = vld [vmem:[%s8955_s20 + $0x830] sm:$0xff]  ;;  %v659_v26 = vld [vmem:[%s8955_s20 + $0x818] sm:$0xff] }
 0x2cd   : > { %v7484_v22 = vcombine.high %v658_v15, %v662_v16  ;;  %v7483_v29 = vcombine.low %v658_v15, %v662_v16  ;;  %v7485_v31 = vcombine.low %v659_v26, %v663_v60  ;;  %v706_v8 = vld [vmem:[%s8955_s20 + $0x990] sm:$0xff] }
 0x2cf   : > { %6410 = vmatpush1.bf16.msra.mxu0 %v7427_v23  ;;  %6697 = vmatpush1.bf16.msra.mxu1 %v7429_v25  ;;  %v7486_v23 = vcombine.high %v659_v26, %v663_v60  ;;  %v666_v25 = vld [vmem:[%s8955_s20 + $0x850] sm:$0xff] }
 0x2d0   : > { %6411 = vmatprep.subr.bf16.mxu0 %v7436_v27  ;;  %6698 = vmatprep.subr.bf16.mxu1 %v7438_v28  ;;  %v670_v27 = vld [vmem:[%s8955_s20 + $0x870] sm:$0xff]  ;;  %v667_v28 = vld [vmem:[%s8955_s20 + $0x858] sm:$0xff] }
 0x2d1   : > { %v7492_v33 = vcombine.high %v666_v25, %v670_v27  ;;  %v7491_v39 = vcombine.low %v666_v25, %v670_v27  ;;  %v7493_v41 = vcombine.low %v667_v28, %v671_v35  ;;  %v714_v60 = vld [vmem:[%s8955_s20 + $0x9d0] sm:$0xff] }
 0x2d3   : > { %6412 = vmatpush1.bf16.msra.mxu0 %v7435_v34  ;;  %6699 = vmatpush1.bf16.msra.mxu1 %v7437_v0  ;;  %v7494_v34 = vcombine.high %v667_v28, %v671_v35  ;;  %v674_v0 = vld [vmem:[%s8955_s20 + $0x890] sm:$0xff] }
 0x2d4   : > { %6413 = vmatprep.subr.bf16.mxu0 %v7444_v36  ;;  %6700 = vmatprep.subr.bf16.mxu1 %v7446_v37  ;;  %v678_v36 = vld [vmem:[%s8955_s20 + $0x8b0] sm:$0xff]  ;;  %v675_v37 = vld [vmem:[%s8955_s20 + $0x898] sm:$0xff] }
 0x2d5   : > { %v7500_v43 = vcombine.high %v674_v0, %v678_v36  ;;  %v7501_v50 = vcombine.low %v675_v37, %v679_v38  ;;  %v722_v35 = vld [vmem:[%s8955_s20 + $0xa10] sm:$0xff] }
 0x2d7   : > { %6414 = vmatpush1.bf16.msra.mxu0 %v7443_v44  ;;  %6701 = vmatpush1.bf16.msra.mxu1 %v7445_v46  ;;  %v7502_v44 = vcombine.high %v675_v37, %v679_v38  ;;  %v682_v46 = vld [vmem:[%s8955_s20 + $0x8d0] sm:$0xff] }
 0x2d8   : > { %6415 = vmatprep.subr.bf16.mxu0 %v7452_v47  ;;  %6702 = vmatprep.subr.bf16.mxu1 %v7454_v48  ;;  %v686_v47 = vld [vmem:[%s8955_s20 + $0x8f0] sm:$0xff]  ;;  %v683_v48 = vld [vmem:[%s8955_s20 + $0x8d8] sm:$0xff] }
 0x2d9   : > { %v7508_v53 = vcombine.high %v682_v46, %v686_v47  ;;  %v7510_v17 = vcombine.high %v683_v48, %v687_v49  ;;  %v7507_v57 = vcombine.low %v682_v46, %v686_v47  ;;  %v730_v38 = vld [vmem:[%s8955_s20 + $0xa50] sm:$0xff] }
 0x2db   : > { %6416 = vmatpush1.bf16.msra.mxu0 %v7451_v11  ;;  %6703 = vmatpush1.bf16.msra.mxu1 %v7453_v10  ;;  %v690_v11 = vld [vmem:[%s8955_s20 + $0x910] sm:$0xff] }
 0x2dc   : > { %6417 = vmatprep.subr.bf16.mxu0 %v7460_v55  ;;  %6704 = vmatprep.subr.bf16.mxu1 %v7462_v24  ;;  %v694_v10 = vld [vmem:[%s8955_s20 + $0x930] sm:$0xff]  ;;  %v691_v55 = vld [vmem:[%s8955_s20 + $0x918] sm:$0xff] }
 0x2dd   : > { %v695_v24 = vld [vmem:[%s8955_s20 + $0x938] sm:$0xff]  ;;  %v7516_v58 = vcombine.high %v690_v11, %v694_v10 }
 0x2de   : > { %v7518_v59 = vcombine.high %v691_v55, %v695_v24  ;;  %v7517_v5 = vcombine.low %v691_v55, %v695_v24  ;;  %v746_v24 = vld [vmem:[%s8955_s20 + $0xad0] sm:$0xff] }
 0x2df   : > { %6418 = vmatpush1.bf16.msra.mxu0 %v7459_v62  ;;  %6705 = vmatpush1.bf16.msra.mxu1 %v7461_v63  ;;  %v702_v62 = vld [vmem:[%s8955_s20 + $0x970] sm:$0xff]  ;;  %v699_v63 = vld [vmem:[%s8955_s20 + $0x958] sm:$0xff] }
 0x2e0   : > { %6419 = vmatprep.subr.bf16.mxu0 %v7468_v2  ;;  %6706 = vmatprep.subr.bf16.mxu1 %v7470_v4  ;;  %v703_v2 = vld [vmem:[%s8955_s20 + $0x978] sm:$0xff]  ;;  %v7515_v4 = vcombine.low %v690_v11, %v694_v10  ;;  %v7524_v6 = vcombine.high %v698_v61, %v702_v62 }
 0x2e1   : > { %v7526_v7 = vcombine.high %v699_v63, %v703_v2  ;;  %v7525_v15 = vcombine.low %v699_v63, %v703_v2  ;;  %v754_v2 = vld [vmem:[%s8955_s20 + $0xb10] sm:$0xff] }
 0x2e3   : > { %6420 = vmatpush1.bf16.msra.mxu0 %v7467_v9  ;;  %6707 = vmatpush1.bf16.msra.mxu1 %v7469_v12  ;;  %v710_v9 = vld [vmem:[%s8955_s20 + $0x9b0] sm:$0xff]  ;;  %v707_v12 = vld [vmem:[%s8955_s20 + $0x998] sm:$0xff] }
 0x2e4   : > { %6421 = vmatprep.subr.bf16.mxu0 %v7476_v18  ;;  %6708 = vmatprep.subr.bf16.mxu1 %v7478_v14  ;;  %v711_v18 = vld [vmem:[%s8955_s20 + $0x9b8] sm:$0xff]  ;;  %v7523_v14 = vcombine.low %v698_v61, %v702_v62  ;;  %v7532_v16 = vcombine.high %v706_v8, %v710_v9 }
 0x2e5   : > { %v7534_v26 = vcombine.high %v707_v12, %v711_v18  ;;  %v7533_v25 = vcombine.low %v707_v12, %v711_v18  ;;  %v762_v18 = vld [vmem:[%s8955_s20 + $0xb50] sm:$0xff] }
 0x2e7   : > { %6422 = vmatpush1.bf16.msra.mxu0 %v7475_v20  ;;  %6709 = vmatpush1.bf16.msra.mxu1 %v7477_v21  ;;  %v718_v20 = vld [vmem:[%s8955_s20 + $0x9f0] sm:$0xff]  ;;  %v715_v21 = vld [vmem:[%s8955_s20 + $0x9d8] sm:$0xff] }
 0x2e8   : > { %6432 = vmatprep.subr.bf16.mxu0 %v7484_v22  ;;  %6719 = vmatprep.subr.bf16.mxu1 %v7486_v23  ;;  %v719_v22 = vld [vmem:[%s8955_s20 + $0x9f8] sm:$0xff]  ;;  %v7531_v23 = vcombine.low %v706_v8, %v710_v9  ;;  %v7540_v27 = vcombine.high %v714_v60, %v718_v20 }
 0x2e9   : > { %v7542_v28 = vcombine.high %v715_v21, %v719_v22 }
 0x2ea   : > { %6424 = vmatmul.mubr.bf16.vlgmr.msra.gmra.mrb[4].mxu0 %v9157_v42  ;;  %6711 = vmatmul.mubr.bf16.vlgmr.msra.gmra.mrb[4].mxu1 %v9157_v42  ;;  %v7499_v42 = vcombine.low %v674_v0, %v678_v36  ;;  %v7541_v0 = vcombine.low %v715_v21, %v719_v22  ;;  %v770_v22 = vld [vmem:[%s8955_s20 + $0xb90] sm:$0xff] }
 0x2eb   : > { %6433 = vmatpush1.bf16.msra.mxu0 %v7483_v29  ;;  %6720 = vmatpush1.bf16.msra.mxu1 %v7485_v31  ;;  %v726_v29 = vld [vmem:[%s8955_s20 + $0xa30] sm:$0xff]  ;;  %v723_v31 = vld [vmem:[%s8955_s20 + $0xa18] sm:$0xff] }
 0x2ec   : > { %6434 = vmatprep.subr.bf16.mxu0 %v7492_v33  ;;  %6721 = vmatprep.subr.bf16.mxu1 %v7494_v34  ;;  %v727_v33 = vld [vmem:[%s8955_s20 + $0xa38] sm:$0xff]  ;;  %v7539_v34 = vcombine.low %v714_v60, %v718_v20  ;;  %v7548_v36 = vcombine.high %v722_v35, %v726_v29 }
 0x2ed   : > { %6464 = vmatprep.mubr.bf16.mxu0 %v9163_v52  ;;  %6751 = vmatprep.mubr.bf16.mxu1 %v9163_v52  ;;  %v7509_v52 = vcombine.low %v683_v48, %v687_v49  ;;  %v7550_v37 = vcombine.high %v723_v31, %v727_v33  ;;  %v7549_v46 = vcombine.low %v723_v31, %v727_v33  ;;  %v738_v49 = vld [vmem:[%s8955_s20 + $0xa90] sm:$0xff] }
 0x2ee   : > { %v778_v33 = vld [vmem:[%s8955_s20 + $0xbd0] sm:$0xff] }
 0x2ef   : > { %6435 = vmatpush1.bf16.msra.mxu0 %v7491_v39  ;;  %6722 = vmatpush1.bf16.msra.mxu1 %v7493_v41  ;;  %v734_v39 = vld [vmem:[%s8955_s20 + $0xa70] sm:$0xff]  ;;  %v731_v41 = vld [vmem:[%s8955_s20 + $0xa58] sm:$0xff] }
 0x2f0   : > { %6436 = vmatprep.subr.bf16.mxu0 %v7500_v43  ;;  %6723 = vmatprep.subr.bf16.mxu1 %v7502_v44  ;;  %v735_v43 = vld [vmem:[%s8955_s20 + $0xa78] sm:$0xff]  ;;  %v7547_v44 = vcombine.low %v722_v35, %v726_v29  ;;  %v7556_v47 = vcombine.high %v730_v38, %v734_v39 }
 0x2f1   : > { %v7558_v48 = vcombine.high %v731_v41, %v735_v43  ;;  %v7557_v11 = vcombine.low %v731_v41, %v735_v43  ;;  %v786_v43 = vld [vmem:[%s8955_s20 + $0xc10] sm:$0xff] }
 0x2f3   : > { %6437 = vmatpush1.bf16.msra.mxu0 %v7499_v42  ;;  %6724 = vmatpush1.bf16.msra.mxu1 %v7501_v50  ;;  %v742_v42 = vld [vmem:[%s8955_s20 + $0xab0] sm:$0xff]  ;;  %v739_v50 = vld [vmem:[%s8955_s20 + $0xa98] sm:$0xff] }
 0x2f4   : > { %6438 = vmatprep.subr.bf16.mxu0 %v7508_v53  ;;  %6725 = vmatprep.subr.bf16.mxu1 %v7510_v17  ;;  %v743_v53 = vld [vmem:[%s8955_s20 + $0xab8] sm:$0xff]  ;;  %v7555_v17 = vcombine.low %v730_v38, %v734_v39  ;;  %v7564_v10 = vcombine.high %v738_v49, %v742_v42 }
 0x2f5   : > { %v7566_v55 = vcombine.high %v739_v50, %v743_v53  ;;  %v7565_v61 = vcombine.low %v739_v50, %v743_v53  ;;  %v794_v53 = vld [vmem:[%s8955_s20 + $0xc50] sm:$0xff] }
 0x2f7   : > { %6439 = vmatpush1.bf16.msra.mxu0 %v7507_v57  ;;  %6726 = vmatpush1.bf16.msra.mxu1 %v7509_v52  ;;  %v750_v57 = vld [vmem:[%s8955_s20 + $0xaf0] sm:$0xff]  ;;  %v747_v52 = vld [vmem:[%s8955_s20 + $0xad8] sm:$0xff] }
 0x2f8   : > { %6440 = vmatprep.subr.bf16.mxu0 %v7516_v58  ;;  %6727 = vmatprep.subr.bf16.mxu1 %v7518_v59  ;;  %v751_v58 = vld [vmem:[%s8955_s20 + $0xaf8] sm:$0xff]  ;;  %v7563_v59 = vcombine.low %v738_v49, %v742_v42  ;;  %v7572_v62 = vcombine.high %v746_v24, %v750_v57 }
 0x2f9   : > { %v7574_v63 = vcombine.high %v747_v52, %v751_v58  ;;  %v7573_v8 = vcombine.low %v747_v52, %v751_v58  ;;  %v802_v58 = vld [vmem:[%s8955_s20 + $0xc90] sm:$0xff] }
 0x2fb   : > { %6441 = vmatpush1.bf16.msra.mxu0 %v7515_v4  ;;  %6728 = vmatpush1.bf16.msra.mxu1 %v7517_v5  ;;  %v758_v4 = vld [vmem:[%s8955_s20 + $0xb30] sm:$0xff]  ;;  %v755_v5 = vld [vmem:[%s8955_s20 + $0xb18] sm:$0xff] }
 0x2fc   : > { %6442 = vmatprep.subr.bf16.mxu0 %v7524_v6  ;;  %6729 = vmatprep.subr.bf16.mxu1 %v7526_v7  ;;  %v759_v6 = vld [vmem:[%s8955_s20 + $0xb38] sm:$0xff]  ;;  %v7571_v7 = vcombine.low %v746_v24, %v750_v57  ;;  %v7580_v9 = vcombine.high %v754_v2, %v758_v4 }
 0x2fd   : > { %v7582_v12 = vcombine.high %v755_v5, %v759_v6  ;;  %v7581_v60 = vcombine.low %v755_v5, %v759_v6  ;;  %v810_v6 = vld [vmem:[%s8955_s20 + $0xcd0] sm:$0xff] }
 0x2ff   : > { %6443 = vmatpush1.bf16.msra.mxu0 %v7523_v14  ;;  %6730 = vmatpush1.bf16.msra.mxu1 %v7525_v15  ;;  %v766_v14 = vld [vmem:[%s8955_s20 + $0xb70] sm:$0xff]  ;;  %v763_v15 = vld [vmem:[%s8955_s20 + $0xb58] sm:$0xff] }
 0x300   : > { %6444 = vmatprep.subr.bf16.mxu0 %v7532_v16  ;;  %6731 = vmatprep.subr.bf16.mxu1 %v7534_v26  ;;  %v767_v16 = vld [vmem:[%s8955_s20 + $0xb78] sm:$0xff]  ;;  %v7579_v26 = vcombine.low %v754_v2, %v758_v4  ;;  %v7588_v20 = vcombine.high %v762_v18, %v766_v14 }
 0x301   : > { %v7590_v21 = vcombine.high %v763_v15, %v767_v16  ;;  %v7589_v35 = vcombine.low %v763_v15, %v767_v16  ;;  %v818_v15 = vld [vmem:[%s8955_s20 + $0xd10] sm:$0xff] }
 0x302   : > { %v822_v16 = vld [vmem:[%s8955_s20 + $0xd30] sm:$0xff] }
 0x303   : > { %6445 = vmatpush1.bf16.msra.mxu0 %v7531_v23  ;;  %6732 = vmatpush1.bf16.msra.mxu1 %v7533_v25  ;;  %v774_v23 = vld [vmem:[%s8955_s20 + $0xbb0] sm:$0xff]  ;;  %v771_v25 = vld [vmem:[%s8955_s20 + $0xb98] sm:$0xff] }
 0x304   : > { %6446 = vmatprep.subr.bf16.mxu0 %v7540_v27  ;;  %6733 = vmatprep.subr.bf16.mxu1 %v7542_v28  ;;  %v775_v27 = vld [vmem:[%s8955_s20 + $0xbb8] sm:$0xff]  ;;  %v7587_v28 = vcombine.low %v762_v18, %v766_v14  ;;  %v7596_v29 = vcombine.high %v770_v22, %v774_v23 }
 0x305   : > { %v7598_v31 = vcombine.high %v771_v25, %v775_v27  ;;  %v7597_v38 = vcombine.low %v771_v25, %v775_v27  ;;  %v830_v25 = vld [vmem:[%s8955_s20 + $0xd70] sm:$0xff]  ;;  %v827_v27 = vld [vmem:[%s8955_s20 + $0xd58] sm:$0xff] }
 0x307   : > { %6447 = vmatpush1.bf16.msra.mxu0 %v7539_v34  ;;  %6734 = vmatpush1.bf16.msra.mxu1 %v7541_v0  ;;  %v782_v34 = vld [vmem:[%s8955_s20 + $0xbf0] sm:$0xff]  ;;  %v779_v0 = vld [vmem:[%s8955_s20 + $0xbd8] sm:$0xff] }
 0x308   : > { %6448 = vmatprep.subr.bf16.mxu0 %v7548_v36  ;;  %6735 = vmatprep.subr.bf16.mxu1 %v7550_v37  ;;  %v783_v36 = vld [vmem:[%s8955_s20 + $0xbf8] sm:$0xff]  ;;  %v7595_v37 = vcombine.low %v770_v22, %v774_v23  ;;  %v7604_v39 = vcombine.high %v778_v33, %v782_v34  ;;  %v826_v23 = vld [vmem:[%s8955_s20 + $0xd50] sm:$0xff] }
 0x309   : > { %v7606_v41 = vcombine.high %v779_v0, %v783_v36  ;;  %v7605_v49 = vcombine.low %v779_v0, %v783_v36  ;;  %v838_v0 = vld [vmem:[%s8955_s20 + $0xdb0] sm:$0xff]  ;;  %v835_v36 = vld [vmem:[%s8955_s20 + $0xd98] sm:$0xff] }
 0x30b   : > { %6449 = vmatpush1.bf16.msra.mxu0 %v7547_v44  ;;  %6736 = vmatpush1.bf16.msra.mxu1 %v7549_v46  ;;  %v790_v44 = vld [vmem:[%s8955_s20 + $0xc30] sm:$0xff]  ;;  %v787_v46 = vld [vmem:[%s8955_s20 + $0xc18] sm:$0xff] }
 0x30c   : > { %6450 = vmatprep.subr.bf16.mxu0 %v7556_v47  ;;  %6737 = vmatprep.subr.bf16.mxu1 %v7558_v48  ;;  %v791_v47 = vld [vmem:[%s8955_s20 + $0xc38] sm:$0xff]  ;;  %v7603_v48 = vcombine.low %v778_v33, %v782_v34  ;;  %v7612_v42 = vcombine.high %v786_v43, %v790_v44  ;;  %v834_v34 = vld [vmem:[%s8955_s20 + $0xd90] sm:$0xff] }
 0x30d   : > { %v7614_v50 = vcombine.high %v787_v46, %v791_v47  ;;  %v7613_v24 = vcombine.low %v787_v46, %v791_v47  ;;  %v842_v46 = vld [vmem:[%s8955_s20 + $0xdd0] sm:$0xff] }
 0x30e   : > { %v846_v47 = vld [vmem:[%s8955_s20 + $0xdf0] sm:$0xff] }
 0x30f   : > { %6451 = vmatpush1.bf16.msra.mxu0 %v7555_v17  ;;  %6738 = vmatpush1.bf16.msra.mxu1 %v7557_v11  ;;  %v798_v17 = vld [vmem:[%s8955_s20 + $0xc70] sm:$0xff]  ;;  %v795_v11 = vld [vmem:[%s8955_s20 + $0xc58] sm:$0xff] }
 0x310   : > { %6452 = vmatprep.subr.bf16.mxu0 %v7564_v10  ;;  %6739 = vmatprep.subr.bf16.mxu1 %v7566_v55  ;;  %v799_v10 = vld [vmem:[%s8955_s20 + $0xc78] sm:$0xff]  ;;  %v7611_v55 = vcombine.low %v786_v43, %v790_v44  ;;  %v7620_v57 = vcombine.high %v794_v53, %v798_v17 }
 0x311   : > { %v7622_v52 = vcombine.high %v795_v11, %v799_v10  ;;  %v7621_v2 = vcombine.low %v795_v11, %v799_v10  ;;  %v7659_v10 = vcombine.low %v834_v34, %v838_v0 }
 0x313   : > { %6453 = vmatpush1.bf16.msra.mxu0 %v7563_v59  ;;  %6740 = vmatpush1.bf16.msra.mxu1 %v7565_v61  ;;  %v806_v59 = vld [vmem:[%s8955_s20 + $0xcb0] sm:$0xff]  ;;  %v803_v61 = vld [vmem:[%s8955_s20 + $0xc98] sm:$0xff] }
 0x314   : > { %6454 = vmatprep.subr.bf16.mxu0 %v7572_v62  ;;  %6741 = vmatprep.subr.bf16.mxu1 %v7574_v63  ;;  %v807_v62 = vld [vmem:[%s8955_s20 + $0xcb8] sm:$0xff]  ;;  %v7619_v63 = vcombine.low %v794_v53, %v798_v17  ;;  %v7628_v4 = vcombine.high %v802_v58, %v806_v59 }
 0x315   : > { %v7630_v5 = vcombine.high %v803_v61, %v807_v62 }
 0x317   : > { %6455 = vmatpush1.bf16.msra.mxu0 %v7571_v7  ;;  %6742 = vmatpush1.bf16.msra.mxu1 %v7573_v8  ;;  %v814_v7 = vld [vmem:[%s8955_s20 + $0xcf0] sm:$0xff]  ;;  %v811_v8 = vld [vmem:[%s8955_s20 + $0xcd8] sm:$0xff] }
 0x318   : > { %6456 = vmatprep.subr.bf16.mxu0 %v7580_v9  ;;  %6743 = vmatprep.subr.bf16.mxu1 %v7582_v12  ;;  %v815_v9 = vld [vmem:[%s8955_s20 + $0xcf8] sm:$0xff]  ;;  %v7629_v12 = vcombine.low %v803_v61, %v807_v62  ;;  %v7636_v18 = vcombine.high %v810_v6, %v814_v7 }
 0x319   : > { %v7638_v14 = vcombine.high %v811_v8, %v815_v9 }
 0x31b   : > { %6457 = vmatpush1.bf16.msra.mxu0 %v7579_v26  ;;  %6744 = vmatpush1.bf16.msra.mxu1 %v7581_v60  ;;  %v819_v26 = vld [vmem:[%s8955_s20 + $0xd18] sm:$0xff] }
 0x31c   : > { %6458 = vmatprep.subr.bf16.mxu0 %v7588_v20  ;;  %6745 = vmatprep.subr.bf16.mxu1 %v7590_v21  ;;  %v823_v60 = vld [vmem:[%s8955_s20 + $0xd38] sm:$0xff]  ;;  %v7635_v20 = vcombine.low %v810_v6, %v814_v7  ;;  %v7644_v21 = vcombine.high %v818_v15, %v822_v16  ;;  %v303_v7 = vld [vmem:[%s8972_s18] sm:$0xff] }
 0x31d   : > { %v7646_v22 = vcombine.high %v819_v26, %v823_v60  ;;  %v855_v6 = vld [vmem:[%s8955_s20 + $0xe38] sm:$0xff] }
 0x31f   : > { %6459 = vmatpush1.bf16.msra.mxu0 %v7587_v28  ;;  %6746 = vmatpush1.bf16.msra.mxu1 %v7589_v35  ;;  %v831_v28 = vld [vmem:[%s8955_s20 + $0xd78] sm:$0xff]  ;;  %v7643_v35 = vcombine.low %v818_v15, %v822_v16  ;;  %v862_v15 = vld [vmem:[%s8955_s20 + $0xe70] sm:$0xff] }
 0x320   : > { %6460 = vmatprep.subr.bf16.mxu0 %v7596_v29  ;;  %6747 = vmatprep.subr.bf16.mxu1 %v7598_v31  ;;  %v7645_v29 = vcombine.low %v819_v26, %v823_v60  ;;  %v7652_v31 = vcombine.high %v826_v23, %v830_v25  ;;  %v7654_v33 = vcombine.high %v827_v27, %v831_v28  ;;  %v859_v26 = vld [vmem:[%s8955_s20 + $0xe58] sm:$0xff] }
 0x321   : > { %v863_v60 = vld [vmem:[%s8955_s20 + $0xe78] sm:$0xff] }
 0x323   : > { %6461 = vmatpush1.bf16.msra.mxu0 %v7595_v37  ;;  %6748 = vmatpush1.bf16.msra.mxu1 %v7597_v38  ;;  %v839_v37 = vld [vmem:[%s8955_s20 + $0xdb8] sm:$0xff]  ;;  %v7651_v38 = vcombine.low %v826_v23, %v830_v25  ;;  %v866_v23 = vld [vmem:[%s8955_s20 + $0xe90] sm:$0xff] }
 0x324   : > { %6462 = vmatprep.subr.bf16.mxu0 %v7604_v39  ;;  %6749 = vmatprep.subr.bf16.mxu1 %v7606_v41  ;;  %v7653_v39 = vcombine.low %v827_v27, %v831_v28  ;;  %v7660_v41 = vcombine.high %v834_v34, %v838_v0  ;;  %v7662_v44 = vcombine.high %v835_v36, %v839_v37  ;;  %v870_v25 = vld [vmem:[%s8955_s20 + $0xeb0] sm:$0xff]  ;;  %v867_v27 = vld [vmem:[%s8955_s20 + $0xe98] sm:$0xff] }
 0x325   : > { %v871_v28 = vld [vmem:[%s8955_s20 + $0xeb8] sm:$0xff]  ;;  %v874_v34 = vld [vmem:[%s8955_s20 + $0xed0] sm:$0xff] }
 0x326   : > { %v878_v0 = vld [vmem:[%s8955_s20 + $0xef0] sm:$0xff] }
 0x327   : > { %6463 = vmatpush1.bf16.msra.mxu0 %v7603_v48  ;;  %6750 = vmatpush1.bf16.msra.mxu1 %v7605_v49 }
 0x328   : > { %6473 = vmatprep.subr.bf16.mxu0 %v7612_v42  ;;  %6760 = vmatprep.subr.bf16.mxu1 %v7614_v50  ;;  %v843_v42 = vld [vmem:[%s8955_s20 + $0xdd8] sm:$0xff] }
 0x329   : > { %v847_v50 = vld [vmem:[%s8955_s20 + $0xdf8] sm:$0xff] }
 0x32a   : > { %6465 = vmatmul.mubr.bf16.vlgmr.msra.gmra.mrb[4].mxu0 %v9238_v3  ;;  %6752 = vmatmul.mubr.bf16.vlgmr.msra.gmra.mrb[4].mxu1 %v9238_v3  ;;  %v7627_v3 = vcombine.low %v802_v58, %v806_v59  ;;  %v7668_v58 = vcombine.high %v842_v46, %v846_v47  ;;  %v7670_v62 = vcombine.high %v843_v42, %v847_v50 }
 0x32b   : > { %6474 = vmatpush1.bf16.msra.mxu0 %v7611_v55  ;;  %6761 = vmatpush1.bf16.msra.mxu1 %v7613_v24 }
 0x32c   : > { %6475 = vmatprep.subr.bf16.mxu0 %v7620_v57  ;;  %6762 = vmatprep.subr.bf16.mxu1 %v7622_v52  ;;  %v7661_v52 = vcombine.low %v835_v36, %v839_v37  ;;  %v875_v36 = vld [vmem:[%s8955_s20 + $0xed8] sm:$0xff] }
 0x32d   : > { %6505 = vmatprep.mubr.bf16.mxu0 %v9244_v13  ;;  %6792 = vmatprep.mubr.bf16.mxu1 %v9244_v13  ;;  %v7637_v13 = vcombine.low %v811_v8, %v815_v9  ;;  %v7667_v8 = vcombine.low %v842_v46, %v846_v47  ;;  %v879_v37 = vld [vmem:[%s8955_s20 + $0xef8] sm:$0xff]  ;;  %v886_v46 = vld [vmem:[%s8955_s20 + $0xf30] sm:$0xff] }
 0x32e   : > { %v883_v47 = vld [vmem:[%s8955_s20 + $0xf18] sm:$0xff] }
 0x32f   : > { %6476 = vmatpush1.bf16.msra.mxu0 %v7619_v63  ;;  %6763 = vmatpush1.bf16.msra.mxu1 %v7621_v2  ;;  %v850_v63 = vld [vmem:[%s8955_s20 + $0xe10] sm:$0xff] }
 0x330   : > { %6477 = vmatprep.subr.bf16.mxu0 %v7628_v4  ;;  %6764 = vmatprep.subr.bf16.mxu1 %v7630_v5  ;;  %v854_v2 = vld [vmem:[%s8955_s20 + $0xe30] sm:$0xff]  ;;  %v851_v5 = vld [vmem:[%s8955_s20 + $0xe18] sm:$0xff] }
 0x333   : > { %6478 = vmatpush1.bf16.msra.mxu0 %v7627_v3  ;;  %6765 = vmatpush1.bf16.msra.mxu1 %v7629_v12  ;;  %v7669_v3 = vcombine.low %v843_v42, %v847_v50  ;;  %v7676_v12 = vcombine.high %v850_v63, %v854_v2  ;;  %v7701_v42 = vcombine.low %v875_v36, %v879_v37 }
 0x334   : > { %6479 = vmatprep.subr.bf16.mxu0 %v7636_v18  ;;  %6766 = vmatprep.subr.bf16.mxu1 %v7638_v14  ;;  %v7678_v18 = vcombine.high %v851_v5, %v855_v6  ;;  %v858_v14 = vld [vmem:[%s8955_s20 + $0xe50] sm:$0xff] }
 0x337   : > { %6480 = vmatpush1.bf16.msra.mxu0 %v7635_v20  ;;  %6767 = vmatpush1.bf16.msra.mxu1 %v7637_v13  ;;  %v7675_v20 = vcombine.low %v850_v63, %v854_v2  ;;  %v7677_v13 = vcombine.low %v851_v5, %v855_v6  ;;  %v903_v63 = vld [vmem:[%s8955_s20 + $0xfb8] sm:$0xff] }
 0x338   : > { %6481 = vmatprep.subr.bf16.mxu0 %v7644_v21  ;;  %6768 = vmatprep.subr.bf16.mxu1 %v7646_v22  ;;  %v7684_v21 = vcombine.high %v858_v14, %v862_v15  ;;  %v7686_v22 = vcombine.high %v859_v26, %v863_v60 }
 0x33b   : > { %6482 = vmatpush1.bf16.msra.mxu0 %v7643_v35  ;;  %6769 = vmatpush1.bf16.msra.mxu1 %v7645_v29  ;;  %v7683_v35 = vcombine.low %v858_v14, %v862_v15  ;;  %v7685_v29 = vcombine.low %v859_v26, %v863_v60  ;;  %v918_v26 = vld [vmem:[%s8955_s20 + $0x1030] sm:$0xff]  ;;  %v915_v60 = vld [vmem:[%s8955_s20 + $0x1018] sm:$0xff] }
 0x33c   : > { %6483 = vmatprep.subr.bf16.mxu0 %v7652_v31  ;;  %6770 = vmatprep.subr.bf16.mxu1 %v7654_v33  ;;  %v7692_v31 = vcombine.high %v866_v23, %v870_v25  ;;  %v7694_v33 = vcombine.high %v867_v27, %v871_v28 }
 0x33d   : > { %v6056_v43 = vpop.f32.mrb[0].mxu0  ;;  %v6343_v48 = vpop.f32.mrb[0].mxu1 }
 0x33e   : > { %v6058_v49 = vpop.f32.mrb[1].mxu0  ;;  %v6345_v17 = vpop.f32.mrb[1].mxu1 }
 0x33f   : > { %v6932_v53 = vcombine.low %v6056_v43, %v6058_v49  ;;  %v6060_v11 = vpop.f32.mrb[2].mxu0  ;;  %6484 = vmatpush1.bf16.msra.mxu0 %v7651_v38  ;;  %v6933_v55 = vcombine.low %v6343_v48, %v6345_v17  ;;  %v6347_v24 = vpop.f32.mrb[2].mxu1  ;;  %6771 = vmatpush1.bf16.msra.mxu1 %v7653_v39  ;;  %v7691_v38 = vcombine.low %v866_v23, %v870_v25  ;;  %v887_v48 = vld [vmem:[%s8955_s20 + $0xf38] sm:$0xff]  ;;  %v890_v17 = vld [vmem:[%s8955_s20 + $0xf50] sm:$0xff] }
 0x340   : > { %v6061_v57 = vpop.f32.mrb[3].mxu0  ;;  %6485 = vmatprep.subr.bf16.mxu0 %v7660_v41  ;;  %v6348_v61 = vpop.f32.mrb[3].mxu1  ;;  %6772 = vmatprep.subr.bf16.mxu1 %v7662_v44  ;;  %v7693_v39 = vcombine.low %v867_v27, %v871_v28  ;;  %v7700_v41 = vcombine.high %v874_v34, %v878_v0  ;;  %v7702_v43 = vcombine.high %v875_v36, %v879_v37  ;;  %v882_v44 = vld [vmem:[%s8955_s20 + $0xf10] sm:$0xff]  ;;  %v923_v28 = vld [vmem:[%s8955_s20 + $0x1058] sm:$0xff] }
 0x341   : > { %v6940_v59 = vrot.slane %v6932_v53, %v9006_v54  ;;  %v6947_v4 = vrot.slane %v6933_v55, %v9006_v54  ;;  %v7699_v49 = vcombine.low %v874_v34, %v878_v0  ;;  %v7708_v50 = vcombine.high %v882_v44, %v886_v46  ;;  %v894_v11 = vld [vmem:[%s8955_s20 + $0xf70] sm:$0xff]  ;;  %v895_v55 = vld [vmem:[%s8955_s20 + $0xf78] sm:$0xff] }
 0x342   : > { %v7710_v53 = vcombine.high %v883_v47, %v887_v48  ;;  %v7707_v24 = vcombine.low %v882_v44, %v886_v46  ;;  %v7709_v57 = vcombine.low %v883_v47, %v887_v48  ;;  %v902_v61 = vld [vmem:[%s8955_s20 + $0xfb0] sm:$0xff]  ;;  %v7715_v2 = vcombine.low %v890_v17, %v894_v11  ;;  %v931_v37 = vld [vmem:[%s8955_s20 + $0x1098] sm:$0xff] }
 0x343   : > { %6486 = vmatpush1.bf16.msra.mxu0 %v7659_v10  ;;  %v6948_v9 = vcombine.low %v6940_v59, %v6947_v4  ;;  %6773 = vmatpush1.bf16.msra.mxu1 %v7661_v52  ;;  %v891_v10 = vld [vmem:[%s8955_s20 + $0xf58] sm:$0xff]  ;;  %v7716_v52 = vcombine.high %v890_v17, %v894_v11  ;;  %v898_v59 = vld [vmem:[%s8955_s20 + $0xf90] sm:$0xff] }
 0x344   : > { %6487 = vmatprep.subr.bf16.mxu0 %v7668_v58  ;;  %6774 = vmatprep.subr.bf16.mxu1 %v7670_v62  ;;  %v7718_v58 = vcombine.high %v891_v10, %v895_v55  ;;  %v899_v62 = vld [vmem:[%s8955_s20 + $0xf98] sm:$0xff]  ;;  %v7717_v4 = vcombine.low %v891_v10, %v895_v55  ;;  %v7724_v5 = vcombine.high %v898_v59, %v902_v61  ;;  %v922_v25 = vld [vmem:[%s8955_s20 + $0x1050] sm:$0xff] }
 0x345   : > { %v6968_v16 = vadd.f32 %v6948_v9, %v303_v7  ;;  %v7726_v6 = vcombine.high %v899_v62, %v903_v63  ;;  %v906_v7 = vld [vmem:[%s8955_s20 + $0xfd0] sm:$0xff]  ;;  %v907_v9 = vld [vmem:[%s8955_s20 + $0xfd8] sm:$0xff] }
 0x346   : > { %v926_v27 = vld [vmem:[%s8955_s20 + $0x1070] sm:$0xff]  ;;  %v939_v48 = vld [vmem:[%s8955_s20 + $0x10d8] sm:$0xff] }
 0x347   : > { %6488 = vmatpush1.bf16.msra.mxu0 %v7667_v8  ;;  %6970 = vst [vmem:[%s8972_s18] sm:$0xff] %v6968_v16  ;;  %6775 = vmatpush1.bf16.msra.mxu1 %v7669_v3  ;;  %v910_v8 = vld [vmem:[%s8955_s20 + $0xff0] sm:$0xff]  ;;  %v911_v3 = vld [vmem:[%s8955_s20 + $0xff8] sm:$0xff] }
 0x348   : > { %6489 = vmatprep.subr.bf16.mxu0 %v7676_v12  ;;  %6776 = vmatprep.subr.bf16.mxu1 %v7678_v18  ;;  %v7723_v12 = vcombine.low %v898_v59, %v902_v61  ;;  %v7725_v18 = vcombine.low %v899_v62, %v903_v63  ;;  %v7732_v14 = vcombine.high %v906_v7, %v910_v8  ;;  %v914_v16 = vld [vmem:[%s8955_s20 + $0x1010] sm:$0xff]  ;;  %v947_v10 = vld [vmem:[%s8955_s20 + $0x1118] sm:$0xff] }
 0x349   : > { %v7734_v15 = vcombine.high %v907_v9, %v911_v3  ;;  %v930_v0 = vld [vmem:[%s8955_s20 + $0x1090] sm:$0xff]  ;;  %v951_v55 = vld [vmem:[%s8955_s20 + $0x1138] sm:$0xff] }
 0x34a   : > { %v934_v36 = vld [vmem:[%s8955_s20 + $0x10b0] sm:$0xff]  ;;  %v955_v61 = vld [vmem:[%s8955_s20 + $0x1158] sm:$0xff] }
 0x34b   : > { %6490 = vmatpush1.bf16.msra.mxu0 %v7675_v20  ;;  %6777 = vmatpush1.bf16.msra.mxu1 %v7677_v13  ;;  %v919_v20 = vld [vmem:[%s8955_s20 + $0x1038] sm:$0xff]  ;;  %v7731_v13 = vcombine.low %v906_v7, %v910_v8  ;;  %v938_v46 = vld [vmem:[%s8955_s20 + $0x10d0] sm:$0xff] }
 0x34c   : > { %6491 = vmatprep.subr.bf16.mxu0 %v7684_v21  ;;  %6778 = vmatprep.subr.bf16.mxu1 %v7686_v22  ;;  %v7733_v21 = vcombine.low %v907_v9, %v911_v3  ;;  %v7740_v22 = vcombine.high %v914_v16, %v918_v26  ;;  %v7742_v23 = vcombine.high %v915_v60, %v919_v20  ;;  %v942_v47 = vld [vmem:[%s8955_s20 + $0x10f0] sm:$0xff]  ;;  %v959_v62 = vld [vmem:[%s8955_s20 + $0x1178] sm:$0xff] }
 0x34d   : > { %v946_v17 = vld [vmem:[%s8955_s20 + $0x1110] sm:$0xff]  ;;  %v963_v8 = vld [vmem:[%s8955_s20 + $0x1198] sm:$0xff] }
 0x34e   : > { %v950_v11 = vld [vmem:[%s8955_s20 + $0x1130] sm:$0xff]  ;;  %v967_v9 = vld [vmem:[%s8955_s20 + $0x11b8] sm:$0xff] }
 0x34f   : > { %6492 = vmatpush1.bf16.msra.mxu0 %v7683_v35  ;;  %6779 = vmatpush1.bf16.msra.mxu1 %v7685_v29  ;;  %v927_v35 = vld [vmem:[%s8955_s20 + $0x1078] sm:$0xff]  ;;  %v7739_v29 = vcombine.low %v914_v16, %v918_v26  ;;  %v958_v59 = vld [vmem:[%s8955_s20 + $0x1170] sm:$0xff]  ;;  %v7771_v63 = vcombine.low %v946_v17, %v950_v11 }
 0x350   : > { %6493 = vmatprep.subr.bf16.mxu0 %v7692_v31  ;;  %6780 = vmatprep.subr.bf16.mxu1 %v7694_v33  ;;  %v7741_v31 = vcombine.low %v915_v60, %v919_v20  ;;  %v7748_v33 = vcombine.high %v922_v25, %v926_v27  ;;  %v7750_v34 = vcombine.high %v923_v28, %v927_v35  ;;  %v966_v7 = vld [vmem:[%s8955_s20 + $0x11b0] sm:$0xff]  ;;  %v971_v26 = vld [vmem:[%s8955_s20 + $0x11d8] sm:$0xff] }
 0x351   : > { %v974_v16 = vld [vmem:[%s8955_s20 + $0x11f0] sm:$0xff]  ;;  %v975_v60 = vld [vmem:[%s8955_s20 + $0x11f8] sm:$0xff] }
 0x353   : > { %6494 = vmatpush1.bf16.msra.mxu0 %v7691_v38  ;;  %6781 = vmatpush1.bf16.msra.mxu1 %v7693_v39  ;;  %v935_v38 = vld [vmem:[%s8955_s20 + $0x10b8] sm:$0xff]  ;;  %v7747_v39 = vcombine.low %v922_v25, %v926_v27  ;;  %v982_v25 = vld [vmem:[%s8955_s20 + $0x1230] sm:$0xff] }
 0x354   : > { %6495 = vmatprep.subr.bf16.mxu0 %v7700_v41  ;;  %6782 = vmatprep.subr.bf16.mxu1 %v7702_v43  ;;  %v7749_v41 = vcombine.low %v923_v28, %v927_v35  ;;  %v7756_v43 = vcombine.high %v930_v0, %v934_v36  ;;  %v7758_v44 = vcombine.high %v931_v37, %v935_v38  ;;  %v979_v27 = vld [vmem:[%s8955_s20 + $0x1218] sm:$0xff] }
 0x355   : > { %v983_v28 = vld [vmem:[%s8955_s20 + $0x1238] sm:$0xff] }
 0x357   : > { %6496 = vmatpush1.bf16.msra.mxu0 %v7699_v49  ;;  %6783 = vmatpush1.bf16.msra.mxu1 %v7701_v42  ;;  %v943_v49 = vld [vmem:[%s8955_s20 + $0x10f8] sm:$0xff]  ;;  %v7757_v42 = vcombine.low %v931_v37, %v935_v38 }
 0x358   : > { %6497 = vmatprep.subr.bf16.mxu0 %v7708_v50  ;;  %6784 = vmatprep.subr.bf16.mxu1 %v7710_v53  ;;  %v7764_v50 = vcombine.high %v938_v46, %v942_v47  ;;  %v7766_v53 = vcombine.high %v939_v48, %v943_v49  ;;  %v991_v37 = vld [vmem:[%s8955_s20 + $0x1278] sm:$0xff] }
 0x35b   : > { %6498 = vmatpush1.bf16.msra.mxu0 %v7707_v24  ;;  %6785 = vmatpush1.bf16.msra.mxu1 %v7709_v57  ;;  %v7763_v24 = vcombine.low %v938_v46, %v942_v47  ;;  %v7772_v57 = vcombine.high %v946_v17, %v950_v11  ;;  %v998_v46 = vld [vmem:[%s8955_s20 + $0x12b0] sm:$0xff]  ;;  %v995_v47 = vld [vmem:[%s8955_s20 + $0x1298] sm:$0xff] }
 0x35c   : > { %6499 = vmatprep.subr.bf16.mxu0 %v7716_v52  ;;  %6786 = vmatprep.subr.bf16.mxu1 %v7718_v58  ;;  %v7774_v52 = vcombine.high %v947_v10, %v951_v55  ;;  %v954_v58 = vld [vmem:[%s8955_s20 + $0x1150] sm:$0xff]  ;;  %v1003_v11 = vld [vmem:[%s8955_s20 + $0x12d8] sm:$0xff] }
 0x35d   : > { %v7779_v3 = vcombine.low %v954_v58, %v958_v59  ;;  %v1006_v17 = vld [vmem:[%s8955_s20 + $0x12f0] sm:$0xff] }
 0x35f   : > { %6500 = vmatpush1.bf16.msra.mxu0 %v7715_v2  ;;  %6787 = vmatpush1.bf16.msra.mxu1 %v7717_v4  ;;  %v7773_v2 = vcombine.low %v947_v10, %v951_v55  ;;  %v7780_v4 = vcombine.high %v954_v58, %v958_v59  ;;  %v1007_v10 = vld [vmem:[%s8955_s20 + $0x12f8] sm:$0xff]  ;;  %v1014_v58 = vld [vmem:[%s8955_s20 + $0x1330] sm:$0xff] }
 0x360   : > { %6501 = vmatprep.subr.bf16.mxu0 %v7724_v5  ;;  %6788 = vmatprep.subr.bf16.mxu1 %v7726_v6  ;;  %v7782_v5 = vcombine.high %v955_v61, %v959_v62  ;;  %v962_v6 = vld [vmem:[%s8955_s20 + $0x1190] sm:$0xff]  ;;  %v1011_v59 = vld [vmem:[%s8955_s20 + $0x1318] sm:$0xff] }
 0x361   : > { %v7787_v20 = vcombine.low %v962_v6, %v966_v7 }
 0x363   : > { %6502 = vmatpush1.bf16.msra.mxu0 %v7723_v12  ;;  %6789 = vmatpush1.bf16.msra.mxu1 %v7725_v18  ;;  %v7781_v12 = vcombine.low %v955_v61, %v959_v62  ;;  %v7788_v18 = vcombine.high %v962_v6, %v966_v7  ;;  %v1015_v61 = vld [vmem:[%s8955_s20 + $0x1338] sm:$0xff]  ;;  %v1022_v6 = vld [vmem:[%s8955_s20 + $0x1370] sm:$0xff] }
 0x364   : > { %6503 = vmatprep.subr.bf16.mxu0 %v7732_v14  ;;  %6790 = vmatprep.subr.bf16.mxu1 %v7734_v15  ;;  %v7790_v14 = vcombine.high %v963_v8, %v967_v9  ;;  %v970_v15 = vld [vmem:[%s8955_s20 + $0x11d0] sm:$0xff]  ;;  %v1019_v7 = vld [vmem:[%s8955_s20 + $0x1358] sm:$0xff] }
 0x365   : > { %v7795_v35 = vcombine.low %v970_v15, %v974_v16 }
 0x367   : > { %6504 = vmatpush1.bf16.msra.mxu0 %v7731_v13  ;;  %6791 = vmatpush1.bf16.msra.mxu1 %v7733_v21  ;;  %v7789_v13 = vcombine.low %v963_v8, %v967_v9  ;;  %v7796_v21 = vcombine.high %v970_v15, %v974_v16  ;;  %v1023_v8 = vld [vmem:[%s8955_s20 + $0x1378] sm:$0xff]  ;;  %v1030_v15 = vld [vmem:[%s8955_s20 + $0x13b0] sm:$0xff] }
 0x368   : > { %6514 = vmatprep.subr.bf16.mxu0 %v7740_v22  ;;  %6801 = vmatprep.subr.bf16.mxu1 %v7742_v23  ;;  %v7798_v22 = vcombine.high %v971_v26, %v975_v60  ;;  %v978_v23 = vld [vmem:[%s8955_s20 + $0x1210] sm:$0xff]  ;;  %v1027_v16 = vld [vmem:[%s8955_s20 + $0x1398] sm:$0xff] }
 0x369   : > { %v7803_v38 = vcombine.low %v978_v23, %v982_v25 }
 0x36a   : > { %6506 = vmatmul.mubr.bf16.vlgmr.msra.gmra.mrb[4].mxu0 %v9321_v30  ;;  %6793 = vmatmul.mubr.bf16.vlgmr.msra.gmra.mrb[4].mxu1 %v9321_v30  ;;  %v7755_v30 = vcombine.low %v930_v0, %v934_v36  ;;  %v990_v0 = vld [vmem:[%s8955_s20 + $0x1270] sm:$0xff]  ;;  %v987_v36 = vld [vmem:[%s8955_s20 + $0x1258] sm:$0xff] }
 0x36b   : > { %6515 = vmatpush1.bf16.msra.mxu0 %v7739_v29  ;;  %6802 = vmatpush1.bf16.msra.mxu1 %v7741_v31  ;;  %v7797_v29 = vcombine.low %v971_v26, %v975_v60  ;;  %v7804_v31 = vcombine.high %v978_v23, %v982_v25  ;;  %v1031_v26 = vld [vmem:[%s8955_s20 + $0x13b8] sm:$0xff]  ;;  %v1038_v23 = vld [vmem:[%s8955_s20 + $0x13f0] sm:$0xff] }
 0x36c   : > { %6516 = vmatprep.subr.bf16.mxu0 %v7748_v33  ;;  %6803 = vmatprep.subr.bf16.mxu1 %v7750_v34  ;;  %v7806_v33 = vcombine.high %v979_v27, %v983_v28  ;;  %v986_v34 = vld [vmem:[%s8955_s20 + $0x1250] sm:$0xff]  ;;  %v1035_v25 = vld [vmem:[%s8955_s20 + $0x13d8] sm:$0xff] }
 0x36d   : > { %6546 = vmatprep.mubr.bf16.mxu0 %v9327_v40  ;;  %6833 = vmatprep.mubr.bf16.mxu1 %v9327_v40  ;;  %v7765_v40 = vcombine.low %v939_v48, %v943_v49  ;;  %v999_v48 = vld [vmem:[%s8955_s20 + $0x12b8] sm:$0xff]  ;;  %v7811_v49 = vcombine.low %v986_v34, %v990_v0 }
 0x36f   : > { %6517 = vmatpush1.bf16.msra.mxu0 %v7747_v39  ;;  %6804 = vmatpush1.bf16.msra.mxu1 %v7749_v41  ;;  %v7805_v39 = vcombine.low %v979_v27, %v983_v28  ;;  %v7812_v41 = vcombine.high %v986_v34, %v990_v0  ;;  %v1039_v27 = vld [vmem:[%s8955_s20 + $0x13f8] sm:$0xff]  ;;  %v1046_v34 = vld [vmem:[%s8955_s20 + $0x1430] sm:$0xff] }
 0x370   : > { %6518 = vmatprep.subr.bf16.mxu0 %v7756_v43  ;;  %6805 = vmatprep.subr.bf16.mxu1 %v7758_v44  ;;  %v7814_v43 = vcombine.high %v987_v36, %v991_v37  ;;  %v994_v44 = vld [vmem:[%s8955_s20 + $0x1290] sm:$0xff]  ;;  %v1043_v0 = vld [vmem:[%s8955_s20 + $0x1418] sm:$0xff] }
 0x371   : > { %v7819_v55 = vcombine.low %v994_v44, %v998_v46 }
 0x373   : > { %6519 = vmatpush1.bf16.msra.mxu0 %v7755_v30  ;;  %6806 = vmatpush1.bf16.msra.mxu1 %v7757_v42  ;;  %v7813_v30 = vcombine.low %v987_v36, %v991_v37  ;;  %v7820_v42 = vcombine.high %v994_v44, %v998_v46  ;;  %v1047_v36 = vld [vmem:[%s8955_s20 + $0x1438] sm:$0xff]  ;;  %v1054_v44 = vld [vmem:[%s8955_s20 + $0x1470] sm:$0xff] }
 0x374   : > { %6520 = vmatprep.subr.bf16.mxu0 %v7764_v50  ;;  %6807 = vmatprep.subr.bf16.mxu1 %v7766_v53  ;;  %v7822_v50 = vcombine.high %v995_v47, %v999_v48  ;;  %v1002_v53 = vld [vmem:[%s8955_s20 + $0x12d0] sm:$0xff]  ;;  %v1051_v46 = vld [vmem:[%s8955_s20 + $0x1458] sm:$0xff] }
 0x375   : > { %v7827_v62 = vcombine.low %v1002_v53, %v1006_v17 }
 0x377   : > { %6521 = vmatpush1.bf16.msra.mxu0 %v7763_v24  ;;  %6808 = vmatpush1.bf16.msra.mxu1 %v7765_v40  ;;  %v7821_v24 = vcombine.low %v995_v47, %v999_v48  ;;  %v7828_v40 = vcombine.high %v1002_v53, %v1006_v17  ;;  %v1055_v47 = vld [vmem:[%s8955_s20 + $0x1478] sm:$0xff]  ;;  %v1062_v53 = vld [vmem:[%s8955_s20 + $0x14b0] sm:$0xff] }
 0x378   : > { %6522 = vmatprep.subr.bf16.mxu0 %v7772_v57  ;;  %6809 = vmatprep.subr.bf16.mxu1 %v7774_v52  ;;  %v7830_v57 = vcombine.high %v1003_v11, %v1007_v10  ;;  %v1010_v52 = vld [vmem:[%s8955_s20 + $0x1310] sm:$0xff]  ;;  %v1059_v17 = vld [vmem:[%s8955_s20 + $0x1498] sm:$0xff] }
 0x379   : > { %v7835_v9 = vcombine.low %v1010_v52, %v1014_v58 }
 0x37b   : > { %6523 = vmatpush1.bf16.msra.mxu0 %v7771_v63  ;;  %6810 = vmatpush1.bf16.msra.mxu1 %v7773_v2  ;;  %v7829_v63 = vcombine.low %v1003_v11, %v1007_v10  ;;  %v7836_v2 = vcombine.high %v1010_v52, %v1014_v58  ;;  %v1063_v11 = vld [vmem:[%s8955_s20 + $0x14b8] sm:$0xff]  ;;  %v1070_v52 = vld [vmem:[%s8955_s20 + $0x14f0] sm:$0xff] }
 0x37c   : > { %6524 = vmatprep.subr.bf16.mxu0 %v7780_v4  ;;  %6811 = vmatprep.subr.bf16.mxu1 %v7782_v5  ;;  %v7838_v4 = vcombine.high %v1011_v59, %v1015_v61  ;;  %v1018_v5 = vld [vmem:[%s8955_s20 + $0x1350] sm:$0xff]  ;;  %v1067_v58 = vld [vmem:[%s8955_s20 + $0x14d8] sm:$0xff] }
 0x37d   : > { %v7843_v60 = vcombine.low %v1018_v5, %v1022_v6 }
 0x37f   : > { %6525 = vmatpush1.bf16.msra.mxu0 %v7779_v3  ;;  %6812 = vmatpush1.bf16.msra.mxu1 %v7781_v12  ;;  %v7837_v3 = vcombine.low %v1011_v59, %v1015_v61  ;;  %v7844_v12 = vcombine.high %v1018_v5, %v1022_v6  ;;  %v1071_v59 = vld [vmem:[%s8955_s20 + $0x14f8] sm:$0xff]  ;;  %v7885_v61 = vcombine.low %v1059_v17, %v1063_v11 }
 0x380   : > { %6526 = vmatprep.subr.bf16.mxu0 %v7788_v18  ;;  %6813 = vmatprep.subr.bf16.mxu1 %v7790_v14  ;;  %v7846_v18 = vcombine.high %v1019_v7, %v1023_v8  ;;  %v1026_v14 = vld [vmem:[%s8955_s20 + $0x1390] sm:$0xff]  ;;  %v1075_v5 = vld [vmem:[%s8955_s20 + $0x1518] sm:$0xff] }
 0x381   : > { %v7851_v28 = vcombine.low %v1026_v14, %v1030_v15  ;;  %v1079_v6 = vld [vmem:[%s8955_s20 + $0x1538] sm:$0xff] }
 0x383   : > { %6527 = vmatpush1.bf16.msra.mxu0 %v7787_v20  ;;  %6814 = vmatpush1.bf16.msra.mxu1 %v7789_v13  ;;  %v7845_v20 = vcombine.low %v1019_v7, %v1023_v8  ;;  %v7852_v13 = vcombine.high %v1026_v14, %v1030_v15  ;;  %v1087_v14 = vld [vmem:[%s8955_s20 + $0x1578] sm:$0xff] }
 0x384   : > { %6528 = vmatprep.subr.bf16.mxu0 %v7796_v21  ;;  %6815 = vmatprep.subr.bf16.mxu1 %v7798_v22  ;;  %v7854_v21 = vcombine.high %v1027_v16, %v1031_v26  ;;  %v1034_v22 = vld [vmem:[%s8955_s20 + $0x13d0] sm:$0xff] }
 0x385   : > { %v7859_v37 = vcombine.low %v1034_v22, %v1038_v23 }
 0x387   : > { %6529 = vmatpush1.bf16.msra.mxu0 %v7795_v35  ;;  %6816 = vmatpush1.bf16.msra.mxu1 %v7797_v29  ;;  %v7853_v35 = vcombine.low %v1027_v16, %v1031_v26  ;;  %v7860_v29 = vcombine.high %v1034_v22, %v1038_v23  ;;  %v7901_v16 = vcombine.low %v1075_v5, %v1079_v6  ;;  %v1095_v22 = vld [vmem:[%s8955_s20 + $0x15b8] sm:$0xff] }
 0x388   : > { %6530 = vmatprep.subr.bf16.mxu0 %v7804_v31  ;;  %6817 = vmatprep.subr.bf16.mxu1 %v7806_v33  ;;  %v7862_v31 = vcombine.high %v1035_v25, %v1039_v27  ;;  %v1042_v33 = vld [vmem:[%s8955_s20 + $0x1410] sm:$0xff] }
 0x389   : > { %v7867_v48 = vcombine.low %v1042_v33, %v1046_v34 }
 0x38b   : > { %6531 = vmatpush1.bf16.msra.mxu0 %v7803_v38  ;;  %6818 = vmatpush1.bf16.msra.mxu1 %v7805_v39  ;;  %v7861_v38 = vcombine.low %v1035_v25, %v1039_v27  ;;  %v7868_v39 = vcombine.high %v1042_v33, %v1046_v34  ;;  %v1103_v33 = vld [vmem:[%s8955_s20 + $0x15f8] sm:$0xff] }
 0x38c   : > { %6532 = vmatprep.subr.bf16.mxu0 %v7812_v41  ;;  %6819 = vmatprep.subr.bf16.mxu1 %v7814_v43  ;;  %v7870_v41 = vcombine.high %v1043_v0, %v1047_v36  ;;  %v1050_v43 = vld [vmem:[%s8955_s20 + $0x1450] sm:$0xff] }
 0x38d   : > { %v7875_v10 = vcombine.low %v1050_v43, %v1054_v44 }
 0x38f   : > { %6533 = vmatpush1.bf16.msra.mxu0 %v7811_v49  ;;  %6820 = vmatpush1.bf16.msra.mxu1 %v7813_v30  ;;  %v7869_v49 = vcombine.low %v1043_v0, %v1047_v36  ;;  %v7876_v30 = vcombine.high %v1050_v43, %v1054_v44  ;;  %v1111_v43 = vld [vmem:[%s8955_s20 + $0x1638] sm:$0xff] }
 0x390   : > { %6534 = vmatprep.subr.bf16.mxu0 %v7820_v42  ;;  %6821 = vmatprep.subr.bf16.mxu1 %v7822_v50  ;;  %v7878_v42 = vcombine.high %v1051_v46, %v1055_v47  ;;  %v1058_v50 = vld [vmem:[%s8955_s20 + $0x1490] sm:$0xff] }
 0x393   : > { %6535 = vmatpush1.bf16.msra.mxu0 %v7819_v55  ;;  %6822 = vmatpush1.bf16.msra.mxu1 %v7821_v24  ;;  %v7877_v55 = vcombine.low %v1051_v46, %v1055_v47  ;;  %v7884_v24 = vcombine.high %v1058_v50, %v1062_v53 }
 0x394   : > { %6536 = vmatprep.subr.bf16.mxu0 %v7828_v40  ;;  %6823 = vmatprep.subr.bf16.mxu1 %v7830_v57  ;;  %v7886_v40 = vcombine.high %v1059_v17, %v1063_v11  ;;  %v1066_v57 = vld [vmem:[%s8955_s20 + $0x14d0] sm:$0xff] }
 0x395   : > { %v7891_v7 = vcombine.low %v1066_v57, %v1070_v52 }
 0x397   : > { %6537 = vmatpush1.bf16.msra.mxu0 %v7827_v62  ;;  %6824 = vmatpush1.bf16.msra.mxu1 %v7829_v63  ;;  %v7892_v62 = vcombine.high %v1066_v57, %v1070_v52  ;;  %v7894_v63 = vcombine.high %v1067_v58, %v1071_v59  ;;  %v1127_v57 = vld [vmem:[%s8955_s20 + $0x16b8] sm:$0xff] }
 0x398   : > { %6538 = vmatprep.subr.bf16.mxu0 %v7836_v2  ;;  %6825 = vmatprep.subr.bf16.mxu1 %v7838_v4  ;;  %v1074_v2 = vld [vmem:[%s8955_s20 + $0x1510] sm:$0xff] }
 0x399   : > { %v1078_v4 = vld [vmem:[%s8955_s20 + $0x1530] sm:$0xff] }
 0x39a   : > { %v7900_v8 = vcombine.high %v1074_v2, %v1078_v4  ;;  %v7899_v15 = vcombine.low %v1074_v2, %v1078_v4  ;;  %v1135_v2 = vld [vmem:[%s8955_s20 + $0x16f8] sm:$0xff] }
 0x39b   : > { %6539 = vmatpush1.bf16.msra.mxu0 %v7835_v9  ;;  %6826 = vmatpush1.bf16.msra.mxu1 %v7837_v3  ;;  %v7902_v9 = vcombine.high %v1075_v5, %v1079_v6  ;;  %v1082_v3 = vld [vmem:[%s8955_s20 + $0x1550] sm:$0xff] }
 0x39c   : > { %6540 = vmatprep.subr.bf16.mxu0 %v7844_v12  ;;  %6827 = vmatprep.subr.bf16.mxu1 %v7846_v18  ;;  %v1086_v12 = vld [vmem:[%s8955_s20 + $0x1570] sm:$0xff]  ;;  %v1083_v18 = vld [vmem:[%s8955_s20 + $0x1558] sm:$0xff] }
 0x39d   : > { %v7908_v26 = vcombine.high %v1082_v3, %v1086_v12  ;;  %v7907_v23 = vcombine.low %v1082_v3, %v1086_v12  ;;  %v7909_v25 = vcombine.low %v1083_v18, %v1087_v14  ;;  %v1143_v3 = vld [vmem:[%s8955_s20 + $0x1738] sm:$0xff] }
 0x39f   : > { %6541 = vmatpush1.bf16.msra.mxu0 %v7843_v60  ;;  %6828 = vmatpush1.bf16.msra.mxu1 %v7845_v20  ;;  %v7910_v60 = vcombine.high %v1083_v18, %v1087_v14  ;;  %v1090_v20 = vld [vmem:[%s8955_s20 + $0x1590] sm:$0xff] }
 0x3a0   : > { %6542 = vmatprep.subr.bf16.mxu0 %v7852_v13  ;;  %6829 = vmatprep.subr.bf16.mxu1 %v7854_v21  ;;  %v1094_v13 = vld [vmem:[%s8955_s20 + $0x15b0] sm:$0xff]  ;;  %v1091_v21 = vld [vmem:[%s8955_s20 + $0x1598] sm:$0xff] }
 0x3a1   : > { %v7916_v27 = vcombine.high %v1090_v20, %v1094_v13  ;;  %v7915_v34 = vcombine.low %v1090_v20, %v1094_v13  ;;  %v7917_v0 = vcombine.low %v1091_v21, %v1095_v22  ;;  %v1151_v20 = vld [vmem:[%s8955_s20 + $0x1778] sm:$0xff] }
 0x3a3   : > { %6543 = vmatpush1.bf16.msra.mxu0 %v7851_v28  ;;  %6830 = vmatpush1.bf16.msra.mxu1 %v7853_v35  ;;  %v7918_v28 = vcombine.high %v1091_v21, %v1095_v22  ;;  %v1098_v35 = vld [vmem:[%s8955_s20 + $0x15d0] sm:$0xff] }
 0x3a4   : > { %6544 = vmatprep.subr.bf16.mxu0 %v7860_v29  ;;  %6831 = vmatprep.subr.bf16.mxu1 %v7862_v31  ;;  %v1102_v29 = vld [vmem:[%s8955_s20 + $0x15f0] sm:$0xff]  ;;  %v1099_v31 = vld [vmem:[%s8955_s20 + $0x15d8] sm:$0xff] }
 0x3a5   : > { %v7924_v36 = vcombine.high %v1098_v35, %v1102_v29  ;;  %v7923_v44 = vcombine.low %v1098_v35, %v1102_v29  ;;  %v7925_v46 = vcombine.low %v1099_v31, %v1103_v33  ;;  %v1159_v35 = vld [vmem:[%s8955_s20 + $0x17b8] sm:$0xff] }
 0x3a7   : > { %6545 = vmatpush1.bf16.msra.mxu0 %v7859_v37  ;;  %6832 = vmatpush1.bf16.msra.mxu1 %v7861_v38  ;;  %v7926_v37 = vcombine.high %v1099_v31, %v1103_v33  ;;  %v1106_v38 = vld [vmem:[%s8955_s20 + $0x1610] sm:$0xff] }
 0x3a8   : > { %6555 = vmatprep.subr.bf16.mxu0 %v7868_v39  ;;  %6842 = vmatprep.subr.bf16.mxu1 %v7870_v41  ;;  %v1110_v39 = vld [vmem:[%s8955_s20 + $0x1630] sm:$0xff]  ;;  %v1107_v41 = vld [vmem:[%s8955_s20 + $0x1618] sm:$0xff] }
 0x3a9   : > { %v7932_v47 = vcombine.high %v1106_v38, %v1110_v39  ;;  %v7933_v17 = vcombine.low %v1107_v41, %v1111_v43 }
 0x3aa   : > { %6547 = vmatmul.mubr.bf16.vlgmr.msra.gmra.mrb[4].mxu0 %v9402_v1  ;;  %6834 = vmatmul.mubr.bf16.vlgmr.msra.gmra.mrb[4].mxu1 %v9402_v1  ;;  %v7883_v1 = vcombine.low %v1058_v50, %v1062_v53  ;;  %v1119_v50 = vld [vmem:[%s8955_s20 + $0x1678] sm:$0xff]  ;;  %v7931_v53 = vcombine.low %v1106_v38, %v1110_v39 }
 0x3ab   : > { %6556 = vmatpush1.bf16.msra.mxu0 %v7867_v48  ;;  %6843 = vmatpush1.bf16.msra.mxu1 %v7869_v49  ;;  %v7934_v48 = vcombine.high %v1107_v41, %v1111_v43  ;;  %v1114_v49 = vld [vmem:[%s8955_s20 + $0x1650] sm:$0xff]  ;;  %v1167_v38 = vld [vmem:[%s8955_s20 + $0x17f8] sm:$0xff] }
 0x3ac   : > { %6557 = vmatprep.subr.bf16.mxu0 %v7876_v30  ;;  %6844 = vmatprep.subr.bf16.mxu1 %v7878_v42  ;;  %v1118_v30 = vld [vmem:[%s8955_s20 + $0x1670] sm:$0xff]  ;;  %v1115_v42 = vld [vmem:[%s8955_s20 + $0x1658] sm:$0xff] }
 0x3ad   : > { %6587 = vmatprep.mubr.bf16.mxu0 %v9408_v32  ;;  %6874 = vmatprep.mubr.bf16.mxu1 %v9408_v32  ;;  %v7893_v32 = vcombine.low %v1067_v58, %v1071_v59  ;;  %v7940_v11 = vcombine.high %v1114_v49, %v1118_v30  ;;  %v7939_v52 = vcombine.low %v1114_v49, %v1118_v30  ;;  %v1175_v49 = vld [vmem:[%s8955_s20 + $0x1838] sm:$0xff] }
 0x3ae   : > { %v7941_v58 = vcombine.low %v1115_v42, %v1119_v50 }
 0x3af   : > { %6558 = vmatpush1.bf16.msra.mxu0 %v7875_v10  ;;  %6845 = vmatpush1.bf16.msra.mxu1 %v7877_v55  ;;  %v7942_v10 = vcombine.high %v1115_v42, %v1119_v50  ;;  %v1122_v55 = vld [vmem:[%s8955_s20 + $0x1690] sm:$0xff] }
 0x3b0   : > { %6559 = vmatprep.subr.bf16.mxu0 %v7884_v24  ;;  %6846 = vmatprep.subr.bf16.mxu1 %v7886_v40  ;;  %v1126_v24 = vld [vmem:[%s8955_s20 + $0x16b0] sm:$0xff]  ;;  %v1123_v40 = vld [vmem:[%s8955_s20 + $0x1698] sm:$0xff] }
 0x3b1   : > { %v7948_v59 = vcombine.high %v1122_v55, %v1126_v24  ;;  %v7947_v4 = vcombine.low %v1122_v55, %v1126_v24  ;;  %v7949_v5 = vcombine.low %v1123_v40, %v1127_v57  ;;  %v1183_v55 = vld [vmem:[%s8955_s20 + $0x1878] sm:$0xff] }
 0x3b3   : > { %6560 = vmatpush1.bf16.msra.mxu0 %v7883_v1  ;;  %6847 = vmatpush1.bf16.msra.mxu1 %v7885_v61  ;;  %v7950_v1 = vcombine.high %v1123_v40, %v1127_v57  ;;  %v1130_v61 = vld [vmem:[%s8955_s20 + $0x16d0] sm:$0xff] }
 0x3b4   : > { %6561 = vmatprep.subr.bf16.mxu0 %v7892_v62  ;;  %6848 = vmatprep.subr.bf16.mxu1 %v7894_v63  ;;  %v1134_v62 = vld [vmem:[%s8955_s20 + $0x16f0] sm:$0xff]  ;;  %v1131_v63 = vld [vmem:[%s8955_s20 + $0x16d8] sm:$0xff] }
 0x3b5   : > { %v7956_v6 = vcombine.high %v1130_v61, %v1134_v62  ;;  %v7955_v12 = vcombine.low %v1130_v61, %v1134_v62  ;;  %v7957_v18 = vcombine.low %v1131_v63, %v1135_v2  ;;  %v1191_v61 = vld [vmem:[%s8955_s20 + $0x18b8] sm:$0xff] }
 0x3b7   : > { %6562 = vmatpush1.bf16.msra.mxu0 %v7891_v7  ;;  %6849 = vmatpush1.bf16.msra.mxu1 %v7893_v32  ;;  %v7958_v7 = vcombine.high %v1131_v63, %v1135_v2  ;;  %v1138_v32 = vld [vmem:[%s8955_s20 + $0x1710] sm:$0xff] }
 0x3b8   : > { %6563 = vmatprep.subr.bf16.mxu0 %v7900_v8  ;;  %6850 = vmatprep.subr.bf16.mxu1 %v7902_v9  ;;  %v1142_v8 = vld [vmem:[%s8955_s20 + $0x1730] sm:$0xff]  ;;  %v1139_v9 = vld [vmem:[%s8955_s20 + $0x1718] sm:$0xff] }
 0x3b9   : > { %v7964_v14 = vcombine.high %v1138_v32, %v1142_v8  ;;  %v7963_v13 = vcombine.low %v1138_v32, %v1142_v8  ;;  %v7965_v21 = vcombine.low %v1139_v9, %v1143_v3  ;;  %v1199_v32 = vld [vmem:[%s8955_s20 + $0x18f8] sm:$0xff] }
 0x3bb   : > { %6564 = vmatpush1.bf16.msra.mxu0 %v7899_v15  ;;  %6851 = vmatpush1.bf16.msra.mxu1 %v7901_v16  ;;  %v7966_v15 = vcombine.high %v1139_v9, %v1143_v3  ;;  %v1146_v16 = vld [vmem:[%s8955_s20 + $0x1750] sm:$0xff] }
 0x3bc   : > { %6565 = vmatprep.subr.bf16.mxu0 %v7908_v26  ;;  %6852 = vmatprep.subr.bf16.mxu1 %v7910_v60  ;;  %v1150_v26 = vld [vmem:[%s8955_s20 + $0x1770] sm:$0xff]  ;;  %v1147_v60 = vld [vmem:[%s8955_s20 + $0x1758] sm:$0xff] }
 0x3bd   : > { %v7972_v22 = vcombine.high %v1146_v16, %v1150_v26  ;;  %v7971_v29 = vcombine.low %v1146_v16, %v1150_v26  ;;  %v7973_v31 = vcombine.low %v1147_v60, %v1151_v20 }
 0x3bf   : > { %6566 = vmatpush1.bf16.msra.mxu0 %v7907_v23  ;;  %6853 = vmatpush1.bf16.msra.mxu1 %v7909_v25  ;;  %v7974_v23 = vcombine.high %v1147_v60, %v1151_v20  ;;  %v1154_v25 = vld [vmem:[%s8955_s20 + $0x1790] sm:$0xff] }
 0x3c0   : > { %6567 = vmatprep.subr.bf16.mxu0 %v7916_v27  ;;  %6854 = vmatprep.subr.bf16.mxu1 %v7918_v28  ;;  %v1158_v27 = vld [vmem:[%s8955_s20 + $0x17b0] sm:$0xff]  ;;  %v1155_v28 = vld [vmem:[%s8955_s20 + $0x1798] sm:$0xff] }
 0x3c1   : > { %v7980_v33 = vcombine.high %v1154_v25, %v1158_v27  ;;  %v7979_v39 = vcombine.low %v1154_v25, %v1158_v27  ;;  %v7981_v41 = vcombine.low %v1155_v28, %v1159_v35  ;;  %v1210_v20 = vld [vmem:[%s8955_s20 + $0x1950] sm:$0xff] }
 0x3c3   : > { %6568 = vmatpush1.bf16.msra.mxu0 %v7915_v34  ;;  %6855 = vmatpush1.bf16.msra.mxu1 %v7917_v0  ;;  %v7982_v34 = vcombine.high %v1155_v28, %v1159_v35  ;;  %v1162_v0 = vld [vmem:[%s8955_s20 + $0x17d0] sm:$0xff] }
 0x3c4   : > { %6569 = vmatprep.subr.bf16.mxu0 %v7924_v36  ;;  %6856 = vmatprep.subr.bf16.mxu1 %v7926_v37  ;;  %v1166_v36 = vld [vmem:[%s8955_s20 + $0x17f0] sm:$0xff]  ;;  %v1163_v37 = vld [vmem:[%s8955_s20 + $0x17d8] sm:$0xff] }
 0x3c5   : > { %v7988_v43 = vcombine.high %v1162_v0, %v1166_v36  ;;  %v7987_v30 = vcombine.low %v1162_v0, %v1166_v36  ;;  %v7989_v42 = vcombine.low %v1163_v37, %v1167_v38  ;;  %v1218_v35 = vld [vmem:[%s8955_s20 + $0x1990] sm:$0xff] }
 0x3c7   : > { %6570 = vmatpush1.bf16.msra.mxu0 %v7923_v44  ;;  %6857 = vmatpush1.bf16.msra.mxu1 %v7925_v46  ;;  %v7990_v44 = vcombine.high %v1163_v37, %v1167_v38  ;;  %v1170_v46 = vld [vmem:[%s8955_s20 + $0x1810] sm:$0xff] }
 0x3c8   : > { %6571 = vmatprep.subr.bf16.mxu0 %v7932_v47  ;;  %6858 = vmatprep.subr.bf16.mxu1 %v7934_v48  ;;  %v1174_v47 = vld [vmem:[%s8955_s20 + $0x1830] sm:$0xff]  ;;  %v1171_v48 = vld [vmem:[%s8955_s20 + $0x1818] sm:$0xff] }
 0x3c9   : > { %v7996_v50 = vcombine.high %v1170_v46, %v1174_v47  ;;  %v7995_v24 = vcombine.low %v1170_v46, %v1174_v47  ;;  %v7997_v40 = vcombine.low %v1171_v48, %v1175_v49  ;;  %v1226_v38 = vld [vmem:[%s8955_s20 + $0x19d0] sm:$0xff] }
 0x3cb   : > { %6572 = vmatpush1.bf16.msra.mxu0 %v7931_v53  ;;  %6859 = vmatpush1.bf16.msra.mxu1 %v7933_v17  ;;  %v7998_v53 = vcombine.high %v1171_v48, %v1175_v49  ;;  %v1178_v17 = vld [vmem:[%s8955_s20 + $0x1850] sm:$0xff] }
 0x3cc   : > { %6573 = vmatprep.subr.bf16.mxu0 %v7940_v11  ;;  %6860 = vmatprep.subr.bf16.mxu1 %v7942_v10  ;;  %v1182_v11 = vld [vmem:[%s8955_s20 + $0x1870] sm:$0xff]  ;;  %v1179_v10 = vld [vmem:[%s8955_s20 + $0x1858] sm:$0xff] }
 0x3cd   : > { %v8004_v57 = vcombine.high %v1178_v17, %v1182_v11  ;;  %v8003_v62 = vcombine.low %v1178_v17, %v1182_v11  ;;  %v8005_v63 = vcombine.low %v1179_v10, %v1183_v55  ;;  %v1234_v49 = vld [vmem:[%s8955_s20 + $0x1a10] sm:$0xff] }
 0x3cf   : > { %6574 = vmatpush1.bf16.msra.mxu0 %v7939_v52  ;;  %6861 = vmatpush1.bf16.msra.mxu1 %v7941_v58  ;;  %v8006_v52 = vcombine.high %v1179_v10, %v1183_v55  ;;  %v1186_v58 = vld [vmem:[%s8955_s20 + $0x1890] sm:$0xff] }
 0x3d0   : > { %6575 = vmatprep.subr.bf16.mxu0 %v7948_v59  ;;  %6862 = vmatprep.subr.bf16.mxu1 %v7950_v1  ;;  %v1190_v59 = vld [vmem:[%s8955_s20 + $0x18b0] sm:$0xff]  ;;  %v1187_v1 = vld [vmem:[%s8955_s20 + $0x1898] sm:$0xff] }
 0x3d1   : > { %v8012_v2 = vcombine.high %v1186_v58, %v1190_v59  ;;  %v8013_v8 = vcombine.low %v1187_v1, %v1191_v61  ;;  %v1242_v55 = vld [vmem:[%s8955_s20 + $0x1a50] sm:$0xff] }
 0x3d3   : > { %6576 = vmatpush1.bf16.msra.mxu0 %v7947_v4  ;;  %6863 = vmatpush1.bf16.msra.mxu1 %v7949_v5  ;;  %v8014_v4 = vcombine.high %v1187_v1, %v1191_v61  ;;  %v1194_v5 = vld [vmem:[%s8955_s20 + $0x18d0] sm:$0xff] }
 0x3d4   : > { %6577 = vmatprep.subr.bf16.mxu0 %v7956_v6  ;;  %6864 = vmatprep.subr.bf16.mxu1 %v7958_v7  ;;  %v1198_v6 = vld [vmem:[%s8955_s20 + $0x18f0] sm:$0xff]  ;;  %v1195_v7 = vld [vmem:[%s8955_s20 + $0x18d8] sm:$0xff] }
 0x3d5   : > { %v8020_v9 = vcombine.high %v1194_v5, %v1198_v6  ;;  %v8022_v3 = vcombine.high %v1195_v7, %v1199_v32  ;;  %v8019_v16 = vcombine.low %v1194_v5, %v1198_v6  ;;  %v1250_v61 = vld [vmem:[%s8955_s20 + $0x1a90] sm:$0xff] }
 0x3d7   : > { %6578 = vmatpush1.bf16.msra.mxu0 %v7955_v12  ;;  %6865 = vmatpush1.bf16.msra.mxu1 %v7957_v18  ;;  %v1202_v12 = vld [vmem:[%s8955_s20 + $0x1910] sm:$0xff] }
 0x3d8   : > { %6579 = vmatprep.subr.bf16.mxu0 %v7964_v14  ;;  %6866 = vmatprep.subr.bf16.mxu1 %v7966_v15  ;;  %v1206_v18 = vld [vmem:[%s8955_s20 + $0x1930] sm:$0xff]  ;;  %v1203_v14 = vld [vmem:[%s8955_s20 + $0x1918] sm:$0xff] }
 0x3d9   : > { %v1207_v15 = vld [vmem:[%s8955_s20 + $0x1938] sm:$0xff]  ;;  %v8028_v26 = vcombine.high %v1202_v12, %v1206_v18 }
 0x3da   : > { %v8030_v60 = vcombine.high %v1203_v14, %v1207_v15  ;;  %v8029_v25 = vcombine.low %v1203_v14, %v1207_v15  ;;  %v1266_v15 = vld [vmem:[%s8955_s20 + $0x1b10] sm:$0xff] }
 0x3db   : > { %6580 = vmatpush1.bf16.msra.mxu0 %v7963_v13  ;;  %6867 = vmatpush1.bf16.msra.mxu1 %v7965_v21  ;;  %v1214_v13 = vld [vmem:[%s8955_s20 + $0x1970] sm:$0xff]  ;;  %v1211_v21 = vld [vmem:[%s8955_s20 + $0x1958] sm:$0xff] }
 0x3dc   : > { %6581 = vmatprep.subr.bf16.mxu0 %v7972_v22  ;;  %6868 = vmatprep.subr.bf16.mxu1 %v7974_v23  ;;  %v1215_v22 = vld [vmem:[%s8955_s20 + $0x1978] sm:$0xff]  ;;  %v8027_v23 = vcombine.low %v1202_v12, %v1206_v18  ;;  %v8036_v27 = vcombine.high %v1210_v20, %v1214_v13 }
 0x3dd   : > { %v8038_v28 = vcombine.high %v1211_v21, %v1215_v22  ;;  %v8037_v0 = vcombine.low %v1211_v21, %v1215_v22  ;;  %v1274_v22 = vld [vmem:[%s8955_s20 + $0x1b50] sm:$0xff] }
 0x3df   : > { %6582 = vmatpush1.bf16.msra.mxu0 %v7971_v29  ;;  %6869 = vmatpush1.bf16.msra.mxu1 %v7973_v31  ;;  %v1222_v29 = vld [vmem:[%s8955_s20 + $0x19b0] sm:$0xff]  ;;  %v1219_v31 = vld [vmem:[%s8955_s20 + $0x1998] sm:$0xff] }
 0x3e0   : > { %6583 = vmatprep.subr.bf16.mxu0 %v7980_v33  ;;  %6870 = vmatprep.subr.bf16.mxu1 %v7982_v34  ;;  %v1223_v33 = vld [vmem:[%s8955_s20 + $0x19b8] sm:$0xff]  ;;  %v8035_v34 = vcombine.low %v1210_v20, %v1214_v13  ;;  %v8044_v36 = vcombine.high %v1218_v35, %v1222_v29 }
 0x3e1   : > { %v8046_v37 = vcombine.high %v1219_v31, %v1223_v33  ;;  %v8045_v46 = vcombine.low %v1219_v31, %v1223_v33  ;;  %v1282_v33 = vld [vmem:[%s8955_s20 + $0x1b90] sm:$0xff] }
 0x3e3   : > { %6584 = vmatpush1.bf16.msra.mxu0 %v7979_v39  ;;  %6871 = vmatpush1.bf16.msra.mxu1 %v7981_v41  ;;  %v1230_v39 = vld [vmem:[%s8955_s20 + $0x19f0] sm:$0xff]  ;;  %v1227_v41 = vld [vmem:[%s8955_s20 + $0x19d8] sm:$0xff] }
 0x3e4   : > { %6585 = vmatprep.subr.bf16.mxu0 %v7988_v43  ;;  %6872 = vmatprep.subr.bf16.mxu1 %v7990_v44  ;;  %v1231_v43 = vld [vmem:[%s8955_s20 + $0x19f8] sm:$0xff]  ;;  %v8043_v44 = vcombine.low %v1218_v35, %v1222_v29  ;;  %v8052_v47 = vcombine.high %v1226_v38, %v1230_v39 }
 0x3e5   : > { %v8054_v48 = vcombine.high %v1227_v41, %v1231_v43  ;;  %v8053_v17 = vcombine.low %v1227_v41, %v1231_v43  ;;  %v1290_v43 = vld [vmem:[%s8955_s20 + $0x1bd0] sm:$0xff] }
 0x3e7   : > { %6586 = vmatpush1.bf16.msra.mxu0 %v7987_v30  ;;  %6873 = vmatpush1.bf16.msra.mxu1 %v7989_v42  ;;  %v1238_v30 = vld [vmem:[%s8955_s20 + $0x1a30] sm:$0xff]  ;;  %v1235_v42 = vld [vmem:[%s8955_s20 + $0x1a18] sm:$0xff] }
 0x3e8   : > { %6596 = vmatprep.subr.bf16.mxu0 %v7996_v50  ;;  %6883 = vmatprep.subr.bf16.mxu1 %v7998_v53  ;;  %v1239_v50 = vld [vmem:[%s8955_s20 + $0x1a38] sm:$0xff]  ;;  %v8051_v53 = vcombine.low %v1226_v38, %v1230_v39  ;;  %v8060_v11 = vcombine.high %v1234_v49, %v1238_v30 }
 0x3e9   : > { %v8062_v10 = vcombine.high %v1235_v42, %v1239_v50 }
 0x3ea   : > { %6588 = vmatmul.mubr.bf16.vlgmr.msra.gmra.mrb[4].mxu0 %v9481_v56  ;;  %6875 = vmatmul.mubr.bf16.vlgmr.msra.gmra.mrb[4].mxu1 %v9481_v56  ;;  %v8011_v56 = vcombine.low %v1186_v58, %v1190_v59  ;;  %v8061_v58 = vcombine.low %v1235_v42, %v1239_v50 }
 0x3eb   : > { %6597 = vmatpush1.bf16.msra.mxu0 %v7995_v24  ;;  %6884 = vmatpush1.bf16.msra.mxu1 %v7997_v40  ;;  %v1246_v24 = vld [vmem:[%s8955_s20 + $0x1a70] sm:$0xff]  ;;  %v1243_v40 = vld [vmem:[%s8955_s20 + $0x1a58] sm:$0xff] }
 0x3ec   : > { %6598 = vmatprep.subr.bf16.mxu0 %v8004_v57  ;;  %6885 = vmatprep.subr.bf16.mxu1 %v8006_v52  ;;  %v1247_v57 = vld [vmem:[%s8955_s20 + $0x1a78] sm:$0xff]  ;;  %v8059_v52 = vcombine.low %v1234_v49, %v1238_v30  ;;  %v8068_v59 = vcombine.high %v1242_v55, %v1246_v24 }
 0x3ed   : > { %6628 = vmatprep.mubr.bf16.mxu0 %v9487_v51  ;;  %6915 = vmatprep.mubr.bf16.mxu1 %v9487_v51  ;;  %v8021_v51 = vcombine.low %v1195_v7, %v1199_v32  ;;  %v8070_v1 = vcombine.high %v1243_v40, %v1247_v57  ;;  %v8069_v5 = vcombine.low %v1243_v40, %v1247_v57  ;;  %v1258_v32 = vld [vmem:[%s8955_s20 + $0x1ad0] sm:$0xff] }
 0x3ef   : > { %6599 = vmatpush1.bf16.msra.mxu0 %v8003_v62  ;;  %6886 = vmatpush1.bf16.msra.mxu1 %v8005_v63  ;;  %v1254_v62 = vld [vmem:[%s8955_s20 + $0x1ab0] sm:$0xff]  ;;  %v1251_v63 = vld [vmem:[%s8955_s20 + $0x1a98] sm:$0xff] }
 0x3f0   : > { %6600 = vmatprep.subr.bf16.mxu0 %v8012_v2  ;;  %6887 = vmatprep.subr.bf16.mxu1 %v8014_v4  ;;  %v1255_v2 = vld [vmem:[%s8955_s20 + $0x1ab8] sm:$0xff]  ;;  %v8067_v4 = vcombine.low %v1242_v55, %v1246_v24  ;;  %v8076_v6 = vcombine.high %v1250_v61, %v1254_v62 }
 0x3f1   : > { %v8078_v7 = vcombine.high %v1251_v63, %v1255_v2  ;;  %v8077_v12 = vcombine.low %v1251_v63, %v1255_v2 }
 0x3f3   : > { %6601 = vmatpush1.bf16.msra.mxu0 %v8011_v56  ;;  %6888 = vmatpush1.bf16.msra.mxu1 %v8013_v8  ;;  %v1262_v56 = vld [vmem:[%s8955_s20 + $0x1af0] sm:$0xff]  ;;  %v1259_v8 = vld [vmem:[%s8955_s20 + $0x1ad8] sm:$0xff] }
 0x3f4   : > { %6602 = vmatprep.subr.bf16.mxu0 %v8020_v9  ;;  %6889 = vmatprep.subr.bf16.mxu1 %v8022_v3  ;;  %v1263_v9 = vld [vmem:[%s8955_s20 + $0x1af8] sm:$0xff]  ;;  %v8075_v3 = vcombine.low %v1250_v61, %v1254_v62  ;;  %v8084_v18 = vcombine.high %v1258_v32, %v1262_v56 }
 0x3f5   : > { %v8086_v14 = vcombine.high %v1259_v8, %v1263_v9  ;;  %v8085_v20 = vcombine.low %v1259_v8, %v1263_v9  ;;  %v304_v62 = vld [vmem:[%s8972_s18 + $0x8] sm:$0xff]  ;;  %v7006_v8 = vsub.s32 (!%p8119_p9), 6, %v8999_v45  ;;  %v7010_v9 = vsub.s32 (!%p8119_p9), 7, %v8999_v45 }
 0x3f7   : > { %6603 = vmatpush1.bf16.msra.mxu0 %v8019_v16  ;;  %6890 = vmatpush1.bf16.msra.mxu1 %v8021_v51  ;;  %v1270_v16 = vld [vmem:[%s8955_s20 + $0x1b30] sm:$0xff]  ;;  %v1267_v51 = vld [vmem:[%s8955_s20 + $0x1b18] sm:$0xff] }
 0x3f8   : > { %6604 = vmatprep.subr.bf16.mxu0 %v8028_v26  ;;  %6891 = vmatprep.subr.bf16.mxu1 %v8030_v60  ;;  %v1271_v26 = vld [vmem:[%s8955_s20 + $0x1b38] sm:$0xff]  ;;  %v8083_v60 = vcombine.low %v1258_v32, %v1262_v56  ;;  %v8092_v13 = vcombine.high %v1266_v15, %v1270_v16  ;;  %v6998_v32 = vsub.s32 (!%p8119_p9), 4, %v8999_v45  ;;  %v7002_v56 = vsub.s32 (!%p8119_p9), 5, %v8999_v45 }
 0x3f9   : > { %v8094_v21 = vcombine.high %v1267_v51, %v1271_v26  ;;  %v8093_v35 = vcombine.low %v1267_v51, %v1271_v26 }
 0x3fb   : > { %6605 = vmatpush1.bf16.msra.mxu0 %v8027_v23  ;;  %6892 = vmatpush1.bf16.msra.mxu1 %v8029_v25  ;;  %v1278_v23 = vld [vmem:[%s8955_s20 + $0x1b70] sm:$0xff]  ;;  %v1275_v25 = vld [vmem:[%s8955_s20 + $0x1b58] sm:$0xff] }
 0x3fc   : > { %6606 = vmatprep.subr.bf16.mxu0 %v8036_v27  ;;  %6893 = vmatprep.subr.bf16.mxu1 %v8038_v28  ;;  %v1279_v27 = vld [vmem:[%s8955_s20 + $0x1b78] sm:$0xff]  ;;  %v8091_v28 = vcombine.low %v1266_v15, %v1270_v16  ;;  %v8100_v29 = vcombine.high %v1274_v22, %v1278_v23 }
 0x3fd   : > { %v8102_v31 = vcombine.high %v1275_v25, %v1279_v27  ;;  %v8101_v38 = vcombine.low %v1275_v25, %v1279_v27 }
 0x3ff   : > { %6607 = vmatpush1.bf16.msra.mxu0 %v8035_v34  ;;  %6894 = vmatpush1.bf16.msra.mxu1 %v8037_v0  ;;  %v1286_v34 = vld [vmem:[%s8955_s20 + $0x1bb0] sm:$0xff]  ;;  %v1283_v0 = vld [vmem:[%s8955_s20 + $0x1b98] sm:$0xff] }
 0x400   : > { %6608 = vmatprep.subr.bf16.mxu0 %v8044_v36  ;;  %6895 = vmatprep.subr.bf16.mxu1 %v8046_v37  ;;  %v1287_v36 = vld [vmem:[%s8955_s20 + $0x1bb8] sm:$0xff]  ;;  %v8099_v37 = vcombine.low %v1274_v22, %v1278_v23  ;;  %v8108_v39 = vcombine.high %v1282_v33, %v1286_v34 }
 0x401   : > { %v8110_v41 = vcombine.high %v1283_v0, %v1287_v36  ;;  %v8109_v49 = vcombine.low %v1283_v0, %v1287_v36 }
 0x403   : > { %6609 = vmatpush1.bf16.msra.mxu0 %v8043_v44  ;;  %6896 = vmatpush1.bf16.msra.mxu1 %v8045_v46  ;;  %v1294_v44 = vld [vmem:[%s8955_s20 + $0x1bf0] sm:$0xff]  ;;  %v1291_v46 = vld [vmem:[%s8955_s20 + $0x1bd8] sm:$0xff] }
 0x404   : > { %6610 = vmatprep.subr.bf16.mxu0 %v8052_v47  ;;  %6897 = vmatprep.subr.bf16.mxu1 %v8054_v48  ;;  %v1295_v47 = vld [vmem:[%s8955_s20 + $0x1bf8] sm:$0xff]  ;;  %v8107_v48 = vcombine.low %v1282_v33, %v1286_v34  ;;  %v8116_v30 = vcombine.high %v1290_v43, %v1294_v44  ;;  %v8115_v50 = vcombine.low %v1290_v43, %v1294_v44 }
 0x405   : > { %v8118_v42 = vcombine.high %v1291_v46, %v1295_v47 }
 0x407   : > { %6611 = vmatpush1.bf16.msra.mxu0 %v8051_v53  ;;  %6898 = vmatpush1.bf16.msra.mxu1 %v8053_v17  ;;  %v8117_v53 = vcombine.low %v1291_v46, %v1295_v47 }
 0x408   : > { %6612 = vmatprep.subr.bf16.mxu0 %v8060_v11  ;;  %6899 = vmatprep.subr.bf16.mxu1 %v8062_v10 }
 0x40b   : > { %6613 = vmatpush1.bf16.msra.mxu0 %v8059_v52  ;;  %6900 = vmatpush1.bf16.msra.mxu1 %v8061_v58 }
 0x40c   : > { %6614 = vmatprep.subr.bf16.mxu0 %v8068_v59  ;;  %6901 = vmatprep.subr.bf16.mxu1 %v8070_v1 }
 0x40f   : > { %6615 = vmatpush1.bf16.msra.mxu0 %v8067_v4  ;;  %6902 = vmatpush1.bf16.msra.mxu1 %v8069_v5  ;;  %v6982_v4 = vsub.s32 (!%p8119_p9), 0, %v8999_v45  ;;  %v6986_v5 = vsub.s32 (!%p8119_p9), 1, %v8999_v45 }
 0x410   : > { %6616 = vmatprep.subr.bf16.mxu0 %v8076_v6  ;;  %6903 = vmatprep.subr.bf16.mxu1 %v8078_v7  ;;  %v6990_v6 = vsub.s32 (!%p8119_p9), 2, %v8999_v45  ;;  %v6994_v7 = vsub.s32 (!%p8119_p9), 3, %v8999_v45  ;;  %v6976_v45 = vld [vmem:[%s8972_s18] sm:$0xff] (!%p8119_p9) }
 0x413   : > { %6617 = vmatpush1.bf16.msra.mxu0 %v8075_v3  ;;  %6904 = vmatpush1.bf16.msra.mxu1 %v8077_v12 }
 0x414   : > { %6618 = vmatprep.subr.bf16.mxu0 %v8084_v18  ;;  %6905 = vmatprep.subr.bf16.mxu1 %v8086_v14 }
 0x417   : > { %6619 = vmatpush1.bf16.msra.mxu0 %v8083_v60  ;;  %6906 = vmatpush1.bf16.msra.mxu1 %v8085_v20 }
 0x418   : > { %6620 = vmatprep.subr.bf16.mxu0 %v8092_v13  ;;  %6907 = vmatprep.subr.bf16.mxu1 %v8094_v21 }
 0x41b   : > { %6621 = vmatpush1.bf16.msra.mxu0 %v8091_v28  ;;  %6908 = vmatpush1.bf16.msra.mxu1 %v8093_v35 }
 0x41c   : > { %6622 = vmatprep.subr.bf16.mxu0 %v8100_v29  ;;  %6909 = vmatprep.subr.bf16.mxu1 %v8102_v31 }
 0x41f   : > { %6623 = vmatpush1.bf16.msra.mxu0 %v8099_v37  ;;  %6910 = vmatpush1.bf16.msra.mxu1 %v8101_v38 }
 0x420   : > { %6624 = vmatprep.subr.bf16.mxu0 %v8108_v39  ;;  %6911 = vmatprep.subr.bf16.mxu1 %v8110_v41 }
 0x423   : > { %6625 = vmatpush1.bf16.msra.mxu0 %v8107_v48  ;;  %6912 = vmatpush1.bf16.msra.mxu1 %v8109_v49 }
 0x424   : > { %6626 = vmatprep.subr.bf16.mxu0 %v8116_v30  ;;  %6913 = vmatprep.subr.bf16.mxu1 %v8118_v42 }
 0x427   : > { %6627 = vmatpush1.bf16.msra.mxu0 %v8115_v50  ;;  %6914 = vmatpush1.bf16.msra.mxu1 %v8117_v53 }
 0x42a   : > { %6629 = vmatmul.mubr.bf16.vlgmr.msra.gmra.mrb[4].mxu0 %v9555_v19  ;;  %6916 = vmatmul.mubr.bf16.vlgmr.msra.gmra.mrb[4].mxu1 %v9555_v19  ;;  %v6978_v19 = vld [vmem:[%s8965_s3] sm:$0xff] (!%p8119_p9) }
 0x42b   : > { %v6983_v3 = vrot.slane (!%p8119_p9), %v6978_v19, %v6982_v4  ;;  %v6987_v12 = vrot.slane (!%p8119_p9), %v6978_v19, %v6986_v5  ;;  %v6991_v18 = vrot.slane (!%p8119_p9), %v6978_v19, %v6990_v6  ;;  %v6995_v14 = vrot.slane (!%p8119_p9), %v6978_v19, %v6994_v7 }
 0x42c   : > { %v6999_v15 = vrot.slane (!%p8119_p9), %v6978_v19, %v6998_v32  ;;  %v7003_v16 = vrot.slane (!%p8119_p9), %v6978_v19, %v7002_v56  ;;  %v7007_v51 = vrot.slane (!%p8119_p9), %v6978_v19, %v7006_v8  ;;  %v7011_v26 = vrot.slane (!%p8119_p9), %v6978_v19, %v7010_v9 }
 0x42d   : > { %v7012_v60 = vcombine.low (!%p8119_p9), %v6983_v3, %v6987_v12  ;;  %v7013_v20 = vcombine.low (!%p8119_p9), %v6991_v18, %v6995_v14 }
 0x42e   : > { %v7029_v13 = vcombine.low (!%p8119_p9), %v6999_v15, %v7003_v16  ;;  %v7030_v21 = vcombine.low (!%p8119_p9), %v7007_v51, %v7011_v26 }
 0x42f   : > { %v7020_v22 = vrot.slane (!%p8119_p9), %v7012_v60, %v9006_v54  ;;  %v7027_v23 = vrot.slane (!%p8119_p9), %v7013_v20, %v9006_v54 }
 0x430   : > { %v7037_v25 = vrot.slane (!%p8119_p9), %v7029_v13, %v9006_v54  ;;  %v7044_v27 = vrot.slane (!%p8119_p9), %v7030_v21, %v9006_v54 }
 0x431   : > { %v7028_v28 = vcombine.low (!%p8119_p9), %v7020_v22, %v7027_v23 }
 0x432   : > { %v7045_v29 = vcombine.low (!%p8119_p9), %v7037_v25, %v7044_v27 }
 0x433   : > { %v7048_v31 = vadd.f32 (!%p8119_p9), %v7028_v28, %v6976_v45 }
 0x435   : > { %v7050_v34 = vmax.f32 (!%p8119_p9), %v7048_v31, 0.0 }
 0x437   : > { %7052 = vst [vmem:[%s8972_s18] sm:$0xff] (!%p8119_p9), %v7050_v34 }
 0x4fd   : > { %v6630_v17 = vpop.f32.mrb[4].mxu0  ;;  %v6917_v11 = vpop.f32.mrb[4].mxu1 }
 0x4fe   : > { %v6632_v10 = vpop.f32.mrb[5].mxu0  ;;  %v6919_v24 = vpop.f32.mrb[5].mxu1 }
 0x4ff   : > { %v6949_v55 = vcombine.low %v6630_v17, %v6632_v10  ;;  %v6634_v40 = vpop.f32.mrb[6].mxu0  ;;  %v6950_v57 = vcombine.low %v6917_v11, %v6919_v24  ;;  %v6921_v52 = vpop.f32.mrb[6].mxu1 }
 0x500   : > { %v6635_v58 = vpop.f32.mrb[7].mxu0  ;;  %v6922_v1 = vpop.f32.mrb[7].mxu1 }
 0x501   : > { %v6957_v59 = vrot.slane %v6949_v55, %v9006_v54  ;;  %v6964_v61 = vrot.slane %v6950_v57, %v9006_v54  ;;  %6975 = sbr.rel (%p8119_p9) target bundleno = 1300 (0x514), region = 52 }
 0x503   : > { %v6965_v63 = vcombine.low %v6957_v59, %v6964_v61 }
 0x505   : > { %v6969_v2 = vadd.f32 %v6965_v63, %v304_v62 }
 0x507   : > { %6971 = vst [vmem:[%s8972_s18 + $0x8] sm:$0xff] %v6969_v2 }
 0x50e   : > { %v6977_v35 = vld [vmem:[%s8972_s18 + $0x8] sm:$0xff] }
 0x50f   : > { %v7049_v33 = vadd.f32 %v7045_v29, %v6977_v35 }
 0x511   : > { %v7051_v0 = vmax.f32 %v7049_v33, 0.0 }
 0x513   : > { %7053 = vst [vmem:[%s8972_s18 + $0x8] sm:$0xff] %v7051_v0 }
 0x514 PF: > { %s10182_s21 = sld [smem:[#allocation14_spill]]  ;;  %s10183_s22 = sld [smem:[#allocation21_spill]] }
 0x515   : > { %s7071_s6 = sshll.u32 %s8972_s18, 4  ;;  %s7055_s0 = scalar_lea.sflag [#allocation4], %s8962_s1  ;;  %s7072_s6 = int_to_ptr.vmem [resolvable:$true] %s7071_s6 }
 0x516   : > { %s8463_s29 = scalar_lea.vmem %s7072_s6, 256  ;;  %p10185_p0 = scmp.ne.s32.totalorder %s10174_s11, 0 }
 0x517   : > { %p8464_p10 = scmp.ne.s32.totalorder %s7072_s6, %s8463_s29  ;;  %s8627_s7 = smov [#allocation8]  }
 0x518   : > { %s8467_s27 = sshll.u32 %s8627_s7, 4  ;;  %s8468_s27 = int_to_ptr.vmem [resolvable:$false] %s8467_s27 }
 0x519   : > { %p8465_p5 = pnand %p8464_p10, %p10185_p0  ;;  %s8469_s20 = scalar_lea.vmem %s8468_s27, 512 }
 0x51a   : > { %s8128_s30 = sshll.u32 %s10182_s21, 8  ;;  %s10184_s8 = smov %s10183_s22 }
 0x51b   : > { %s10059_s24 = scalar_lea.hbm %s10183_s22, %s8128_s30  ;;  %p8466_p3 = pneg %p8465_p5 }
 0x51c   : > { %p8470_p7 = scmp.lt.s32.totalorder %s7072_s6, %s8468_s27  ;;  %p8471_p12 = scmp.lt.s32.totalorder %s8469_s20, %s8463_s29 }
 0x51e   : > { %p8472_p8 = por %p8471_p12, %p8470_p7 }
 0x520   : > { %p8473_p13 = pnand %p8472_p8, %p8466_p3 }
 0x522   : > { %8476 = shalt.err (!%p8473_p13)
}
 0x523   : > { %s8477_s1 = scalar_lea.hbm %s10059_s24, 256  ;;  %s8481_s5 = scalar_lea.hbm %s10184_s8, 1024 }
 0x524   : > { %p8478_p1 = scmp.ne.s32.totalorder %s10059_s24, %s8477_s1  ;;  %p8482_p6 = scmp.lt.u32.totalorder %s10059_s24, %s10184_s8 }
 0x525   : > { %p8483_p11 = scmp.lt.u32.totalorder %s8481_s5, %s8477_s1  ;;  %p8485_p10 = scmp.lt.u32.totalorder %s8477_s1, %s10059_s24 }
 0x526   : > { %p8479_p4 = pnand %p8478_p1, %p10185_p0 }
 0x527   : > { %p8484_p9 = por %p8483_p11, %p8482_p6 }
 0x528   : > { %p8480_p2 = pneg %p8479_p4 }
 0x529   : > { %p8486_p5 = por %p8485_p10, %p8484_p9 }
 0x52b   : > { %p8487_p3 = pnand %p8486_p5, %p8480_p2 }
 0x52d   : > { %8490 = shalt.err (!%p8487_p3)
}
 0x52e   : > { %8235 = dma.vmem_to_hbm [thread:$0]  (%p10185_p0), %s7072_s6, 256, %s10059_s24, %s7055_s0  }
 0x52f PF: > { %p8252_p7 = scmp.ge.s32.totalorder %s8617_s25, 2  ;;  %s7083_s30 = sand.u32 1, %s8565_s12  }
 0x530   : > { %p10186_p12 = scmp.ne.s32.totalorder %s10175_s15, 0  ;;  %s7084_s4 = scalar_lea.sflag [#allocation4], %s7083_s30 }
 0x532   : > { %p8248_p8 = pnand %p8252_p7, %p10186_p12 }
 0x534   : > { %8560 = dma.done.wait (!%p8248_p8), %s7084_s4, 256  }
 0x535   : > { %8562 = vsyncadd (!%p8248_p8), %s7084_s4, 4294967040  ;;  %s22_s25 = sadd.s32 1, %s8617_s25   ;;  %s10188_s11 = sld [smem:[#allocation13_spill]] }
 0x536   : > { %p10085_p13 = scmp.ge.s32.totalorder %s22_s25, 58   ;;  %s10189_s20 = sld [smem:[#allocation18_spill]] }
 0x537   : > { %s10190_s22 = sld [smem:[#allocation15_spill]]  ;;  %s10191_s24 = sld [smem:[#allocation16_spill]] }
 0x538   : > { %s10192_s6 = sld [smem:[#allocation17_spill]]  ;;  %s10193_s12 = smov %s8569_s13 }
 0x539   : > { %s10194_s13 = smov %s8573_s14  ;;  %s10195_s14 = smov %s8882_s28 }
 0x53a   : > { %s10196_s15 = smov %s8581_s16  ;;  %s10197_s16 = smov %s8585_s17 }
 0x53b   : > { %s10198_s17 = smov %s8841_s26  ;;  %s10199_s18 = smov %s8593_s19 }
 0x53c   : > { %s10200_s19 = smov %s10188_s11  ;;  %s10201_s21 = smov %s8609_s23 }
 0x53d   : > { %s10202_s23 = smov %s10191_s24  ;;  %21 = sbr.rel (!%p10085_p13) target bundleno = 16 (0x10), region = 109 }
 0x53e   : > { %s10203_s24 = smov %s10192_s6 }
 0x544   :  { %7089 = vsyncpa [#allocation3], 1 }
 0x545   :  { %7091 = vsyncpa [#allocation3 + $0x1], 1 }
 0x546   :  { %7092 = vsyncpa [#allocation6], 1 }
 0x547   :  { %7094 = vsyncpa [#allocation6 + $0x1], 1 }
 0x548   :  { %7095 = vsyncpa [#allocation4], 1 }
 0x549   :  { %7097 = vsyncpa [#allocation4 + $0x1], 1 }

</bundles_post_ra>
